<compile_context>
chip_gen: v7x
topology: tpu7x:2x2x1
jax: 0.10.0
libtpu: 0.0.40
codegen_flags: <defaults>
</compile_context>

<pallas_src>
import functools

import jax
import jax.numpy as jnp
from jax import lax
from jax.experimental import pallas as pl
from jax.experimental.pallas import tpu as pltpu

HIDDEN = 128  # module default hidden_size / mlp dims


# ----------------------------- shared math ----------------------------------

def _lstm_elementwise(gates, cx):
    """LSTMCell elementwise part (gate order i,f,g,o), all f32."""
    H = HIDDEN
    i_g = jax.nn.sigmoid(gates[:, 0 * H:1 * H])
    f_g = jax.nn.sigmoid(gates[:, 1 * H:2 * H])
    g_g = jnp.tanh(gates[:, 2 * H:3 * H])
    o_g = jax.nn.sigmoid(gates[:, 3 * H:4 * H])
    c_new = f_g * cx + i_g * g_g
    h_new = o_g * jnp.tanh(c_new)
    return h_new, c_new


def _mlp_ih_math(x_bf16, w0, w1, w2, b_mlp, w_ih):
    """relu-MLP followed by the input-hidden LSTM matmul (bias_ih == 0)."""
    bf16, f32 = jnp.bfloat16, jnp.float32
    h = jnp.maximum(jnp.dot(x_bf16, w0, preferred_element_type=f32) + b_mlp[0:1, :], 0.0)
    h = jnp.maximum(jnp.dot(h.astype(bf16), w1, preferred_element_type=f32) + b_mlp[1:2, :], 0.0)
    h = jnp.maximum(jnp.dot(h.astype(bf16), w2, preferred_element_type=f32) + b_mlp[2:3, :], 0.0)
    return jnp.dot(h.astype(bf16), w_ih, preferred_element_type=f32)


def _single_step_math(x, hx, cx, w0, w1, w2, b_mlp, w_ih, w_hh, w_head):
    """One full ActorCritic step (used by the single-step kernel + reference)."""
    bf16, f32 = jnp.bfloat16, jnp.float32
    gates_ih = _mlp_ih_math(x.astype(bf16), w0, w1, w2, b_mlp, w_ih)
    gates = gates_ih + jnp.dot(hx.astype(bf16), w_hh, preferred_element_type=f32)
    h_new, c_new = _lstm_elementwise(gates, cx)
    head = jnp.dot(h_new.astype(bf16), w_head, preferred_element_type=f32)
    return head, h_new, c_new


# ----------------------------- helpers ---------------------------------------

def _whole(arr):
    """Whole-array block with a constant index_map (DMA'd once, VMEM-resident)."""
    nd = arr.ndim
    return pl.BlockSpec(arr.shape, lambda *args, _nd=nd: (0,) * _nd)


def _pick_time_chunk(T, max_chunk=8):
    for tc in range(min(T, max_chunk), 0, -1):
        if T % tc == 0:
            return tc
    return 1


def _pick_row_block(n_rows, max_rows=1024):
    if n_rows <= max_rows:
        return n_rows
    for rb in range(max_rows, 7, -1):
        if n_rows % rb == 0 and rb % 8 == 0:
            return rb
    return n_rows


# ------------------- phase 1: batched MLP + input-hidden matmul --------------

def _mlp_ih_kernel(x_ref, w0_ref, w1_ref, w2_ref, bmlp_ref, wih_ref, gih_ref):
    gih_ref[...] = _mlp_ih_math(x_ref[...], w0_ref[...], w1_ref[...],
                                w2_ref[...], bmlp_ref[...], wih_ref[...])


def _batched_mlp_ih(x_flat_bf16, params):
    n, ob = x_flat_bf16.shape
    H = HIDDEN
    rb = _pick_row_block(n)
    return pl.pallas_call(
        _mlp_ih_kernel,
        grid=(n // rb,),
        out_shape=jax.ShapeDtypeStruct((n, 4 * H), jnp.float32),
        in_specs=[pl.BlockSpec((rb, ob), lambda r: (r, 0)),
                  _whole(params["w0"]), _whole(params["w1"]), _whole(params["w2"]),
                  _whole(params["b_mlp"]), _whole(params["w_ih"])],
        out_specs=pl.BlockSpec((rb, 4 * H), lambda r: (r, 0)),
        compiler_params=pltpu.CompilerParams(dimension_semantics=("parallel",)),
    )(x_flat_bf16, params["w0"], params["w1"], params["w2"],
      params["b_mlp"], params["w_ih"])


# ------------------- phase 2: chunked serial recurrence ----------------------

def _recurrent_kernel(gih_ref, hx0_ref, cx0_ref, whh_ref,
                      hall_ref, hxT_ref, cxT_ref, hx_s, cx_s):
    i = pl.program_id(0)

    @pl.when(i == 0)
    def _():
        hx_s[...] = hx0_ref[...]
        cx_s[...] = cx0_ref[...]

    whh = whh_ref[...]           # hoisted: loaded once per chunk
    Tc = gih_ref.shape[0]

    def step(t, carry):
        hx = hx_s[...]
        cx = cx_s[...]
        gates = gih_ref[t] + jnp.dot(hx.astype(jnp.bfloat16), whh,
                                     preferred_element_type=jnp.float32)
        h_new, c_new = _lstm_elementwise(gates, cx)
        hx_s[...] = h_new
        cx_s[...] = c_new
        hall_ref[t] = h_new.astype(hall_ref.dtype)   # bf16 writeback
        return carry

    lax.fori_loop(0, Tc, step, 0, unroll=True)

    @pl.when(i == pl.num_programs(0) - 1)
    def _():
        hxT_ref[...] = hx_s[...]
        cxT_ref[...] = cx_s[...]


def _recurrence(gates_ih, hx0, cx0, w_hh, Tc):
    T, B, fourH = gates_ih.shape
    H = HIDDEN
    return pl.pallas_call(
        _recurrent_kernel,
        grid=(T // Tc,),
        out_shape=(jax.ShapeDtypeStruct((T, B, H), jnp.bfloat16),   # h[t] for head
                   jax.ShapeDtypeStruct((B, H), jnp.float32),       # final hx
                   jax.ShapeDtypeStruct((B, H), jnp.float32)),      # final cx
        in_specs=[pl.BlockSpec((Tc, B, fourH), lambda i: (i, 0, 0)),
                  _whole(hx0), _whole(cx0), _whole(w_hh)],
        out_specs=(pl.BlockSpec((Tc, B, H), lambda i: (i, 0, 0)),
                   pl.BlockSpec((B, H), lambda i: (0, 0)),
                   pl.BlockSpec((B, H), lambda i: (0, 0))),
        scratch_shapes=[pltpu.VMEM((B, H), jnp.float32),   # hx carry (f32)
                        pltpu.VMEM((B, H), jnp.float32)],  # cx carry (f32)
        compiler_params=pltpu.CompilerParams(dimension_semantics=("arbitrary",)),
    )(gates_ih, hx0, cx0, w_hh)


# ------------------- phase 3: batched fused critic|actor head ----------------

def _head_kernel(h_ref, whead_ref, head_ref):
    head_ref[...] = jnp.dot(h_ref[...], whead_ref[...],
                            preferred_element_type=jnp.float32)


def _batched_head(h_flat_bf16, w_head):
    n, H = h_flat_bf16.shape
    rb = _pick_row_block(n)
    return pl.pallas_call(
        _head_kernel,
        grid=(n // rb,),
        out_shape=jax.ShapeDtypeStruct((n, H), jnp.float32),
        in_specs=[pl.BlockSpec((rb, H), lambda r: (r, 0)), _whole(w_head)],
        out_specs=pl.BlockSpec((rb, H), lambda r: (r, 0)),
        compiler_params=pltpu.CompilerParams(dimension_semantics=("parallel",)),
    )(h_flat_bf16, w_head)


# ------------------- fused T-step rollout (3-phase pipeline) ------------------

def actor_critic_rollout(xs, hx0, cx0, params, act_dim, time_chunk=8):
    """Run T ActorCritic steps: batched MLP+ih matmul, chunked serial LSTM
    recurrence, batched fused head.  Returns (values [T,B,1], logits [T,B,act],
    (hxT, cxT))."""
    T, B, ob = xs.shape
    H = HIDDEN
    Tc = _pick_time_chunk(T, time_chunk)

    # phase 1: gates_ih for all T*B rows (MXU row-occupancy ~ T*B, not B)
    xs_flat = xs.reshape(T * B, ob).astype(jnp.bfloat16)
    gates_ih = _batched_mlp_ih(xs_flat, params).reshape(T, B, 4 * H)

    # phase 2: only hx @ w_hh + LSTM elementwise on the serial chain
    h_all, hxT, cxT = _recurrence(gates_ih, hx0, cx0, params["w_hh"], Tc)

    # phase 3: deferred batched critic|actor head
    head = _batched_head(h_all.reshape(T * B, H), params["w_head"]).reshape(T, B, H)
    values = head[:, :, :1]
    logits = head[:, :, 1:1 + act_dim]
    return values, logits, (hxT, cxT)


# ----------------------------- single step -----------------------------------

def _step_kernel(x_ref, hx_ref, cx_ref, w0_ref, w1_ref, w2_ref, bmlp_ref,
                 wih_ref, whh_ref, whead_ref, head_ref, hxo_ref, cxo_ref):
    head, h_new, c_new = _single_step_math(
        x_ref[...], hx_ref[...], cx_ref[...], w0_ref[...], w1_ref[...],
        w2_ref[...], bmlp_ref[...], wih_ref[...], whh_ref[...], whead_ref[...])
    head_ref[...] = head
    hxo_ref[...] = h_new
    cxo_ref[...] = c_new


def actor_critic_step(x, hx, cx, params, act_dim):
    """Single ActorCritic.forward -> (value, logits, (hx, cx)).
    (Steppers driving many timesteps should use actor_critic_rollout so the
    weights are not re-DMA'd every call.)"""
    B = x.shape[0]
    vmem = pl.BlockSpec(memory_space=pltpu.MemorySpace.VMEM)
    inputs = (x, hx, cx, params["w0"], params["w1"], params["w2"],
              params["b_mlp"], params["w_ih"], params["w_hh"], params["w_head"])
    head, hx_new, cx_new = pl.pallas_call(
        _step_kernel,
        out_shape=(
            jax.ShapeDtypeStruct((B, HIDDEN), jnp.float32),  # fused head (lane-dense)
            jax.ShapeDtypeStruct((B, HIDDEN), jnp.float32),  # hx
            jax.ShapeDtypeStruct((B, HIDDEN), jnp.float32),  # cx
        ),
        in_specs=[vmem] * len(inputs),
        out_specs=(vmem, vmem, vmem),
        # reuse the recurrent-state HBM buffers in place (hx->hx_out, cx->cx_out)
        input_output_aliases={1: 1, 2: 2},
    )(*inputs)
    value = head[:, :1]
    logits = head[:, 1:1 + act_dim]
    return value, logits, (hx_new, cx_new)


# ------------------------------ parameters ------------------------------------

def init_params(key, ob_dim, act_dim, hidden=HIDDEN):
    assert 1 + act_dim <= hidden, "fused head assumes 1 + act_dim <= 128"
    ks = jax.random.split(key, 10)
    bf16 = jnp.bfloat16

    def xavier(k, fan_in, fan_out):
        # torch.nn.init.xavier_uniform_ (gain=1), stored transposed [in, out]
        a = (6.0 / (fan_in + fan_out)) ** 0.5
        return jax.random.uniform(k, (fan_in, fan_out), jnp.float32, -a, a)

    def torch_default(k, fan_in, shape):
        # PyTorch default U(-1/sqrt(fan_in), 1/sqrt(fan_in))
        a = 1.0 / (fan_in ** 0.5)
        return jax.random.uniform(k, shape, jnp.float32, -a, a)

    # MLP weights hit by weights_init (xavier); biases keep the nn.Linear
    # default init.  Biases packed into one (3, H) array -> single DMA.
    w0 = xavier(ks[0], ob_dim, hidden)
    w1 = xavier(ks[1], hidden, hidden)
    w2 = xavier(ks[2], hidden, hidden)
    b_mlp = jnp.stack([
        torch_default(ks[3], ob_dim, (hidden,)),
        torch_default(ks[4], hidden, (hidden,)),
        torch_default(ks[5], hidden, (hidden,)),
    ])  # (3, hidden) f32

    # LSTMCell has no `.weight` attr, so weights_init leaves the PyTorch default
    # U(+-1/sqrt(H)); gate order i,f,g,o; stored transposed [H, 4H].
    # bias_ih / bias_hh are zero-filled in the module -> dropped.
    w_ih = torch_default(ks[6], hidden, (hidden, 4 * hidden))
    w_hh = torch_default(ks[7], hidden, (hidden, 4 * hidden))

    # Heads: xavier weights, biases zero-filled in the module -> dropped.
    # Fused as [wc | wa | 0-pad] -> (H, H) lane-dense output.
    wc = xavier(ks[8], hidden, 1)
    wa = xavier(ks[9], hidden, act_dim)
    w_head = jnp.zeros((hidden, hidden), jnp.float32)
    w_head = w_head.at[:, 0:1].set(wc)
    w_head = w_head.at[:, 1:1 + act_dim].set(wa)

    return {
        "w0": w0.astype(bf16), "w1": w1.astype(bf16), "w2": w2.astype(bf16),
        "b_mlp": b_mlp,                      # f32
        "w_ih": w_ih.astype(bf16), "w_hh": w_hh.astype(bf16),
        "w_head": w_head.astype(bf16),
    }


# ------------------------------ references ------------------------------------

def _reference_step(x, hx, cx, p):
    return _single_step_math(x, hx, cx, p["w0"], p["w1"], p["w2"], p["b_mlp"],
                             p["w_ih"], p["w_hh"], p["w_head"])


def _reference_rollout(xs, hx, cx, p, act_dim):
    """Pure-JAX reference using the identical 3-phase math (bf16 operands,
    f32 accumulation/elementwise, h[t] stored bf16 before the head matmul)."""
    bf16, f32 = jnp.bfloat16, jnp.float32
    T, B, ob = xs.shape
    H = HIDDEN
    gih = _mlp_ih_math(xs.reshape(T * B, ob).astype(bf16), p["w0"], p["w1"],
                       p["w2"], p["b_mlp"], p["w_ih"]).reshape(T, B, 4 * H)
    hs = []
    for t in range(T):
        gates = gih[t] + jnp.dot(hx.astype(bf16), p["w_hh"],
                                 preferred_element_type=f32)
        hx, cx = _lstm_elementwise(gates, cx)
        hs.append(hx.astype(bf16))
    h_all = jnp.stack(hs)
    head = jnp.dot(h_all.reshape(T * B, H), p["w_head"],
                   preferred_element_type=f32).reshape(T, B, H)
    return head[:, :, :1], head[:, :, 1:1 + act_dim], (hx, cx)


# --------------------------------- main ----------------------------------------

if __name__ == "__main__":
    key = jax.random.PRNGKey(0)
    kp, kx, kh, kc, kxs = jax.random.split(key, 5)

    batch, ob_dim, act_dim, T = 8, 16, 6, 16
    params = init_params(kp, ob_dim, act_dim)

    x = jax.random.normal(kx, (batch, ob_dim), jnp.float32)
    hx = jax.random.normal(kh, (batch, HIDDEN), jnp.float32)
    cx = jax.random.normal(kc, (batch, HIDDEN), jnp.float32)
    xs = jax.random.normal(kxs, (T, batch, ob_dim), jnp.float32)

    # pure-JAX references (identical math) computed up front
    # NOTE: the recurrent state is carried in f32; only the matmul operands are
    # bf16, so long-T drift vs a pure-f32 PyTorch module stays bounded by the
    # bf16 matmul precision.
    ref_head, ref_h, ref_c = _reference_step(x, hx, cx, params)
    ref_v, ref_lg, (ref_hT, ref_cT) = _reference_rollout(xs, hx, cx, params, act_dim)
    jax.block_until_ready((ref_head, ref_h, ref_c, ref_v, ref_lg, ref_hT, ref_cT))

    # fused T-step rollout (batched MLP+ih -> chunked recurrence -> batched head)
    roll_fn = jax.jit(functools.partial(actor_critic_rollout, act_dim=act_dim))
    values, logits_seq, (hxT, cxT) = roll_fn(xs, hx, cx, params)
    jax.block_until_ready((values, logits_seq, hxT, cxT))

    # single-step kernel (exact module forward interface)
    step_fn = jax.jit(functools.partial(actor_critic_step, act_dim=act_dim))
    value, logits, (hx1, cx1) = step_fn(x, hx, cx, params)
    jax.block_until_ready((value, logits, hx1, cx1))

    tol = dict(atol=1e-3, rtol=1e-3)
    assert jnp.allclose(value, ref_head[:, :1], **tol), "value mismatch"
    assert jnp.allclose(logits, ref_head[:, 1:1 + act_dim], **tol), "logits mismatch"
    assert jnp.allclose(hx1, ref_h, **tol), "hx mismatch"
    assert jnp.allclose(cx1, ref_c, **tol), "cx mismatch"
    assert jnp.allclose(values, ref_v, **tol), "rollout value mismatch"
    assert jnp.allclose(logits_seq, ref_lg, **tol), "rollout logits mismatch"
    assert jnp.allclose(hxT, ref_hT, **tol), "rollout hx mismatch"
    assert jnp.allclose(cxT, ref_cT, **tol), "rollout cx mismatch"

    print("KERNEL_OK")
</pallas_src>

<mosaic_0001>
module attributes {stable_mosaic.version = 11 : i64} {
  func.func @_head_kernel(%arg0: i32, %arg1: memref<128x128xbf16, #tpu.memory_space<vmem>>, %arg2: memref<128x128xbf16, #tpu.memory_space<vmem>>, %arg3: memref<128x128xf32, #tpu.memory_space<vmem>>) attributes {dimension_semantics = [#tpu.dimension_semantics<parallel>], iteration_bounds = array<i64: 1>, scalar_prefetch = 0 : i64, scratch_operands = 0 : i64, tpu.core_type = #tpu.core_type<tc>, window_params = [{transform_indices = @transform_0, window_bounds = array<i64: 128, 128>}, {pipeline_mode = #tpu.pipeline_mode<synchronous>, transform_indices = @transform_1, window_bounds = array<i64: 128, 128>}, {transform_indices = @transform_2, window_bounds = array<i64: 128, 128>}]} {
    %c0 = arith.constant 0 : index
    %c0_0 = arith.constant 0 : index
    %0 = vector.load %arg1[%c0, %c0_0] : memref<128x128xbf16, #tpu.memory_space<vmem>>, vector<128x128xbf16>
    %c0_1 = arith.constant 0 : index
    %c0_2 = arith.constant 0 : index
    %1 = vector.load %arg2[%c0_1, %c0_2] : memref<128x128xbf16, #tpu.memory_space<vmem>>, vector<128x128xbf16>
    %cst = arith.constant dense<0.000000e+00> : vector<128x128xf32>
    %2 = tpu.matmul %0, %1, %cst {dimension_numbers = #tpu.dot_dimension_numbers<[1], [0], [0], [1], [0, 0, 1, 1], [], []>} : vector<128x128xbf16>, vector<128x128xbf16>, vector<128x128xf32> -> vector<128x128xf32>
    %c0_3 = arith.constant 0 : index
    %c0_4 = arith.constant 0 : index
    %3 = vector.load %arg3[%c0_3, %c0_4] : memref<128x128xf32, #tpu.memory_space<vmem>>, vector<128x128xf32>
    tpu.vector_store %arg3[%c0_3, %c0_4], %2 {strides = array<i32>} : memref<128x128xf32, #tpu.memory_space<vmem>>, vector<128x128xf32>,
    return
  }
  func.func @transform_0(%arg0: i32) -> (i32, i32) {
    %c0_i32 = arith.constant 0 : i32
    %c0_i32_0 = arith.constant 0 : i32
    return %arg0, %c0_i32 : i32, i32
  }
  func.func @transform_1(%arg0: i32) -> (i32, i32) {
    %c0_i32 = arith.constant 0 : i32
    %c0_i32_0 = arith.constant 0 : i32
    %c0_i32_1 = arith.constant 0 : i32
    return %c0_i32, %c0_i32_0 : i32, i32
  }
  func.func @transform_2(%arg0: i32) -> (i32, i32) {
    %c0_i32 = arith.constant 0 : i32
    %c0_i32_0 = arith.constant 0 : i32
    return %arg0, %c0_i32 : i32, i32
  }
}

module attributes {stable_mosaic.version = 11 : i64} {
  func.func @_mlp_ih_kernel(%arg0: i32, %arg1: memref<128x16xbf16, #tpu.memory_space<vmem>>, %arg2: memref<16x128xbf16, #tpu.memory_space<vmem>>, %arg3: memref<128x128xbf16, #tpu.memory_space<vmem>>, %arg4: memref<128x128xbf16, #tpu.memory_space<vmem>>, %arg5: memref<3x128xf32, #tpu.memory_space<vmem>>, %arg6: memref<128x512xbf16, #tpu.memory_space<vmem>>, %arg7: memref<128x512xf32, #tpu.memory_space<vmem>>) attributes {dimension_semantics = [#tpu.dimension_semantics<parallel>], iteration_bounds = array<i64: 1>, scalar_prefetch = 0 : i64, scratch_operands = 0 : i64, tpu.core_type = #tpu.core_type<tc>, window_params = [{transform_indices = @transform_0, window_bounds = array<i64: 128, 16>}, {pipeline_mode = #tpu.pipeline_mode<synchronous>, transform_indices = @transform_1, window_bounds = array<i64: 16, 128>}, {pipeline_mode = #tpu.pipeline_mode<synchronous>, transform_indices = @transform_2, window_bounds = array<i64: 128, 128>}, {pipeline_mode = #tpu.pipeline_mode<synchronous>, transform_indices = @transform_3, window_bounds = array<i64: 128, 128>}, {pipeline_mode = #tpu.pipeline_mode<synchronous>, transform_indices = @transform_4, window_bounds = array<i64: 3, 128>}, {pipeline_mode = #tpu.pipeline_mode<synchronous>, transform_indices = @transform_5, window_bounds = array<i64: 128, 512>}, {transform_indices = @transform_6, window_bounds = array<i64: 128, 512>}]} {
    %c0 = arith.constant 0 : index
    %c0_0 = arith.constant 0 : index
    %0 = vector.load %arg1[%c0, %c0_0] : memref<128x16xbf16, #tpu.memory_space<vmem>>, vector<128x16xbf16>
    %c0_1 = arith.constant 0 : index
    %c0_2 = arith.constant 0 : index
    %1 = vector.load %arg2[%c0_1, %c0_2] : memref<16x128xbf16, #tpu.memory_space<vmem>>, vector<16x128xbf16>
    %c0_3 = arith.constant 0 : index
    %c0_4 = arith.constant 0 : index
    %2 = vector.load %arg3[%c0_3, %c0_4] : memref<128x128xbf16, #tpu.memory_space<vmem>>, vector<128x128xbf16>
    %c0_5 = arith.constant 0 : index
    %c0_6 = arith.constant 0 : index
    %3 = vector.load %arg4[%c0_5, %c0_6] : memref<128x128xbf16, #tpu.memory_space<vmem>>, vector<128x128xbf16>
    %c0_7 = arith.constant 0 : index
    %c0_8 = arith.constant 0 : index
    %4 = vector.load %arg5[%c0_7, %c0_8] : memref<3x128xf32, #tpu.memory_space<vmem>>, vector<3x128xf32>
    %c0_9 = arith.constant 0 : index
    %c0_10 = arith.constant 0 : index
    %5 = vector.load %arg6[%c0_9, %c0_10] : memref<128x512xbf16, #tpu.memory_space<vmem>>, vector<128x512xbf16>
    %cst = arith.constant dense<0.000000e+00> : vector<128x128xf32>
    %6 = tpu.matmul %0, %1, %cst {dimension_numbers = #tpu.dot_dimension_numbers<[1], [0], [0], [1], [0, 0, 1, 1], [], []>} : vector<128x16xbf16>, vector<16x128xbf16>, vector<128x128xf32> -> vector<128x128xf32>
    %7 = vector.extract_strided_slice %4 {offsets = [0, 0], sizes = [1, 128], strides = [1, 1]} : vector<3x128xf32> to vector<1x128xf32>
    %8 = vector.broadcast %7 : vector<1x128xf32> to vector<128x128xf32>
    %9 = arith.addf %6, %8 : vector<128x128xf32>
    %cst_11 = arith.constant 0.000000e+00 : f32
    %10 = vector.broadcast %cst_11 : f32 to vector<128x128xf32>
    %11 = arith.maximumf %9, %10 : vector<128x128xf32>
    %12 = arith.truncf %11 : vector<128x128xf32> to vector<128x128xbf16>
    %cst_12 = arith.constant dense<0.000000e+00> : vector<128x128xf32>
    %13 = tpu.matmul %12, %2, %cst_12 {dimension_numbers = #tpu.dot_dimension_numbers<[1], [0], [0], [1], [0, 0, 1, 1], [], []>} : vector<128x128xbf16>, vector<128x128xbf16>, vector<128x128xf32> -> vector<128x128xf32>
    %14 = vector.extract_strided_slice %4 {offsets = [1, 0], sizes = [1, 128], strides = [1, 1]} : vector<3x128xf32> to vector<1x128xf32>
    %15 = vector.broadcast %14 : vector<1x128xf32> to vector<128x128xf32>
    %16 = arith.addf %13, %15 : vector<128x128xf32>
    %cst_13 = arith.constant 0.000000e+00 : f32
    %17 = vector.broadcast %cst_13 : f32 to vector<128x128xf32>
    %18 = arith.maximumf %16, %17 : vector<128x128xf32>
    %19 = arith.truncf %18 : vector<128x128xf32> to vector<128x128xbf16>
    %cst_14 = arith.constant dense<0.000000e+00> : vector<128x128xf32>
    %20 = tpu.matmul %19, %3, %cst_14 {dimension_numbers = #tpu.dot_dimension_numbers<[1], [0], [0], [1], [0, 0, 1, 1], [], []>} : vector<128x128xbf16>, vector<128x128xbf16>, vector<128x128xf32> -> vector<128x128xf32>
    %21 = vector.extract_strided_slice %4 {offsets = [2, 0], sizes = [1, 128], strides = [1, 1]} : vector<3x128xf32> to vector<1x128xf32>
    %22 = vector.broadcast %21 : vector<1x128xf32> to vector<128x128xf32>
    %23 = arith.addf %20, %22 : vector<128x128xf32>
    %cst_15 = arith.constant 0.000000e+00 : f32
    %24 = vector.broadcast %cst_15 : f32 to vector<128x128xf32>
    %25 = arith.maximumf %23, %24 : vector<128x128xf32>
    %26 = arith.truncf %25 : vector<128x128xf32> to vector<128x128xbf16>
    %cst_16 = arith.constant dense<0.000000e+00> : vector<128x512xf32>
    %27 = tpu.matmul %26, %5, %cst_16 {dimension_numbers = #tpu.dot_dimension_numbers<[1], [0], [0], [1], [0, 0, 1, 1], [], []>} : vector<128x128xbf16>, vector<128x512xbf16>, vector<128x512xf32> -> vector<128x512xf32>
    %c0_17 = arith.constant 0 : index
    %c0_18 = arith.constant 0 : index
    %28 = vector.load %arg7[%c0_17, %c0_18] : memref<128x512xf32, #tpu.memory_space<vmem>>, vector<128x512xf32>
    tpu.vector_store %arg7[%c0_17, %c0_18], %27 {strides = array<i32>} : memref<128x512xf32, #tpu.memory_space<vmem>>, vector<128x512xf32>,
    return
  }
  func.func @transform_0(%arg0: i32) -> (i32, i32) {
    %c0_i32 = arith.constant 0 : i32
    %c0_i32_0 = arith.constant 0 : i32
    return %arg0, %c0_i32 : i32, i32
  }
  func.func @transform_1(%arg0: i32) -> (i32, i32) {
    %c0_i32 = arith.constant 0 : i32
    %c0_i32_0 = arith.constant 0 : i32
    %c0_i32_1 = arith.constant 0 : i32
    return %c0_i32, %c0_i32_0 : i32, i32
  }
  func.func @transform_2(%arg0: i32) -> (i32, i32) {
    %c0_i32 = arith.constant 0 : i32
    %c0_i32_0 = arith.constant 0 : i32
    %c0_i32_1 = arith.constant 0 : i32
    return %c0_i32, %c0_i32_0 : i32, i32
  }
  func.func @transform_3(%arg0: i32) -> (i32, i32) {
    %c0_i32 = arith.constant 0 : i32
    %c0_i32_0 = arith.constant 0 : i32
    %c0_i32_1 = arith.constant 0 : i32
    return %c0_i32, %c0_i32_0 : i32, i32
  }
  func.func @transform_4(%arg0: i32) -> (i32, i32) {
    %c0_i32 = arith.constant 0 : i32
    %c0_i32_0 = arith.constant 0 : i32
    %c0_i32_1 = arith.constant 0 : i32
    return %c0_i32, %c0_i32_0 : i32, i32
  }
  func.func @transform_5(%arg0: i32) -> (i32, i32) {
    %c0_i32 = arith.constant 0 : i32
    %c0_i32_0 = arith.constant 0 : i32
    %c0_i32_1 = arith.constant 0 : i32
    return %c0_i32, %c0_i32_0 : i32, i32
  }
  func.func @transform_6(%arg0: i32) -> (i32, i32) {
    %c0_i32 = arith.constant 0 : i32
    %c0_i32_0 = arith.constant 0 : i32
    return %arg0, %c0_i32 : i32, i32
  }
}

module attributes {stable_mosaic.version = 11 : i64} {
  func.func @_recurrent_kernel(%arg0: i32, %arg1: memref<8x8x512xf32, #tpu.memory_space<vmem>>, %arg2: memref<8x128xf32, #tpu.memory_space<vmem>>, %arg3: memref<8x128xf32, #tpu.memory_space<vmem>>, %arg4: memref<128x512xbf16, #tpu.memory_space<vmem>>, %arg5: memref<8x8x128xbf16, #tpu.memory_space<vmem>>, %arg6: memref<8x128xf32, #tpu.memory_space<vmem>>, %arg7: memref<8x128xf32, #tpu.memory_space<vmem>>, %arg8: memref<8x128xf32, #tpu.memory_space<vmem>>, %arg9: memref<8x128xf32, #tpu.memory_space<vmem>>) attributes {dimension_semantics = [#tpu.dimension_semantics<arbitrary>], iteration_bounds = array<i64: 2>, scalar_prefetch = 0 : i64, scratch_operands = 2 : i64, tpu.core_type = #tpu.core_type<tc>, window_params = [{transform_indices = @transform_0, window_bounds = array<i64: 8, 8, 512>}, {pipeline_mode = #tpu.pipeline_mode<synchronous>, transform_indices = @transform_1, window_bounds = array<i64: 8, 128>}, {pipeline_mode = #tpu.pipeline_mode<synchronous>, transform_indices = @transform_2, window_bounds = array<i64: 8, 128>}, {pipeline_mode = #tpu.pipeline_mode<synchronous>, transform_indices = @transform_3, window_bounds = array<i64: 128, 512>}, {transform_indices = @transform_4, window_bounds = array<i64: 8, 8, 128>}, {pipeline_mode = #tpu.pipeline_mode<synchronous>, transform_indices = @transform_5, window_bounds = array<i64: 8, 128>}, {pipeline_mode = #tpu.pipeline_mode<synchronous>, transform_indices = @transform_6, window_bounds = array<i64: 8, 128>}]} {
    %c0_i32 = arith.constant 0 : i32
    %0 = arith.cmpi eq, %arg0, %c0_i32 : i32
    %1 = arith.extui %0 : i1 to i32
    %c0_i32_0 = arith.constant 0 : i32
    %2 = arith.cmpi ne, %1, %c0_i32_0 : i32
    scf.if %2 {
      %c0_132 = arith.constant 0 : index
      %c0_133 = arith.constant 0 : index
      %327 = vector.load %arg2[%c0_132, %c0_133] : memref<8x128xf32, #tpu.memory_space<vmem>>, vector<8x128xf32>
      %c0_134 = arith.constant 0 : index
      %c0_135 = arith.constant 0 : index
      %328 = vector.load %arg8[%c0_134, %c0_135] : memref<8x128xf32, #tpu.memory_space<vmem>>, vector<8x128xf32>
      tpu.vector_store %arg8[%c0_134, %c0_135], %327 {strides = array<i32>} : memref<8x128xf32, #tpu.memory_space<vmem>>, vector<8x128xf32>,
      %c0_136 = arith.constant 0 : index
      %c0_137 = arith.constant 0 : index
      %329 = vector.load %arg3[%c0_136, %c0_137] : memref<8x128xf32, #tpu.memory_space<vmem>>, vector<8x128xf32>
      %c0_138 = arith.constant 0 : index
      %c0_139 = arith.constant 0 : index
      %330 = vector.load %arg9[%c0_138, %c0_139] : memref<8x128xf32, #tpu.memory_space<vmem>>, vector<8x128xf32>
      tpu.vector_store %arg9[%c0_138, %c0_139], %329 {strides = array<i32>} : memref<8x128xf32, #tpu.memory_space<vmem>>, vector<8x128xf32>,
    } else {
    }
    %c0 = arith.constant 0 : index
    %c0_1 = arith.constant 0 : index
    %3 = vector.load %arg4[%c0, %c0_1] : memref<128x512xbf16, #tpu.memory_space<vmem>>, vector<128x512xbf16>
    %c0_i32_2 = arith.constant 0 : i32
    %c0_3 = arith.constant 0 : index
    %c0_4 = arith.constant 0 : index
    %4 = vector.load %arg8[%c0_3, %c0_4] : memref<8x128xf32, #tpu.memory_space<vmem>>, vector<8x128xf32>
    %c0_5 = arith.constant 0 : index
    %c0_6 = arith.constant 0 : index
    %5 = vector.load %arg9[%c0_5, %c0_6] : memref<8x128xf32, #tpu.memory_space<vmem>>, vector<8x128xf32>
    %6 = arith.index_cast %c0_i32_2 : i32 to index
    %c0_7 = arith.constant 0 : index
    %c0_8 = arith.constant 0 : index
    %7 = vector.load %arg1[%6, %c0_7, %c0_8] : memref<8x8x512xf32, #tpu.memory_space<vmem>>, vector<1x8x512xf32>
    %8 = vector.shape_cast %7 : vector<1x8x512xf32> to vector<8x512xf32>
    %9 = arith.truncf %4 : vector<8x128xf32> to vector<8x128xbf16>
    %cst = arith.constant dense<0.000000e+00> : vector<8x512xf32>
    %10 = tpu.matmul %9, %3, %cst {dimension_numbers = #tpu.dot_dimension_numbers<[1], [0], [0], [1], [0, 0, 1, 1], [], []>} : vector<8x128xbf16>, vector<128x512xbf16>, vector<8x512xf32> -> vector<8x512xf32>
    %11 = arith.addf %8, %10 : vector<8x512xf32>
    %12 = vector.extract_strided_slice %11 {offsets = [0, 0], sizes = [8, 128], strides = [1, 1]} : vector<8x512xf32> to vector<8x128xf32>
    %13 = arith.negf %12 : vector<8x128xf32>
    %14 = math.exp %13 : vector<8x128xf32>
    %cst_9 = arith.constant 1.000000e+00 : f32
    %15 = vector.broadcast %cst_9 : f32 to vector<8x128xf32>
    %16 = arith.addf %15, %14 : vector<8x128xf32>
    %17 = arith.divf %15, %16 : vector<8x128xf32>
    %18 = vector.extract_strided_slice %11 {offsets = [0, 128], sizes = [8, 128], strides = [1, 1]} : vector<8x512xf32> to vector<8x128xf32>
    %19 = arith.negf %18 : vector<8x128xf32>
    %20 = math.exp %19 : vector<8x128xf32>
    %cst_10 = arith.constant 1.000000e+00 : f32
    %21 = vector.broadcast %cst_10 : f32 to vector<8x128xf32>
    %22 = arith.addf %21, %20 : vector<8x128xf32>
    %23 = arith.divf %21, %22 : vector<8x128xf32>
    %24 = vector.extract_strided_slice %11 {offsets = [0, 256], sizes = [8, 128], strides = [1, 1]} : vector<8x512xf32> to vector<8x128xf32>
    %25 = math.tanh %24 : vector<8x128xf32>
    %26 = vector.extract_strided_slice %11 {offsets = [0, 384], sizes = [8, 128], strides = [1, 1]} : vector<8x512xf32> to vector<8x128xf32>
    %27 = arith.negf %26 : vector<8x128xf32>
    %28 = math.exp %27 : vector<8x128xf32>
    %cst_11 = arith.constant 1.000000e+00 : f32
    %29 = vector.broadcast %cst_11 : f32 to vector<8x128xf32>
    %30 = arith.addf %29, %28 : vector<8x128xf32>
    %31 = arith.divf %29, %30 : vector<8x128xf32>
    %32 = arith.mulf %23, %5 : vector<8x128xf32>
    %33 = arith.mulf %17, %25 : vector<8x128xf32>
    %34 = arith.addf %32, %33 : vector<8x128xf32>
    %35 = math.tanh %34 : vector<8x128xf32>
    %36 = arith.mulf %31, %35 : vector<8x128xf32>
    %c0_12 = arith.constant 0 : index
    %c0_13 = arith.constant 0 : index
    %37 = vector.load %arg8[%c0_12, %c0_13] : memref<8x128xf32, #tpu.memory_space<vmem>>, vector<8x128xf32>
    tpu.vector_store %arg8[%c0_12, %c0_13], %36 {strides = array<i32>} : memref<8x128xf32, #tpu.memory_space<vmem>>, vector<8x128xf32>,
    %c0_14 = arith.constant 0 : index
    %c0_15 = arith.constant 0 : index
    %38 = vector.load %arg9[%c0_14, %c0_15] : memref<8x128xf32, #tpu.memory_space<vmem>>, vector<8x128xf32>
    tpu.vector_store %arg9[%c0_14, %c0_15], %34 {strides = array<i32>} : memref<8x128xf32, #tpu.memory_space<vmem>>, vector<8x128xf32>,
    %39 = arith.truncf %36 : vector<8x128xf32> to vector<8x128xbf16>
    %40 = arith.index_cast %c0_i32_2 : i32 to index
    %c0_16 = arith.constant 0 : index
    %c0_17 = arith.constant 0 : index
    %41 = vector.load %arg5[%40, %c0_16, %c0_17] : memref<8x8x128xbf16, #tpu.memory_space<vmem>>, vector<1x8x128xbf16>
    %42 = vector.shape_cast %41 : vector<1x8x128xbf16> to vector<8x128xbf16>
    %43 = vector.shape_cast %39 : vector<8x128xbf16> to vector<1x8x128xbf16>
    tpu.vector_store %arg5[%40, %c0_16, %c0_17], %43 {strides = array<i32>} : memref<8x8x128xbf16, #tpu.memory_space<vmem>>, vector<1x8x128xbf16>,
    %c1_i32 = arith.constant 1 : i32
    %c0_18 = arith.constant 0 : index
    %c0_19 = arith.constant 0 : index
    %44 = vector.load %arg8[%c0_18, %c0_19] : memref<8x128xf32, #tpu.memory_space<vmem>>, vector<8x128xf32>
    %c0_20 = arith.constant 0 : index
    %c0_21 = arith.constant 0 : index
    %45 = vector.load %arg9[%c0_20, %c0_21] : memref<8x128xf32, #tpu.memory_space<vmem>>, vector<8x128xf32>
    %46 = arith.index_cast %c1_i32 : i32 to index
    %c0_22 = arith.constant 0 : index
    %c0_23 = arith.constant 0 : index
    %47 = vector.load %arg1[%46, %c0_22, %c0_23] : memref<8x8x512xf32, #tpu.memory_space<vmem>>, vector<1x8x512xf32>
    %48 = vector.shape_cast %47 : vector<1x8x512xf32> to vector<8x512xf32>
    %49 = arith.truncf %44 : vector<8x128xf32> to vector<8x128xbf16>
    %cst_24 = arith.constant dense<0.000000e+00> : vector<8x512xf32>
    %50 = tpu.matmul %49, %3, %cst_24 {dimension_numbers = #tpu.dot_dimension_numbers<[1], [0], [0], [1], [0, 0, 1, 1], [], []>} : vector<8x128xbf16>, vector<128x512xbf16>, vector<8x512xf32> -> vector<8x512xf32>
    %51 = arith.addf %48, %50 : vector<8x512xf32>
    %52 = vector.extract_strided_slice %51 {offsets = [0, 0], sizes = [8, 128], strides = [1, 1]} : vector<8x512xf32> to vector<8x128xf32>
    %53 = arith.negf %52 : vector<8x128xf32>
    %54 = math.exp %53 : vector<8x128xf32>
    %cst_25 = arith.constant 1.000000e+00 : f32
    %55 = vector.broadcast %cst_25 : f32 to vector<8x128xf32>
    %56 = arith.addf %55, %54 : vector<8x128xf32>
    %57 = arith.divf %55, %56 : vector<8x128xf32>
    %58 = vector.extract_strided_slice %51 {offsets = [0, 128], sizes = [8, 128], strides = [1, 1]} : vector<8x512xf32> to vector<8x128xf32>
    %59 = arith.negf %58 : vector<8x128xf32>
    %60 = math.exp %59 : vector<8x128xf32>
    %cst_26 = arith.constant 1.000000e+00 : f32
    %61 = vector.broadcast %cst_26 : f32 to vector<8x128xf32>
    %62 = arith.addf %61, %60 : vector<8x128xf32>
    %63 = arith.divf %61, %62 : vector<8x128xf32>
    %64 = vector.extract_strided_slice %51 {offsets = [0, 256], sizes = [8, 128], strides = [1, 1]} : vector<8x512xf32> to vector<8x128xf32>
    %65 = math.tanh %64 : vector<8x128xf32>
    %66 = vector.extract_strided_slice %51 {offsets = [0, 384], sizes = [8, 128], strides = [1, 1]} : vector<8x512xf32> to vector<8x128xf32>
    %67 = arith.negf %66 : vector<8x128xf32>
    %68 = math.exp %67 : vector<8x128xf32>
    %cst_27 = arith.constant 1.000000e+00 : f32
    %69 = vector.broadcast %cst_27 : f32 to vector<8x128xf32>
    %70 = arith.addf %69, %68 : vector<8x128xf32>
    %71 = arith.divf %69, %70 : vector<8x128xf32>
    %72 = arith.mulf %63, %45 : vector<8x128xf32>
    %73 = arith.mulf %57, %65 : vector<8x128xf32>
    %74 = arith.addf %72, %73 : vector<8x128xf32>
    %75 = math.tanh %74 : vector<8x128xf32>
    %76 = arith.mulf %71, %75 : vector<8x128xf32>
    %c0_28 = arith.constant 0 : index
    %c0_29 = arith.constant 0 : index
    %77 = vector.load %arg8[%c0_28, %c0_29] : memref<8x128xf32, #tpu.memory_space<vmem>>, vector<8x128xf32>
    tpu.vector_store %arg8[%c0_28, %c0_29], %76 {strides = array<i32>} : memref<8x128xf32, #tpu.memory_space<vmem>>, vector<8x128xf32>,
    %c0_30 = arith.constant 0 : index
    %c0_31 = arith.constant 0 : index
    %78 = vector.load %arg9[%c0_30, %c0_31] : memref<8x128xf32, #tpu.memory_space<vmem>>, vector<8x128xf32>
    tpu.vector_store %arg9[%c0_30, %c0_31], %74 {strides = array<i32>} : memref<8x128xf32, #tpu.memory_space<vmem>>, vector<8x128xf32>,
    %79 = arith.truncf %76 : vector<8x128xf32> to vector<8x128xbf16>
    %80 = arith.index_cast %c1_i32 : i32 to index
    %c0_32 = arith.constant 0 : index
    %c0_33 = arith.constant 0 : index
    %81 = vector.load %arg5[%80, %c0_32, %c0_33] : memref<8x8x128xbf16, #tpu.memory_space<vmem>>, vector<1x8x128xbf16>
    %82 = vector.shape_cast %81 : vector<1x8x128xbf16> to vector<8x128xbf16>
    %83 = vector.shape_cast %79 : vector<8x128xbf16> to vector<1x8x128xbf16>
    tpu.vector_store %arg5[%80, %c0_32, %c0_33], %83 {strides = array<i32>} : memref<8x8x128xbf16, #tpu.memory_space<vmem>>, vector<1x8x128xbf16>,
    %c2_i32 = arith.constant 2 : i32
    %c0_34 = arith.constant 0 : index
    %c0_35 = arith.constant 0 : index
    %84 = vector.load %arg8[%c0_34, %c0_35] : memref<8x128xf32, #tpu.memory_space<vmem>>, vector<8x128xf32>
    %c0_36 = arith.constant 0 : index
    %c0_37 = arith.constant 0 : index
    %85 = vector.load %arg9[%c0_36, %c0_37] : memref<8x128xf32, #tpu.memory_space<vmem>>, vector<8x128xf32>
    %86 = arith.index_cast %c2_i32 : i32 to index
    %c0_38 = arith.constant 0 : index
    %c0_39 = arith.constant 0 : index
    %87 = vector.load %arg1[%86, %c0_38, %c0_39] : memref<8x8x512xf32, #tpu.memory_space<vmem>>, vector<1x8x512xf32>
    %88 = vector.shape_cast %87 : vector<1x8x512xf32> to vector<8x512xf32>
    %89 = arith.truncf %84 : vector<8x128xf32> to vector<8x128xbf16>
    %cst_40 = arith.constant dense<0.000000e+00> : vector<8x512xf32>
    %90 = tpu.matmul %89, %3, %cst_40 {dimension_numbers = #tpu.dot_dimension_numbers<[1], [0], [0], [1], [0, 0, 1, 1], [], []>} : vector<8x128xbf16>, vector<128x512xbf16>, vector<8x512xf32> -> vector<8x512xf32>
    %91 = arith.addf %88, %90 : vector<8x512xf32>
    %92 = vector.extract_strided_slice %91 {offsets = [0, 0], sizes = [8, 128], strides = [1, 1]} : vector<8x512xf32> to vector<8x128xf32>
    %93 = arith.negf %92 : vector<8x128xf32>
    %94 = math.exp %93 : vector<8x128xf32>
    %cst_41 = arith.constant 1.000000e+00 : f32
    %95 = vector.broadcast %cst_41 : f32 to vector<8x128xf32>
    %96 = arith.addf %95, %94 : vector<8x128xf32>
    %97 = arith.divf %95, %96 : vector<8x128xf32>
    %98 = vector.extract_strided_slice %91 {offsets = [0, 128], sizes = [8, 128], strides = [1, 1]} : vector<8x512xf32> to vector<8x128xf32>
    %99 = arith.negf %98 : vector<8x128xf32>
    %100 = math.exp %99 : vector<8x128xf32>
    %cst_42 = arith.constant 1.000000e+00 : f32
    %101 = vector.broadcast %cst_42 : f32 to vector<8x128xf32>
    %102 = arith.addf %101, %100 : vector<8x128xf32>
    %103 = arith.divf %101, %102 : vector<8x128xf32>
    %104 = vector.extract_strided_slice %91 {offsets = [0, 256], sizes = [8, 128], strides = [1, 1]} : vector<8x512xf32> to vector<8x128xf32>
    %105 = math.tanh %104 : vector<8x128xf32>
    %106 = vector.extract_strided_slice %91 {offsets = [0, 384], sizes = [8, 128], strides = [1, 1]} : vector<8x512xf32> to vector<8x128xf32>
    %107 = arith.negf %106 : vector<8x128xf32>
    %108 = math.exp %107 : vector<8x128xf32>
    %cst_43 = arith.constant 1.000000e+00 : f32
    %109 = vector.broadcast %cst_43 : f32 to vector<8x128xf32>
    %110 = arith.addf %109, %108 : vector<8x128xf32>
    %111 = arith.divf %109, %110 : vector<8x128xf32>
    %112 = arith.mulf %103, %85 : vector<8x128xf32>
    %113 = arith.mulf %97, %105 : vector<8x128xf32>
    %114 = arith.addf %112, %113 : vector<8x128xf32>
    %115 = math.tanh %114 : vector<8x128xf32>
    %116 = arith.mulf %111, %115 : vector<8x128xf32>
    %c0_44 = arith.constant 0 : index
    %c0_45 = arith.constant 0 : index
    %117 = vector.load %arg8[%c0_44, %c0_45] : memref<8x128xf32, #tpu.memory_space<vmem>>, vector<8x128xf32>
    tpu.vector_store %arg8[%c0_44, %c0_45], %116 {strides = array<i32>} : memref<8x128xf32, #tpu.memory_space<vmem>>, vector<8x128xf32>,
    %c0_46 = arith.constant 0 : index
    %c0_47 = arith.constant 0 : index
    %118 = vector.load %arg9[%c0_46, %c0_47] : memref<8x128xf32, #tpu.memory_space<vmem>>, vector<8x128xf32>
    tpu.vector_store %arg9[%c0_46, %c0_47], %114 {strides = array<i32>} : memref<8x128xf32, #tpu.memory_space<vmem>>, vector<8x128xf32>,
    %119 = arith.truncf %116 : vector<8x128xf32> to vector<8x128xbf16>
    %120 = arith.index_cast %c2_i32 : i32 to index
    %c0_48 = arith.constant 0 : index
    %c0_49 = arith.constant 0 : index
    %121 = vector.load %arg5[%120, %c0_48, %c0_49] : memref<8x8x128xbf16, #tpu.memory_space<vmem>>, vector<1x8x128xbf16>
    %122 = vector.shape_cast %121 : vector<1x8x128xbf16> to vector<8x128xbf16>
    %123 = vector.shape_cast %119 : vector<8x128xbf16> to vector<1x8x128xbf16>
    tpu.vector_store %arg5[%120, %c0_48, %c0_49], %123 {strides = array<i32>} : memref<8x8x128xbf16, #tpu.memory_space<vmem>>, vector<1x8x128xbf16>,
    %c3_i32 = arith.constant 3 : i32
    %c0_50 = arith.constant 0 : index
    %c0_51 = arith.constant 0 : index
    %124 = vector.load %arg8[%c0_50, %c0_51] : memref<8x128xf32, #tpu.memory_space<vmem>>, vector<8x128xf32>
    %c0_52 = arith.constant 0 : index
    %c0_53 = arith.constant 0 : index
    %125 = vector.load %arg9[%c0_52, %c0_53] : memref<8x128xf32, #tpu.memory_space<vmem>>, vector<8x128xf32>
    %126 = arith.index_cast %c3_i32 : i32 to index
    %c0_54 = arith.constant 0 : index
    %c0_55 = arith.constant 0 : index
    %127 = vector.load %arg1[%126, %c0_54, %c0_55] : memref<8x8x512xf32, #tpu.memory_space<vmem>>, vector<1x8x512xf32>
    %128 = vector.shape_cast %127 : vector<1x8x512xf32> to vector<8x512xf32>
    %129 = arith.truncf %124 : vector<8x128xf32> to vector<8x128xbf16>
    %cst_56 = arith.constant dense<0.000000e+00> : vector<8x512xf32>
    %130 = tpu.matmul %129, %3, %cst_56 {dimension_numbers = #tpu.dot_dimension_numbers<[1], [0], [0], [1], [0, 0, 1, 1], [], []>} : vector<8x128xbf16>, vector<128x512xbf16>, vector<8x512xf32> -> vector<8x512xf32>
    %131 = arith.addf %128, %130 : vector<8x512xf32>
    %132 = vector.extract_strided_slice %131 {offsets = [0, 0], sizes = [8, 128], strides = [1, 1]} : vector<8x512xf32> to vector<8x128xf32>
    %133 = arith.negf %132 : vector<8x128xf32>
    %134 = math.exp %133 : vector<8x128xf32>
    %cst_57 = arith.constant 1.000000e+00 : f32
    %135 = vector.broadcast %cst_57 : f32 to vector<8x128xf32>
    %136 = arith.addf %135, %134 : vector<8x128xf32>
    %137 = arith.divf %135, %136 : vector<8x128xf32>
    %138 = vector.extract_strided_slice %131 {offsets = [0, 128], sizes = [8, 128], strides = [1, 1]} : vector<8x512xf32> to vector<8x128xf32>
    %139 = arith.negf %138 : vector<8x128xf32>
    %140 = math.exp %139 : vector<8x128xf32>
    %cst_58 = arith.constant 1.000000e+00 : f32
    %141 = vector.broadcast %cst_58 : f32 to vector<8x128xf32>
    %142 = arith.addf %141, %140 : vector<8x128xf32>
    %143 = arith.divf %141, %142 : vector<8x128xf32>
    %144 = vector.extract_strided_slice %131 {offsets = [0, 256], sizes = [8, 128], strides = [1, 1]} : vector<8x512xf32> to vector<8x128xf32>
    %145 = math.tanh %144 : vector<8x128xf32>
    %146 = vector.extract_strided_slice %131 {offsets = [0, 384], sizes = [8, 128], strides = [1, 1]} : vector<8x512xf32> to vector<8x128xf32>
    %147 = arith.negf %146 : vector<8x128xf32>
    %148 = math.exp %147 : vector<8x128xf32>
    %cst_59 = arith.constant 1.000000e+00 : f32
    %149 = vector.broadcast %cst_59 : f32 to vector<8x128xf32>
    %150 = arith.addf %149, %148 : vector<8x128xf32>
    %151 = arith.divf %149, %150 : vector<8x128xf32>
    %152 = arith.mulf %143, %125 : vector<8x128xf32>
    %153 = arith.mulf %137, %145 : vector<8x128xf32>
    %154 = arith.addf %152, %153 : vector<8x128xf32>
    %155 = math.tanh %154 : vector<8x128xf32>
    %156 = arith.mulf %151, %155 : vector<8x128xf32>
    %c0_60 = arith.constant 0 : index
    %c0_61 = arith.constant 0 : index
    %157 = vector.load %arg8[%c0_60, %c0_61] : memref<8x128xf32, #tpu.memory_space<vmem>>, vector<8x128xf32>
    tpu.vector_store %arg8[%c0_60, %c0_61], %156 {strides = array<i32>} : memref<8x128xf32, #tpu.memory_space<vmem>>, vector<8x128xf32>,
    %c0_62 = arith.constant 0 : index
    %c0_63 = arith.constant 0 : index
    %158 = vector.load %arg9[%c0_62, %c0_63] : memref<8x128xf32, #tpu.memory_space<vmem>>, vector<8x128xf32>
    tpu.vector_store %arg9[%c0_62, %c0_63], %154 {strides = array<i32>} : memref<8x128xf32, #tpu.memory_space<vmem>>, vector<8x128xf32>,
    %159 = arith.truncf %156 : vector<8x128xf32> to vector<8x128xbf16>
    %160 = arith.index_cast %c3_i32 : i32 to index
    %c0_64 = arith.constant 0 : index
    %c0_65 = arith.constant 0 : index
    %161 = vector.load %arg5[%160, %c0_64, %c0_65] : memref<8x8x128xbf16, #tpu.memory_space<vmem>>, vector<1x8x128xbf16>
    %162 = vector.shape_cast %161 : vector<1x8x128xbf16> to vector<8x128xbf16>
    %163 = vector.shape_cast %159 : vector<8x128xbf16> to vector<1x8x128xbf16>
    tpu.vector_store %arg5[%160, %c0_64, %c0_65], %163 {strides = array<i32>} : memref<8x8x128xbf16, #tpu.memory_space<vmem>>, vector<1x8x128xbf16>,
    %c4_i32 = arith.constant 4 : i32
    %c0_66 = arith.constant 0 : index
    %c0_67 = arith.constant 0 : index
    %164 = vector.load %arg8[%c0_66, %c0_67] : memref<8x128xf32, #tpu.memory_space<vmem>>, vector<8x128xf32>
    %c0_68 = arith.constant 0 : index
    %c0_69 = arith.constant 0 : index
    %165 = vector.load %arg9[%c0_68, %c0_69] : memref<8x128xf32, #tpu.memory_space<vmem>>, vector<8x128xf32>
    %166 = arith.index_cast %c4_i32 : i32 to index
    %c0_70 = arith.constant 0 : index
    %c0_71 = arith.constant 0 : index
    %167 = vector.load %arg1[%166, %c0_70, %c0_71] : memref<8x8x512xf32, #tpu.memory_space<vmem>>, vector<1x8x512xf32>
    %168 = vector.shape_cast %167 : vector<1x8x512xf32> to vector<8x512xf32>
    %169 = arith.truncf %164 : vector<8x128xf32> to vector<8x128xbf16>
    %cst_72 = arith.constant dense<0.000000e+00> : vector<8x512xf32>
    %170 = tpu.matmul %169, %3, %cst_72 {dimension_numbers = #tpu.dot_dimension_numbers<[1], [0], [0], [1], [0, 0, 1, 1], [], []>} : vector<8x128xbf16>, vector<128x512xbf16>, vector<8x512xf32> -> vector<8x512xf32>
    %171 = arith.addf %168, %170 : vector<8x512xf32>
    %172 = vector.extract_strided_slice %171 {offsets = [0, 0], sizes = [8, 128], strides = [1, 1]} : vector<8x512xf32> to vector<8x128xf32>
    %173 = arith.negf %172 : vector<8x128xf32>
    %174 = math.exp %173 : vector<8x128xf32>
    %cst_73 = arith.constant 1.000000e+00 : f32
    %175 = vector.broadcast %cst_73 : f32 to vector<8x128xf32>
    %176 = arith.addf %175, %174 : vector<8x128xf32>
    %177 = arith.divf %175, %176 : vector<8x128xf32>
    %178 = vector.extract_strided_slice %171 {offsets = [0, 128], sizes = [8, 128], strides = [1, 1]} : vector<8x512xf32> to vector<8x128xf32>
    %179 = arith.negf %178 : vector<8x128xf32>
    %180 = math.exp %179 : vector<8x128xf32>
    %cst_74 = arith.constant 1.000000e+00 : f32
    %181 = vector.broadcast %cst_74 : f32 to vector<8x128xf32>
    %182 = arith.addf %181, %180 : vector<8x128xf32>
    %183 = arith.divf %181, %182 : vector<8x128xf32>
    %184 = vector.extract_strided_slice %171 {offsets = [0, 256], sizes = [8, 128], strides = [1, 1]} : vector<8x512xf32> to vector<8x128xf32>
    %185 = math.tanh %184 : vector<8x128xf32>
    %186 = vector.extract_strided_slice %171 {offsets = [0, 384], sizes = [8, 128], strides = [1, 1]} : vector<8x512xf32> to vector<8x128xf32>
    %187 = arith.negf %186 : vector<8x128xf32>
    %188 = math.exp %187 : vector<8x128xf32>
    %cst_75 = arith.constant 1.000000e+00 : f32
    %189 = vector.broadcast %cst_75 : f32 to vector<8x128xf32>
    %190 = arith.addf %189, %188 : vector<8x128xf32>
    %191 = arith.divf %189, %190 : vector<8x128xf32>
    %192 = arith.mulf %183, %165 : vector<8x128xf32>
    %193 = arith.mulf %177, %185 : vector<8x128xf32>
    %194 = arith.addf %192, %193 : vector<8x128xf32>
    %195 = math.tanh %194 : vector<8x128xf32>
    %196 = arith.mulf %191, %195 : vector<8x128xf32>
    %c0_76 = arith.constant 0 : index
    %c0_77 = arith.constant 0 : index
    %197 = vector.load %arg8[%c0_76, %c0_77] : memref<8x128xf32, #tpu.memory_space<vmem>>, vector<8x128xf32>
    tpu.vector_store %arg8[%c0_76, %c0_77], %196 {strides = array<i32>} : memref<8x128xf32, #tpu.memory_space<vmem>>, vector<8x128xf32>,
    %c0_78 = arith.constant 0 : index
    %c0_79 = arith.constant 0 : index
    %198 = vector.load %arg9[%c0_78, %c0_79] : memref<8x128xf32, #tpu.memory_space<vmem>>, vector<8x128xf32>
    tpu.vector_store %arg9[%c0_78, %c0_79], %194 {strides = array<i32>} : memref<8x128xf32, #tpu.memory_space<vmem>>, vector<8x128xf32>,
    %199 = arith.truncf %196 : vector<8x128xf32> to vector<8x128xbf16>
    %200 = arith.index_cast %c4_i32 : i32 to index
    %c0_80 = arith.constant 0 : index
    %c0_81 = arith.constant 0 : index
    %201 = vector.load %arg5[%200, %c0_80, %c0_81] : memref<8x8x128xbf16, #tpu.memory_space<vmem>>, vector<1x8x128xbf16>
    %202 = vector.shape_cast %201 : vector<1x8x128xbf16> to vector<8x128xbf16>
    %203 = vector.shape_cast %199 : vector<8x128xbf16> to vector<1x8x128xbf16>
    tpu.vector_store %arg5[%200, %c0_80, %c0_81], %203 {strides = array<i32>} : memref<8x8x128xbf16, #tpu.memory_space<vmem>>, vector<1x8x128xbf16>,
    %c5_i32 = arith.constant 5 : i32
    %c0_82 = arith.constant 0 : index
    %c0_83 = arith.constant 0 : index
    %204 = vector.load %arg8[%c0_82, %c0_83] : memref<8x128xf32, #tpu.memory_space<vmem>>, vector<8x128xf32>
    %c0_84 = arith.constant 0 : index
    %c0_85 = arith.constant 0 : index
    %205 = vector.load %arg9[%c0_84, %c0_85] : memref<8x128xf32, #tpu.memory_space<vmem>>, vector<8x128xf32>
    %206 = arith.index_cast %c5_i32 : i32 to index
    %c0_86 = arith.constant 0 : index
    %c0_87 = arith.constant 0 : index
    %207 = vector.load %arg1[%206, %c0_86, %c0_87] : memref<8x8x512xf32, #tpu.memory_space<vmem>>, vector<1x8x512xf32>
    %208 = vector.shape_cast %207 : vector<1x8x512xf32> to vector<8x512xf32>
    %209 = arith.truncf %204 : vector<8x128xf32> to vector<8x128xbf16>
    %cst_88 = arith.constant dense<0.000000e+00> : vector<8x512xf32>
    %210 = tpu.matmul %209, %3, %cst_88 {dimension_numbers = #tpu.dot_dimension_numbers<[1], [0], [0], [1], [0, 0, 1, 1], [], []>} : vector<8x128xbf16>, vector<128x512xbf16>, vector<8x512xf32> -> vector<8x512xf32>
    %211 = arith.addf %208, %210 : vector<8x512xf32>
    %212 = vector.extract_strided_slice %211 {offsets = [0, 0], sizes = [8, 128], strides = [1, 1]} : vector<8x512xf32> to vector<8x128xf32>
    %213 = arith.negf %212 : vector<8x128xf32>
    %214 = math.exp %213 : vector<8x128xf32>
    %cst_89 = arith.constant 1.000000e+00 : f32
    %215 = vector.broadcast %cst_89 : f32 to vector<8x128xf32>
    %216 = arith.addf %215, %214 : vector<8x128xf32>
    %217 = arith.divf %215, %216 : vector<8x128xf32>
    %218 = vector.extract_strided_slice %211 {offsets = [0, 128], sizes = [8, 128], strides = [1, 1]} : vector<8x512xf32> to vector<8x128xf32>
    %219 = arith.negf %218 : vector<8x128xf32>
    %220 = math.exp %219 : vector<8x128xf32>
    %cst_90 = arith.constant 1.000000e+00 : f32
    %221 = vector.broadcast %cst_90 : f32 to vector<8x128xf32>
    %222 = arith.addf %221, %220 : vector<8x128xf32>
    %223 = arith.divf %221, %222 : vector<8x128xf32>
    %224 = vector.extract_strided_slice %211 {offsets = [0, 256], sizes = [8, 128], strides = [1, 1]} : vector<8x512xf32> to vector<8x128xf32>
    %225 = math.tanh %224 : vector<8x128xf32>
    %226 = vector.extract_strided_slice %211 {offsets = [0, 384], sizes = [8, 128], strides = [1, 1]} : vector<8x512xf32> to vector<8x128xf32>
    %227 = arith.negf %226 : vector<8x128xf32>
    %228 = math.exp %227 : vector<8x128xf32>
    %cst_91 = arith.constant 1.000000e+00 : f32
    %229 = vector.broadcast %cst_91 : f32 to vector<8x128xf32>
    %230 = arith.addf %229, %228 : vector<8x128xf32>
    %231 = arith.divf %229, %230 : vector<8x128xf32>
    %232 = arith.mulf %223, %205 : vector<8x128xf32>
    %233 = arith.mulf %217, %225 : vector<8x128xf32>
    %234 = arith.addf %232, %233 : vector<8x128xf32>
    %235 = math.tanh %234 : vector<8x128xf32>
    %236 = arith.mulf %231, %235 : vector<8x128xf32>
    %c0_92 = arith.constant 0 : index
    %c0_93 = arith.constant 0 : index
    %237 = vector.load %arg8[%c0_92, %c0_93] : memref<8x128xf32, #tpu.memory_space<vmem>>, vector<8x128xf32>
    tpu.vector_store %arg8[%c0_92, %c0_93], %236 {strides = array<i32>} : memref<8x128xf32, #tpu.memory_space<vmem>>, vector<8x128xf32>,
    %c0_94 = arith.constant 0 : index
    %c0_95 = arith.constant 0 : index
    %238 = vector.load %arg9[%c0_94, %c0_95] : memref<8x128xf32, #tpu.memory_space<vmem>>, vector<8x128xf32>
    tpu.vector_store %arg9[%c0_94, %c0_95], %234 {strides = array<i32>} : memref<8x128xf32, #tpu.memory_space<vmem>>, vector<8x128xf32>,
    %239 = arith.truncf %236 : vector<8x128xf32> to vector<8x128xbf16>
    %240 = arith.index_cast %c5_i32 : i32 to index
    %c0_96 = arith.constant 0 : index
    %c0_97 = arith.constant 0 : index
    %241 = vector.load %arg5[%240, %c0_96, %c0_97] : memref<8x8x128xbf16, #tpu.memory_space<vmem>>, vector<1x8x128xbf16>
    %242 = vector.shape_cast %241 : vector<1x8x128xbf16> to vector<8x128xbf16>
    %243 = vector.shape_cast %239 : vector<8x128xbf16> to vector<1x8x128xbf16>
    tpu.vector_store %arg5[%240, %c0_96, %c0_97], %243 {strides = array<i32>} : memref<8x8x128xbf16, #tpu.memory_space<vmem>>, vector<1x8x128xbf16>,
    %c6_i32 = arith.constant 6 : i32
    %c0_98 = arith.constant 0 : index
    %c0_99 = arith.constant 0 : index
    %244 = vector.load %arg8[%c0_98, %c0_99] : memref<8x128xf32, #tpu.memory_space<vmem>>, vector<8x128xf32>
    %c0_100 = arith.constant 0 : index
    %c0_101 = arith.constant 0 : index
    %245 = vector.load %arg9[%c0_100, %c0_101] : memref<8x128xf32, #tpu.memory_space<vmem>>, vector<8x128xf32>
    %246 = arith.index_cast %c6_i32 : i32 to index
    %c0_102 = arith.constant 0 : index
    %c0_103 = arith.constant 0 : index
    %247 = vector.load %arg1[%246, %c0_102, %c0_103] : memref<8x8x512xf32, #tpu.memory_space<vmem>>, vector<1x8x512xf32>
    %248 = vector.shape_cast %247 : vector<1x8x512xf32> to vector<8x512xf32>
    %249 = arith.truncf %244 : vector<8x128xf32> to vector<8x128xbf16>
    %cst_104 = arith.constant dense<0.000000e+00> : vector<8x512xf32>
    %250 = tpu.matmul %249, %3, %cst_104 {dimension_numbers = #tpu.dot_dimension_numbers<[1], [0], [0], [1], [0, 0, 1, 1], [], []>} : vector<8x128xbf16>, vector<128x512xbf16>, vector<8x512xf32> -> vector<8x512xf32>
    %251 = arith.addf %248, %250 : vector<8x512xf32>
    %252 = vector.extract_strided_slice %251 {offsets = [0, 0], sizes = [8, 128], strides = [1, 1]} : vector<8x512xf32> to vector<8x128xf32>
    %253 = arith.negf %252 : vector<8x128xf32>
    %254 = math.exp %253 : vector<8x128xf32>
    %cst_105 = arith.constant 1.000000e+00 : f32
    %255 = vector.broadcast %cst_105 : f32 to vector<8x128xf32>
    %256 = arith.addf %255, %254 : vector<8x128xf32>
    %257 = arith.divf %255, %256 : vector<8x128xf32>
    %258 = vector.extract_strided_slice %251 {offsets = [0, 128], sizes = [8, 128], strides = [1, 1]} : vector<8x512xf32> to vector<8x128xf32>
    %259 = arith.negf %258 : vector<8x128xf32>
    %260 = math.exp %259 : vector<8x128xf32>
    %cst_106 = arith.constant 1.000000e+00 : f32
    %261 = vector.broadcast %cst_106 : f32 to vector<8x128xf32>
    %262 = arith.addf %261, %260 : vector<8x128xf32>
    %263 = arith.divf %261, %262 : vector<8x128xf32>
    %264 = vector.extract_strided_slice %251 {offsets = [0, 256], sizes = [8, 128], strides = [1, 1]} : vector<8x512xf32> to vector<8x128xf32>
    %265 = math.tanh %264 : vector<8x128xf32>
    %266 = vector.extract_strided_slice %251 {offsets = [0, 384], sizes = [8, 128], strides = [1, 1]} : vector<8x512xf32> to vector<8x128xf32>
    %267 = arith.negf %266 : vector<8x128xf32>
    %268 = math.exp %267 : vector<8x128xf32>
    %cst_107 = arith.constant 1.000000e+00 : f32
    %269 = vector.broadcast %cst_107 : f32 to vector<8x128xf32>
    %270 = arith.addf %269, %268 : vector<8x128xf32>
    %271 = arith.divf %269, %270 : vector<8x128xf32>
    %272 = arith.mulf %263, %245 : vector<8x128xf32>
    %273 = arith.mulf %257, %265 : vector<8x128xf32>
    %274 = arith.addf %272, %273 : vector<8x128xf32>
    %275 = math.tanh %274 : vector<8x128xf32>
    %276 = arith.mulf %271, %275 : vector<8x128xf32>
    %c0_108 = arith.constant 0 : index
    %c0_109 = arith.constant 0 : index
    %277 = vector.load %arg8[%c0_108, %c0_109] : memref<8x128xf32, #tpu.memory_space<vmem>>, vector<8x128xf32>
    tpu.vector_store %arg8[%c0_108, %c0_109], %276 {strides = array<i32>} : memref<8x128xf32, #tpu.memory_space<vmem>>, vector<8x128xf32>,
    %c0_110 = arith.constant 0 : index
    %c0_111 = arith.constant 0 : index
    %278 = vector.load %arg9[%c0_110, %c0_111] : memref<8x128xf32, #tpu.memory_space<vmem>>, vector<8x128xf32>
    tpu.vector_store %arg9[%c0_110, %c0_111], %274 {strides = array<i32>} : memref<8x128xf32, #tpu.memory_space<vmem>>, vector<8x128xf32>,
    %279 = arith.truncf %276 : vector<8x128xf32> to vector<8x128xbf16>
    %280 = arith.index_cast %c6_i32 : i32 to index
    %c0_112 = arith.constant 0 : index
    %c0_113 = arith.constant 0 : index
    %281 = vector.load %arg5[%280, %c0_112, %c0_113] : memref<8x8x128xbf16, #tpu.memory_space<vmem>>, vector<1x8x128xbf16>
    %282 = vector.shape_cast %281 : vector<1x8x128xbf16> to vector<8x128xbf16>
    %283 = vector.shape_cast %279 : vector<8x128xbf16> to vector<1x8x128xbf16>
    tpu.vector_store %arg5[%280, %c0_112, %c0_113], %283 {strides = array<i32>} : memref<8x8x128xbf16, #tpu.memory_space<vmem>>, vector<1x8x128xbf16>,
    %c7_i32 = arith.constant 7 : i32
    %c0_114 = arith.constant 0 : index
    %c0_115 = arith.constant 0 : index
    %284 = vector.load %arg8[%c0_114, %c0_115] : memref<8x128xf32, #tpu.memory_space<vmem>>, vector<8x128xf32>
    %c0_116 = arith.constant 0 : index
    %c0_117 = arith.constant 0 : index
    %285 = vector.load %arg9[%c0_116, %c0_117] : memref<8x128xf32, #tpu.memory_space<vmem>>, vector<8x128xf32>
    %286 = arith.index_cast %c7_i32 : i32 to index
    %c0_118 = arith.constant 0 : index
    %c0_119 = arith.constant 0 : index
    %287 = vector.load %arg1[%286, %c0_118, %c0_119] : memref<8x8x512xf32, #tpu.memory_space<vmem>>, vector<1x8x512xf32>
    %288 = vector.shape_cast %287 : vector<1x8x512xf32> to vector<8x512xf32>
    %289 = arith.truncf %284 : vector<8x128xf32> to vector<8x128xbf16>
    %cst_120 = arith.constant dense<0.000000e+00> : vector<8x512xf32>
    %290 = tpu.matmul %289, %3, %cst_120 {dimension_numbers = #tpu.dot_dimension_numbers<[1], [0], [0], [1], [0, 0, 1, 1], [], []>} : vector<8x128xbf16>, vector<128x512xbf16>, vector<8x512xf32> -> vector<8x512xf32>
    %291 = arith.addf %288, %290 : vector<8x512xf32>
    %292 = vector.extract_strided_slice %291 {offsets = [0, 0], sizes = [8, 128], strides = [1, 1]} : vector<8x512xf32> to vector<8x128xf32>
    %293 = arith.negf %292 : vector<8x128xf32>
    %294 = math.exp %293 : vector<8x128xf32>
    %cst_121 = arith.constant 1.000000e+00 : f32
    %295 = vector.broadcast %cst_121 : f32 to vector<8x128xf32>
    %296 = arith.addf %295, %294 : vector<8x128xf32>
    %297 = arith.divf %295, %296 : vector<8x128xf32>
    %298 = vector.extract_strided_slice %291 {offsets = [0, 128], sizes = [8, 128], strides = [1, 1]} : vector<8x512xf32> to vector<8x128xf32>
    %299 = arith.negf %298 : vector<8x128xf32>
    %300 = math.exp %299 : vector<8x128xf32>
    %cst_122 = arith.constant 1.000000e+00 : f32
    %301 = vector.broadcast %cst_122 : f32 to vector<8x128xf32>
    %302 = arith.addf %301, %300 : vector<8x128xf32>
    %303 = arith.divf %301, %302 : vector<8x128xf32>
    %304 = vector.extract_strided_slice %291 {offsets = [0, 256], sizes = [8, 128], strides = [1, 1]} : vector<8x512xf32> to vector<8x128xf32>
    %305 = math.tanh %304 : vector<8x128xf32>
    %306 = vector.extract_strided_slice %291 {offsets = [0, 384], sizes = [8, 128], strides = [1, 1]} : vector<8x512xf32> to vector<8x128xf32>
    %307 = arith.negf %306 : vector<8x128xf32>
    %308 = math.exp %307 : vector<8x128xf32>
    %cst_123 = arith.constant 1.000000e+00 : f32
    %309 = vector.broadcast %cst_123 : f32 to vector<8x128xf32>
    %310 = arith.addf %309, %308 : vector<8x128xf32>
    %311 = arith.divf %309, %310 : vector<8x128xf32>
    %312 = arith.mulf %303, %285 : vector<8x128xf32>
    %313 = arith.mulf %297, %305 : vector<8x128xf32>
    %314 = arith.addf %312, %313 : vector<8x128xf32>
    %315 = math.tanh %314 : vector<8x128xf32>
    %316 = arith.mulf %311, %315 : vector<8x128xf32>
    %c0_124 = arith.constant 0 : index
    %c0_125 = arith.constant 0 : index
    %317 = vector.load %arg8[%c0_124, %c0_125] : memref<8x128xf32, #tpu.memory_space<vmem>>, vector<8x128xf32>
    tpu.vector_store %arg8[%c0_124, %c0_125], %316 {strides = array<i32>} : memref<8x128xf32, #tpu.memory_space<vmem>>, vector<8x128xf32>,
    %c0_126 = arith.constant 0 : index
    %c0_127 = arith.constant 0 : index
    %318 = vector.load %arg9[%c0_126, %c0_127] : memref<8x128xf32, #tpu.memory_space<vmem>>, vector<8x128xf32>
    tpu.vector_store %arg9[%c0_126, %c0_127], %314 {strides = array<i32>} : memref<8x128xf32, #tpu.memory_space<vmem>>, vector<8x128xf32>,
    %319 = arith.truncf %316 : vector<8x128xf32> to vector<8x128xbf16>
    %320 = arith.index_cast %c7_i32 : i32 to index
    %c0_128 = arith.constant 0 : index
    %c0_129 = arith.constant 0 : index
    %321 = vector.load %arg5[%320, %c0_128, %c0_129] : memref<8x8x128xbf16, #tpu.memory_space<vmem>>, vector<1x8x128xbf16>
    %322 = vector.shape_cast %321 : vector<1x8x128xbf16> to vector<8x128xbf16>
    %323 = vector.shape_cast %319 : vector<8x128xbf16> to vector<1x8x128xbf16>
    tpu.vector_store %arg5[%320, %c0_128, %c0_129], %323 {strides = array<i32>} : memref<8x8x128xbf16, #tpu.memory_space<vmem>>, vector<1x8x128xbf16>,
    %c8_i32 = arith.constant 8 : i32
    %c1_i32_130 = arith.constant 1 : i32
    %324 = arith.cmpi eq, %arg0, %c1_i32_130 : i32
    %325 = arith.extui %324 : i1 to i32
    %c0_i32_131 = arith.constant 0 : i32
    %326 = arith.cmpi ne, %325, %c0_i32_131 : i32
    scf.if %326 {
      %c0_132 = arith.constant 0 : index
      %c0_133 = arith.constant 0 : index
      %327 = vector.load %arg8[%c0_132, %c0_133] : memref<8x128xf32, #tpu.memory_space<vmem>>, vector<8x128xf32>
      %c0_134 = arith.constant 0 : index
      %c0_135 = arith.constant 0 : index
      %328 = vector.load %arg6[%c0_134, %c0_135] : memref<8x128xf32, #tpu.memory_space<vmem>>, vector<8x128xf32>
      tpu.vector_store %arg6[%c0_134, %c0_135], %327 {strides = array<i32>} : memref<8x128xf32, #tpu.memory_space<vmem>>, vector<8x128xf32>,
      %c0_136 = arith.constant 0 : index
      %c0_137 = arith.constant 0 : index
      %329 = vector.load %arg9[%c0_136, %c0_137] : memref<8x128xf32, #tpu.memory_space<vmem>>, vector<8x128xf32>
      %c0_138 = arith.constant 0 : index
      %c0_139 = arith.constant 0 : index
      %330 = vector.load %arg7[%c0_138, %c0_139] : memref<8x128xf32, #tpu.memory_space<vmem>>, vector<8x128xf32>
      tpu.vector_store %arg7[%c0_138, %c0_139], %329 {strides = array<i32>} : memref<8x128xf32, #tpu.memory_space<vmem>>, vector<8x128xf32>,
    } else {
    }
    return
  }
  func.func @transform_0(%arg0: i32) -> (i32, i32, i32) {
    %c0_i32 = arith.constant 0 : i32
    %c0_i32_0 = arith.constant 0 : i32
    %c0_i32_1 = arith.constant 0 : i32
    return %arg0, %c0_i32, %c0_i32_0 : i32, i32, i32
  }
  func.func @transform_1(%arg0: i32) -> (i32, i32) {
    %c0_i32 = arith.constant 0 : i32
    %c0_i32_0 = arith.constant 0 : i32
    %c0_i32_1 = arith.constant 0 : i32
    return %c0_i32, %c0_i32_0 : i32, i32
  }
  func.func @transform_2(%arg0: i32) -> (i32, i32) {
    %c0_i32 = arith.constant 0 : i32
    %c0_i32_0 = arith.constant 0 : i32
    %c0_i32_1 = arith.constant 0 : i32
    return %c0_i32, %c0_i32_0 : i32, i32
  }
  func.func @transform_3(%arg0: i32) -> (i32, i32) {
    %c0_i32 = arith.constant 0 : i32
    %c0_i32_0 = arith.constant 0 : i32
    %c0_i32_1 = arith.constant 0 : i32
    return %c0_i32, %c0_i32_0 : i32, i32
  }
  func.func @transform_4(%arg0: i32) -> (i32, i32, i32) {
    %c0_i32 = arith.constant 0 : i32
    %c0_i32_0 = arith.constant 0 : i32
    %c0_i32_1 = arith.constant 0 : i32
    return %arg0, %c0_i32, %c0_i32_0 : i32, i32, i32
  }
  func.func @transform_5(%arg0: i32) -> (i32, i32) {
    %c0_i32 = arith.constant 0 : i32
    %c0_i32_0 = arith.constant 0 : i32
    %c0_i32_1 = arith.constant 0 : i32
    return %c0_i32, %c0_i32_0 : i32, i32
  }
  func.func @transform_6(%arg0: i32) -> (i32, i32) {
    %c0_i32 = arith.constant 0 : i32
    %c0_i32_0 = arith.constant 0 : i32
    %c0_i32_1 = arith.constant 0 : i32
    return %c0_i32, %c0_i32_0 : i32, i32
  }
}

</mosaic_0001>

<bundles_post_ra>
// kernel: actor_critic_rollout.5
= control target key start
LH: loop header
LB: loop body
LE: loop exit
PB: predicated region body
PF: predicated region fallthrough
CT: control target
= control target key end

     0   :  { %s464_s1 = inlined_call_operand.vmem [shape: bf16[128,128], index: 1, kind: input, shape index: {}]   ;;  %s465_s0 = inlined_call_operand.vmem [shape: bf16[128,128], index: 0, kind: input, shape index: {}]   ;;  %s466_s2 = inlined_call_operand.vmem [shape: f32[128,128], index: 2, kind: output, shape index: {}]  }
   0x1   :  { %v337_v0 = vld [vmem:[%s464_s1] sm:$0xff]   ;;  %v338_v1 = vld [vmem:[%s464_s1 + $0x8] sm:$0xff]   ;;  %v339_v2 = vld [vmem:[%s464_s1 + $0x10] sm:$0xff]  }
   0x2   :  { %289 = vmatprep.subr.bf16.mxu0 %v337_v0  ;;  %321 = vmatprep.subr.bf16.mxu1 %v337_v0  ;;  %v340_v3 = vld [vmem:[%s464_s1 + $0x18] sm:$0xff]   ;;  %v345_v4 = vld [vmem:[%s465_s0] sm:$0xff]   ;;  %v342_v7 = vld [vmem:[%s464_s1 + $0x28] sm:$0xff]  }
   0x3   :  { %290 = vmatpush3.bf16.msra.mxu0 %v337_v0  ;;  %329 = vmatpush3.bf16.msra.mxu1 %v337_v0  ;;  %v346_v5 = vld [vmem:[%s465_s0 + $0x20] sm:$0xff]   ;;  %v343_v8 = vld [vmem:[%s464_s1 + $0x30] sm:$0xff]   ;;  %v344_v9 = vld [vmem:[%s464_s1 + $0x38] sm:$0xff]  }
   0x4   :  { %291 = vmatprep.subr.bf16.mxu0 %v338_v1  ;;  %322 = vmatprep.subr.bf16.mxu1 %v338_v1  ;;  %v341_v6 = vld [vmem:[%s464_s1 + $0x20] sm:$0xff]   ;;  %v347_v10 = vld [vmem:[%s465_s0 + $0x8] sm:$0xff]   ;;  %v349_v12 = vld [vmem:[%s465_s0 + $0x10] sm:$0xff]  }
   0x5   :  { %305 = vmatprep.mubr.bf16.mxu0 %v345_v4  ;;  %313 = vmatprep.mubr.bf16.mxu1 %v346_v5  ;;  %v348_v11 = vld [vmem:[%s465_s0 + $0x28] sm:$0xff]   ;;  %v350_v13 = vld [vmem:[%s465_s0 + $0x30] sm:$0xff]   ;;  %v351_v14 = vld [vmem:[%s465_s0 + $0x18] sm:$0xff]  }
   0x6   :  { %v352_v15 = vld [vmem:[%s465_s0 + $0x38] sm:$0xff]  }
   0x7   :  { %292 = vmatpush3.bf16.msra.mxu0 %v338_v1  ;;  %330 = vmatpush3.bf16.msra.mxu1 %v338_v1 }
   0x8   :  { %293 = vmatprep.subr.bf16.mxu0 %v339_v2  ;;  %323 = vmatprep.subr.bf16.mxu1 %v339_v2 }
   0xb   :  { %294 = vmatpush3.bf16.msra.mxu0 %v339_v2  ;;  %331 = vmatpush3.bf16.msra.mxu1 %v339_v2 }
   0xc   :  { %295 = vmatprep.subr.bf16.mxu0 %v340_v3  ;;  %324 = vmatprep.subr.bf16.mxu1 %v340_v3 }
   0xf   :  { %296 = vmatpush3.bf16.msra.mxu0 %v340_v3  ;;  %332 = vmatpush3.bf16.msra.mxu1 %v340_v3 }
  0x10   :  { %297 = vmatprep.subr.bf16.mxu0 %v341_v6  ;;  %325 = vmatprep.subr.bf16.mxu1 %v341_v6 }
  0x13   :  { %298 = vmatpush3.bf16.msra.mxu0 %v341_v6  ;;  %333 = vmatpush3.bf16.msra.mxu1 %v341_v6 }
  0x14   :  { %299 = vmatprep.subr.bf16.mxu0 %v342_v7  ;;  %326 = vmatprep.subr.bf16.mxu1 %v342_v7 }
  0x17   :  { %300 = vmatpush3.bf16.msra.mxu0 %v342_v7  ;;  %334 = vmatpush3.bf16.msra.mxu1 %v342_v7 }
  0x18   :  { %301 = vmatprep.subr.bf16.mxu0 %v343_v8  ;;  %327 = vmatprep.subr.bf16.mxu1 %v343_v8 }
  0x1b   :  { %302 = vmatpush3.bf16.msra.mxu0 %v343_v8  ;;  %335 = vmatpush3.bf16.msra.mxu1 %v343_v8 }
  0x1c   :  { %303 = vmatprep.subr.bf16.mxu0 %v344_v9  ;;  %328 = vmatprep.subr.bf16.mxu1 %v344_v9 }
  0x1f   :  { %304 = vmatpush3.bf16.msra.mxu0 %v344_v9  ;;  %336 = vmatpush3.bf16.msra.mxu1 %v344_v9 }
  0x22   :  { %306 = vmatmul.mubr.bf16.vlgmr.msra.gmra.mrb[0].mxu0 %v347_v10  ;;  %314 = vmatmul.mubr.bf16.vlgmr.msra.gmra.mrb[0].mxu1 %v348_v11 }
  0x23   :  { %309 = vmatprep.mubr.bf16.mxu0 %v349_v12  ;;  %317 = vmatprep.mubr.bf16.mxu1 %v350_v13 }
  0x2a   :  { %310 = vmatmul.mubr.bf16.gmra.mrb[4].mxu0 %v351_v14  ;;  %318 = vmatmul.mubr.bf16.gmra.mrb[4].mxu1 %v352_v15 }
  0xf5   :  { %v307_v16 = vpop.f32.mrb[0].mxu0  ;;  %v315_v17 = vpop.f32.mrb[0].mxu1 }
  0xf6   :  { %239 = vst [vmem:[%s466_s2 + $0x10] sm:$0xff] %v307_v16  ;;  %247 = vst [vmem:[%s466_s2 + $0x50] sm:$0xff] %v315_v17  ;;  %v174_v18 = vpop.f32.mrb[1].mxu0  ;;  %v206_v19 = vpop.f32.mrb[1].mxu1 }
  0xf7   :  { %237 = vst [vmem:[%s466_s2] sm:$0xff] %v174_v18  ;;  %245 = vst [vmem:[%s466_s2 + $0x40] sm:$0xff] %v206_v19  ;;  %v308_v20 = vpop.f32.mrb[2].mxu0  ;;  %v316_v21 = vpop.f32.mrb[2].mxu1 }
  0xf8   :  { %240 = vst [vmem:[%s466_s2 + $0x18] sm:$0xff] %v308_v20  ;;  %248 = vst [vmem:[%s466_s2 + $0x58] sm:$0xff] %v316_v21  ;;  %v177_v22 = vpop.f32.mrb[3].mxu0  ;;  %v209_v23 = vpop.f32.mrb[3].mxu1 }
  0xf9   :  { %238 = vst [vmem:[%s466_s2 + $0x8] sm:$0xff] %v177_v22  ;;  %246 = vst [vmem:[%s466_s2 + $0x48] sm:$0xff] %v209_v23 }
  0xfd   :  { %v311_v24 = vpop.f32.mrb[4].mxu0  ;;  %v319_v25 = vpop.f32.mrb[4].mxu1 }
  0xfe   :  { %243 = vst [vmem:[%s466_s2 + $0x30] sm:$0xff] %v311_v24  ;;  %251 = vst [vmem:[%s466_s2 + $0x70] sm:$0xff] %v319_v25  ;;  %v190_v26 = vpop.f32.mrb[5].mxu0  ;;  %v222_v27 = vpop.f32.mrb[5].mxu1 }
  0xff   :  { %241 = vst [vmem:[%s466_s2 + $0x20] sm:$0xff] %v190_v26  ;;  %249 = vst [vmem:[%s466_s2 + $0x60] sm:$0xff] %v222_v27  ;;  %v312_v28 = vpop.f32.mrb[6].mxu0  ;;  %v320_v29 = vpop.f32.mrb[6].mxu1 }
 0x100   :  { %244 = vst [vmem:[%s466_s2 + $0x38] sm:$0xff] %v312_v28  ;;  %252 = vst [vmem:[%s466_s2 + $0x78] sm:$0xff] %v320_v29  ;;  %v193_v30 = vpop.f32.mrb[7].mxu0  ;;  %v225_v31 = vpop.f32.mrb[7].mxu1 }
 0x101   :  { %242 = vst [vmem:[%s466_s2 + $0x28] sm:$0xff] %v193_v30  ;;  %250 = vst [vmem:[%s466_s2 + $0x68] sm:$0xff] %v225_v31 }

// kernel: actor_critic_rollout.3
= control target key start
LH: loop header
LB: loop body
LE: loop exit
PB: predicated region body
PF: predicated region fallthrough
CT: control target
= control target key end

     0   :  { %11 = vsyncpa [#allocation3], 0  ;;  %s1407_s21 = smov [#allocation2]   ;;  %s1798_s0 = inlined_call_operand.vmem [shape: bf16[128,16], index: 0, kind: input, shape index: {}]   ;;  %s1799_s1 = inlined_call_operand.vmem [shape: bf16[16,128], index: 1, kind: input, shape index: {}]   ;;  %s1800_s2 = inlined_call_operand.vmem [shape: bf16[128,128], index: 2, kind: input, shape index: {}]   ;;  %s1801_s3 = inlined_call_operand.vmem [shape: bf16[128,128], index: 3, kind: input, shape index: {}]   ;;  %s1802_s4 = inlined_call_operand.vmem [shape: f32[3,128], index: 4, kind: input, shape index: {}]   ;;  %s1803_s5 = inlined_call_operand.hbm [shape: bf16[128,512], index: 5, kind: input, shape index: {}]   ;;  %s1804_s6 = inlined_call_operand.vmem [shape: f32[128,512], index: 6, kind: output, shape index: {}]  }
   0x1   :  { %s27_s22 = sshll.u32 %s1407_s21, 4  ;;  %s1383_s25 = scalar_lea.hbm %s1803_s5, 4096  ;;  %s28_s22 = int_to_ptr.vmem [resolvable:$true] %s27_s22 }
   0x2   :  { %p1384_p0 = scmp.ne.s32.totalorder %s1803_s5, %s1383_s25  ;;  %p1387_p1 = scmp.lt.u32.totalorder %s1383_s25, %s1803_s5 }
   0x4   :  { %p1389_p2 = pnand %p1387_p1, %p1384_p0 }
   0x6   :  { %1392 = shalt.err (!%p1389_p2)
}
   0x7   :  { %s1393_s30 = scalar_lea.vmem %s28_s22, 4096  ;;  %p1398_p4 = scmp.lt.s32.totalorder %s28_s22, %s28_s22 }
   0x8   :  { %p1394_p3 = scmp.ne.s32.totalorder %s28_s22, %s1393_s30  ;;  %p1399_p5 = scmp.lt.s32.totalorder %s1393_s30, %s1393_s30 }
   0xa   :  { %p1400_p6 = por %p1399_p5, %p1398_p4 }
   0xc   :  { %p1401_p7 = pnand %p1400_p6, %p1394_p3 }
   0xe   :  { %1404 = shalt.err (!%p1401_p7)
}
   0xf   :  { %s1408_s7 = smov 256   ;;  %s1409_s8 = smov 16  }
  0x10   :  { %33 = dma.hbm_to_vmem [thread:$0]  %s1803_s5, 4096, %s28_s22, [#allocation3], %s1408_s7, %s1408_s7, %s1409_s8  }
  0x11   :  { %1405 = dma.done.wait [#allocation3], 4096  }
  0x12   :  { %1406 = vsyncadd [#allocation3], 4294963200  ;;  %v1310_v0 = vld [vmem:[%s1799_s1] sm:$0xff]   ;;  %vm171_vm0 = vcmask 130048   ;;  %v1312_v2 = vld [vmem:[%s1798_s0 + $0x8] sm:$0xff]   ;;  %v121_v23 = vlaneseq }
  0x13   :  { %v1311_v1 = vld [vmem:[%s1798_s0] sm:$0xff]   ;;  %1224 = vmatprep.subr.bf16.mxu0 %v1310_v0  ;;  %v1313_v3 = vld [vmem:[%s1798_s0 + $0x10] sm:$0xff]   ;;  %v1314_v4 = vld [vmem:[%s1798_s0 + $0x18] sm:$0xff]  }
  0x14   :  { %1225 = vmatpush3.bf16.msra.mxu0 %v1310_v0  ;;  %1226 = vmatprep.mubr.msk.bf16.mxu0 %vm171_vm0, %v1311_v1  ;;  %v1319_v5 = vld [vmem:[%s1800_s2] sm:$0xff]   ;;  %v1320_v6 = vld [vmem:[%s1800_s2 + $0x8] sm:$0xff]   ;;  %v1321_v8 = vld [vmem:[%s1800_s2 + $0x10] sm:$0xff]   ;;  %v1535_v24 = vshrl.u32 %v121_v23, 7 }
  0x15   :  { %v1315_v7 = vld [vmem:[%s1798_s0 + $0x20] sm:$0xff]   ;;  %1242 = vmatprep.subr.bf16.mxu1 %v1319_v5  ;;  %v1322_v9 = vld [vmem:[%s1800_s2 + $0x18] sm:$0xff]   ;;  %v1316_v10 = vld [vmem:[%s1798_s0 + $0x28] sm:$0xff]  }
  0x16   :  { %1243 = vmatpush3.bf16.msra.mxu1 %v1319_v5  ;;  %v1317_v11 = vld [vmem:[%s1798_s0 + $0x30] sm:$0xff]   ;;  %v1323_v12 = vld [vmem:[%s1800_s2 + $0x20] sm:$0xff]   ;;  %v1324_v13 = vld [vmem:[%s1800_s2 + $0x28] sm:$0xff]   ;;  %v123_v25 = vsub.s32 0, %v1535_v24 }
  0x17   :  { %1227 = vmatmul.mubr.msk.bf16.vlgmr.msra.gmra.mrb[0].mxu0 %vm171_vm0, %v1312_v2  ;;  %1244 = vmatprep.subr.bf16.mxu1 %v1320_v6  ;;  %v1318_v14 = vld [vmem:[%s1798_s0 + $0x38] sm:$0xff]   ;;  %v1325_v15 = vld [vmem:[%s1800_s2 + $0x30] sm:$0xff]   ;;  %v1327_v17 = vld [vmem:[%s1801_s3] sm:$0xff]  }
  0x18   :  { %1230 = vmatprep.mubr.msk.bf16.mxu0 %vm171_vm0, %v1313_v3  ;;  %v1326_v16 = vld [vmem:[%s1800_s2 + $0x38] sm:$0xff]   ;;  %v1328_v18 = vld [vmem:[%s1801_s3 + $0x8] sm:$0xff]   ;;  %1274 = vmatprep.subr.bf16.mxu0 %v1327_v17  ;;  %v1329_v19 = vld [vmem:[%s1801_s3 + $0x10] sm:$0xff]  }
  0x19   :  { %1275 = vmatpush3.bf16.msra.mxu0 %v1327_v17  ;;  %v1330_v20 = vld [vmem:[%s1801_s3 + $0x18] sm:$0xff]   ;;  %v1331_v21 = vld [vmem:[%s1801_s3 + $0x20] sm:$0xff]   ;;  %v1332_v22 = vld [vmem:[%s1801_s3 + $0x28] sm:$0xff]  }
  0x1a   :  { %1245 = vmatpush3.bf16.msra.mxu1 %v1320_v6  ;;  %1276 = vmatprep.subr.bf16.mxu0 %v1328_v18  ;;  %v1541_v26 = vld [vmem:[%s1802_s4] sm:$0x7]  ;;  %v1337_v23 = vld [vmem:[#allocation2 + $0x4] ss:$16 sps:$4 sm:$0xff]  }
  0x1b   :  { %1246 = vmatprep.subr.bf16.mxu1 %v1321_v8  ;;  %v124_v27 = vrot.slane %v1541_v26, %v123_v25  ;;  %v1340_v25 = vld [vmem:[#allocation2 + $0xc] ss:$16 sps:$4 sm:$0xff]  }
  0x1d   :  { %1277 = vmatpush3.bf16.msra.mxu0 %v1328_v18 }
  0x1e   :  { %1247 = vmatpush3.bf16.msra.mxu1 %v1321_v8  ;;  %1278 = vmatprep.subr.bf16.mxu0 %v1329_v19 }
  0x1f   :  { %1231 = vmatmul.mubr.msk.bf16.gmra.mrb[4].mxu0 %vm171_vm0, %v1314_v4  ;;  %1248 = vmatprep.subr.bf16.mxu1 %v1322_v9 }
  0x20   :  { %1234 = vmatprep.mubr.msk.bf16.mxu0 %vm171_vm0, %v1315_v7 }
  0x21   :  { %1279 = vmatpush3.bf16.msra.mxu0 %v1329_v19 }
  0x22   :  { %1249 = vmatpush3.bf16.msra.mxu1 %v1322_v9  ;;  %1280 = vmatprep.subr.bf16.mxu0 %v1330_v20 }
  0x23   :  { %1250 = vmatprep.subr.bf16.mxu1 %v1323_v12 }
  0x25   :  { %1281 = vmatpush3.bf16.msra.mxu0 %v1330_v20  ;;  %v1333_v20 = vld [vmem:[%s1801_s3 + $0x30] sm:$0xff]  }
  0x26   :  { %1251 = vmatpush3.bf16.msra.mxu1 %v1323_v12  ;;  %1282 = vmatprep.subr.bf16.mxu0 %v1331_v21 }
  0x27   :  { %1235 = vmatmul.mubr.msk.bf16.gmra.mrb[8].mxu0 %vm171_vm0, %v1316_v10  ;;  %1252 = vmatprep.subr.bf16.mxu1 %v1324_v13 }
  0x28   :  { %1238 = vmatprep.mubr.msk.bf16.mxu0 %vm171_vm0, %v1317_v11 }
  0x29   :  { %1283 = vmatpush3.bf16.msra.mxu0 %v1331_v21  ;;  %v1334_v21 = vld [vmem:[%s1801_s3 + $0x38] sm:$0xff]  }
  0x2a   :  { %1253 = vmatpush3.bf16.msra.mxu1 %v1324_v13  ;;  %1284 = vmatprep.subr.bf16.mxu0 %v1332_v22 }
  0x2b   :  { %1254 = vmatprep.subr.bf16.mxu1 %v1325_v15 }
  0x2d   :  { %1285 = vmatpush3.bf16.msra.mxu0 %v1332_v22  ;;  %v1335_v22 = vld [vmem:[#allocation2] ss:$16 sps:$4 sm:$0xff]  }
  0x2e   :  { %1255 = vmatpush3.bf16.msra.mxu1 %v1325_v15  ;;  %1286 = vmatprep.subr.bf16.mxu0 %v1333_v20 }
  0x2f   :  { %1239 = vmatmul.mubr.msk.bf16.gmra.mrb[12].mxu0 %vm171_vm0, %v1318_v14  ;;  %1256 = vmatprep.subr.bf16.mxu1 %v1326_v16 }
  0x31   :  { %1287 = vmatpush3.bf16.msra.mxu0 %v1333_v20 }
  0x32   :  { %1257 = vmatpush3.bf16.msra.mxu1 %v1326_v16  ;;  %1288 = vmatprep.subr.bf16.mxu0 %v1334_v21 }
  0x33   :  { %823 = vmatprep.subr.bf16.mxu1 %v1337_v23 }
  0x35   :  { %1289 = vmatpush3.bf16.msra.mxu0 %v1334_v21  ;;  %v1364_v21 = vld [vmem:[#allocation2 + $0x8c] ss:$16 sps:$4 sm:$0xff]  }
  0x36   :  { %936 = vmatprep.subr.bf16.mxu0 %v1340_v25 }
  0xea   :  { %v1228_v28 = vpop.f32.mrb[0].mxu0 }
  0xeb   :  { %v239_v29 = vadd.f32 %v1228_v28, %v124_v27  ;;  %v230_v30 = vpop.f32.mrb[1].mxu0  ;;  %v1341_v28 = vld [vmem:[#allocation2 + $0x20] ss:$16 sps:$4 sm:$0xff]  }
  0xec   :  { %v231_v31 = vadd.f32 %v230_v30, %v124_v27  ;;  %v1229_v32 = vpop.f32.mrb[2].mxu0  ;;  %v1347_v30 = vld [vmem:[#allocation2 + $0x40] ss:$16 sps:$4 sm:$0xff]  }
  0xed   :  { %v242_v33 = vadd.f32 %v1229_v32, %v124_v27  ;;  %v233_v34 = vpop.f32.mrb[3].mxu0  ;;  %v295_v36 = vmax.f32 %v239_v29, 0.0  ;;  %v1349_v29 = vld [vmem:[#allocation2 + $0x44] ss:$16 sps:$4 sm:$0xff]   ;;  %v1353_v32 = vld [vmem:[#allocation2 + $0x60] ss:$16 sps:$4 sm:$0xff]  }
  0xee   :  { %v234_v35 = vadd.f32 %v233_v34, %v124_v27  ;;  %v293_v38 = vmax.f32 %v231_v31, 0.0  ;;  %v1355_v31 = vld [vmem:[#allocation2 + $0x64] ss:$16 sps:$4 sm:$0xff]   ;;  %v1359_v34 = vld [vmem:[#allocation2 + $0x80] ss:$16 sps:$4 sm:$0xff]  }
  0xef   :  { %v296_v37 = vmax.f32 %v242_v33, 0.0  ;;  %v1361_v33 = vld [vmem:[#allocation2 + $0x84] ss:$16 sps:$4 sm:$0xff]  }
  0xf0   :  { %v294_v39 = vmax.f32 %v234_v35, 0.0  ;;  %v1367_v35 = vld [vmem:[#allocation2 + $0xa4] ss:$16 sps:$4 sm:$0xff]  }
  0xf1   :  { %v310_v40 = vpack.c.bf16 %v296_v37, %v295_v36  ;;  %v1365_v36 = vld [vmem:[#allocation2 + $0xa0] ss:$16 sps:$4 sm:$0xff]   ;;  %v319_v37 = vsub.s32 1, %v1535_v24 }
  0xf2   :  { %v1232_v41 = vpop.f32.mrb[4].mxu0  ;;  %v309_v42 = vpack.c.bf16 %v294_v39, %v293_v38 }
  0xf3   :  { %v255_v43 = vadd.f32 %v1232_v41, %v124_v27  ;;  %v246_v44 = vpop.f32.mrb[5].mxu0  ;;  %v1552_v38 = vrot.slane %v1541_v26, %v319_v37 }
  0xf4   :  { %v247_v45 = vadd.f32 %v246_v44, %v124_v27  ;;  %v1233_v46 = vpop.f32.mrb[6].mxu0  ;;  %1258 = vmatprep.mubr.bf16.mxu1 %v309_v42 }
  0xf5   :  { %v299_v47 = vmax.f32 %v255_v43, 0.0  ;;  %v258_v48 = vadd.f32 %v1233_v46, %v124_v27  ;;  %v249_v49 = vpop.f32.mrb[7].mxu0  ;;  %1259 = vmatmul.mubr.bf16.vlgmr.msra.gmra.mrb[0].mxu1 %v310_v40 }
  0xf6   :  { %v297_v50 = vmax.f32 %v247_v45, 0.0  ;;  %v250_v51 = vadd.f32 %v249_v49, %v124_v27  ;;  %824 = vmatpush1.bf16.msra.mxu1 %v1335_v22 }
  0xf7   :  { %v300_v52 = vmax.f32 %v258_v48, 0.0 }
  0xf8   :  { %v298_v53 = vmax.f32 %v250_v51, 0.0 }
  0xf9   :  { %v312_v54 = vpack.c.bf16 %v300_v52, %v299_v47 }
  0xfa   :  { %v311_v55 = vpack.c.bf16 %v298_v53, %v297_v50  ;;  %v1236_v56 = vpop.f32.mrb[8].mxu0 }
  0xfb   :  { %v271_v57 = vadd.f32 %v1236_v56, %v124_v27  ;;  %v262_v58 = vpop.f32.mrb[9].mxu0 }
  0xfc   :  { %1262 = vmatprep.mubr.bf16.mxu1 %v311_v55  ;;  %v263_v59 = vadd.f32 %v262_v58, %v124_v27  ;;  %v1237_v60 = vpop.f32.mrb[10].mxu0 }
  0xfd   :  { %1263 = vmatmul.mubr.bf16.gmra.mrb[4].mxu1 %v312_v54  ;;  %v303_v61 = vmax.f32 %v271_v57, 0.0  ;;  %v274_v62 = vadd.f32 %v1237_v60, %v124_v27  ;;  %v265_v63 = vpop.f32.mrb[11].mxu0  ;;  %v1338_v54 = vld [vmem:[#allocation2 + $0x8] ss:$16 sps:$4 sm:$0xff]   ;;  %v1346_v57 = vld [vmem:[#allocation2 + $0x2c] ss:$16 sps:$4 sm:$0xff]  }
  0xfe   :  { %v301_v0 = vmax.f32 %v263_v59, 0.0  ;;  %v266_v1 = vadd.f32 %v265_v63, %v124_v27 }
  0xff   :  { %v304_v2 = vmax.f32 %v274_v62, 0.0 }
 0x100   :  { %v302_v3 = vmax.f32 %v266_v1, 0.0  ;;  %v1344_v1 = vld [vmem:[#allocation2 + $0x28] ss:$16 sps:$4 sm:$0xff]  }
 0x101   :  { %v314_v4 = vpack.c.bf16 %v304_v2, %v303_v61 }
 0x102   :  { %v313_v5 = vpack.c.bf16 %v302_v3, %v301_v0  ;;  %v1240_v6 = vpop.f32.mrb[12].mxu0  ;;  %v1352_v3 = vld [vmem:[#allocation2 + $0x4c] ss:$16 sps:$4 sm:$0xff]  }
 0x103   :  { %v287_v7 = vadd.f32 %v1240_v6, %v124_v27  ;;  %v278_v8 = vpop.f32.mrb[13].mxu0 }
 0x104   :  { %1266 = vmatprep.mubr.bf16.mxu1 %v313_v5  ;;  %v279_v9 = vadd.f32 %v278_v8, %v124_v27  ;;  %v1241_v10 = vpop.f32.mrb[14].mxu0  ;;  %v1350_v8 = vld [vmem:[#allocation2 + $0x48] ss:$16 sps:$4 sm:$0xff]  }
 0x105   :  { %1267 = vmatmul.mubr.bf16.gmra.mrb[8].mxu1 %v314_v4  ;;  %v307_v11 = vmax.f32 %v287_v7, 0.0  ;;  %v290_v12 = vadd.f32 %v1241_v10, %v124_v27  ;;  %v281_v13 = vpop.f32.mrb[15].mxu0 }
 0x106   :  { %v305_v14 = vmax.f32 %v279_v9, 0.0  ;;  %v282_v15 = vadd.f32 %v281_v13, %v124_v27  ;;  %v1343_v27 = vld [vmem:[#allocation2 + $0x24] ss:$16 sps:$4 sm:$0xff]  }
 0x107   :  { %v308_v16 = vmax.f32 %v290_v12, 0.0  ;;  %825 = vmatprep.subr.bf16.mxu1 %v1343_v27 }
 0x108   :  { %v306_v17 = vmax.f32 %v282_v15, 0.0  ;;  %826 = vmatpush1.bf16.msra.mxu1 %v1341_v28  ;;  %v1362_v28 = vld [vmem:[#allocation2 + $0x88] ss:$16 sps:$4 sm:$0xff]  }
 0x109   :  { %v316_v18 = vpack.c.bf16 %v308_v16, %v307_v11  ;;  %827 = vmatprep.subr.bf16.mxu1 %v1349_v29  ;;  %v1358_v11 = vld [vmem:[#allocation2 + $0x6c] ss:$16 sps:$4 sm:$0xff]  }
 0x10a   :  { %v315_v19 = vpack.c.bf16 %v306_v17, %v305_v14 }
 0x10c   :  { %1270 = vmatprep.mubr.bf16.mxu1 %v315_v19  ;;  %828 = vmatpush1.bf16.msra.mxu1 %v1347_v30  ;;  %v1356_v19 = vld [vmem:[#allocation2 + $0x68] ss:$16 sps:$4 sm:$0xff]  }
 0x10d   :  { %1271 = vmatmul.mubr.bf16.gmra.mrb[12].mxu1 %v316_v18  ;;  %829 = vmatprep.subr.bf16.mxu1 %v1355_v31  ;;  %v1370_v31 = vld [vmem:[#allocation2 + $0xac] ss:$16 sps:$4 sm:$0xff]  }
 0x110   :  { %830 = vmatpush1.bf16.msra.mxu1 %v1353_v32 }
 0x111   :  { %831 = vmatprep.subr.bf16.mxu1 %v1361_v33 }
 0x114   :  { %832 = vmatpush1.bf16.msra.mxu1 %v1359_v34 }
 0x115   :  { %833 = vmatprep.subr.bf16.mxu1 %v1367_v35 }
 0x118   :  { %834 = vmatpush1.bf16.msra.mxu1 %v1365_v36 }
 0x1c8   :  { %v1260_v39 = vpop.f32.mrb[0].mxu1 }
 0x1c9   :  { %v412_v40 = vadd.f32 %v1260_v39, %v1552_v38  ;;  %v403_v41 = vpop.f32.mrb[1].mxu1 }
 0x1ca   :  { %v404_v42 = vadd.f32 %v403_v41, %v1552_v38  ;;  %v1261_v43 = vpop.f32.mrb[2].mxu1 }
 0x1cb   :  { %v415_v44 = vadd.f32 %v1261_v43, %v1552_v38  ;;  %v406_v45 = vpop.f32.mrb[3].mxu1  ;;  %v468_v47 = vmax.f32 %v412_v40, 0.0  ;;  %v1368_v40 = vld [vmem:[#allocation2 + $0xa8] ss:$16 sps:$4 sm:$0xff]  }
 0x1cc   :  { %v407_v46 = vadd.f32 %v406_v45, %v1552_v38  ;;  %v466_v49 = vmax.f32 %v404_v42, 0.0  ;;  %v1373_v45 = vld [vmem:[#allocation2 + $0xc4] ss:$16 sps:$4 sm:$0xff]  }
 0x1cd   :  { %v469_v48 = vmax.f32 %v415_v44, 0.0  ;;  %835 = vmatprep.subr.bf16.mxu1 %v1373_v45 }
 0x1ce   :  { %v467_v50 = vmax.f32 %v407_v46, 0.0  ;;  %v1376_v46 = vld [vmem:[#allocation2 + $0xcc] ss:$16 sps:$4 sm:$0xff]  }
 0x1cf   :  { %v483_v51 = vpack.c.bf16 %v469_v48, %v468_v47  ;;  %v1371_v47 = vld [vmem:[#allocation2 + $0xc0] ss:$16 sps:$4 sm:$0xff]   ;;  %v1374_v48 = vld [vmem:[#allocation2 + $0xc8] ss:$16 sps:$4 sm:$0xff]  }
 0x1d0   :  { %v482_v52 = vpack.c.bf16 %v467_v50, %v466_v49  ;;  %v1264_v53 = vpop.f32.mrb[4].mxu1  ;;  %836 = vmatpush1.bf16.msra.mxu1 %v1371_v47  ;;  %v1379_v49 = vld [vmem:[#allocation2 + $0xe4] ss:$16 sps:$4 sm:$0xff]   ;;  %v1377_v50 = vld [vmem:[#allocation2 + $0xe0] ss:$16 sps:$4 sm:$0xff]  }
 0x1d1   :  { %v428_v55 = vadd.f32 %v1264_v53, %v1552_v38  ;;  %v419_v56 = vpop.f32.mrb[5].mxu1  ;;  %837 = vmatprep.subr.bf16.mxu1 %v1379_v49  ;;  %v492_v53 = vsub.s32 2, %v1535_v24 }
 0x1d2   :  { %v420_v58 = vadd.f32 %v419_v56, %v1552_v38  ;;  %v1265_v59 = vpop.f32.mrb[6].mxu1  ;;  %1290 = vmatprep.mubr.bf16.mxu0 %v482_v52  ;;  %v1410_v52 = vmov 0  }
 0x1d3   :  { %v472_v60 = vmax.f32 %v428_v55, 0.0  ;;  %v431_v61 = vadd.f32 %v1265_v59, %v1552_v38  ;;  %v422_v62 = vpop.f32.mrb[7].mxu1  ;;  %1291 = vmatmul.mubr.bf16.vlgmr.msra.gmra.mrb[16].mxu0 %v483_v51  ;;  %v1380_v51 = vld [vmem:[#allocation2 + $0xe8] ss:$16 sps:$4 sm:$0xff]   ;;  %855 = vmatprep.mubr.bf16.mxu1 %v1410_v52 }
 0x1d4   :  { %v470_v63 = vmax.f32 %v420_v58, 0.0  ;;  %v423_v0 = vadd.f32 %v422_v62, %v1552_v38  ;;  %937 = vmatpush1.bf16.msra.mxu0 %v1338_v54  ;;  %838 = vmatpush1.bf16.msra.mxu1 %v1377_v50  ;;  %v1574_v54 = vrot.slane %v1541_v26, %v492_v53 }
 0x1d5   :  { %v473_v2 = vmax.f32 %v431_v61, 0.0  ;;  %938 = vmatprep.subr.bf16.mxu0 %v1346_v57 }
 0x1d6   :  { %v471_v4 = vmax.f32 %v423_v0, 0.0 }
 0x1d7   :  { %v485_v5 = vpack.c.bf16 %v473_v2, %v472_v60 }
 0x1d8   :  { %v484_v6 = vpack.c.bf16 %v471_v4, %v470_v63  ;;  %v1268_v7 = vpop.f32.mrb[8].mxu1  ;;  %939 = vmatpush1.bf16.msra.mxu0 %v1344_v1 }
 0x1d9   :  { %v444_v9 = vadd.f32 %v1268_v7, %v1552_v38  ;;  %v435_v10 = vpop.f32.mrb[9].mxu1  ;;  %940 = vmatprep.subr.bf16.mxu0 %v1352_v3 }
 0x1da   :  { %1294 = vmatprep.mubr.bf16.mxu0 %v484_v6  ;;  %v436_v12 = vadd.f32 %v435_v10, %v1552_v38  ;;  %v1269_v13 = vpop.f32.mrb[10].mxu1 }
 0x1db   :  { %1295 = vmatmul.mubr.bf16.gmra.mrb[20].mxu0 %v485_v5  ;;  %v476_v14 = vmax.f32 %v444_v9, 0.0  ;;  %v447_v15 = vadd.f32 %v1269_v13, %v1552_v38  ;;  %v438_v16 = vpop.f32.mrb[11].mxu1 }
 0x1dc   :  { %v474_v17 = vmax.f32 %v436_v12, 0.0  ;;  %v439_v18 = vadd.f32 %v438_v16, %v1552_v38  ;;  %941 = vmatpush1.bf16.msra.mxu0 %v1350_v8 }
 0x1dd   :  { %v477_v20 = vmax.f32 %v447_v15, 0.0  ;;  %942 = vmatprep.subr.bf16.mxu0 %v1358_v11 }
 0x1de   :  { %v475_v22 = vmax.f32 %v439_v18, 0.0 }
 0x1df   :  { %v487_v23 = vpack.c.bf16 %v477_v20, %v476_v14 }
 0x1e0   :  { %v486_v25 = vpack.c.bf16 %v475_v22, %v474_v17  ;;  %v1272_v27 = vpop.f32.mrb[12].mxu1  ;;  %943 = vmatpush1.bf16.msra.mxu0 %v1356_v19 }
 0x1e1   :  { %v460_v29 = vadd.f32 %v1272_v27, %v1552_v38  ;;  %v451_v30 = vpop.f32.mrb[13].mxu1  ;;  %944 = vmatprep.subr.bf16.mxu0 %v1364_v21 }
 0x1e2   :  { %1298 = vmatprep.mubr.bf16.mxu0 %v486_v25  ;;  %v452_v32 = vadd.f32 %v451_v30, %v1552_v38  ;;  %v1273_v33 = vpop.f32.mrb[14].mxu1 }
 0x1e3   :  { %1299 = vmatmul.mubr.bf16.gmra.mrb[24].mxu0 %v487_v23  ;;  %v480_v34 = vmax.f32 %v460_v29, 0.0  ;;  %v463_v35 = vadd.f32 %v1273_v33, %v1552_v38  ;;  %v454_v36 = vpop.f32.mrb[15].mxu1 }
 0x1e4   :  { %v478_v37 = vmax.f32 %v452_v32, 0.0  ;;  %v455_v39 = vadd.f32 %v454_v36, %v1552_v38  ;;  %945 = vmatpush1.bf16.msra.mxu0 %v1362_v28  ;;  %v1382_v38 = vld [vmem:[#allocation2 + $0xec] ss:$16 sps:$4 sm:$0xff]  }
 0x1e5   :  { %v481_v41 = vmax.f32 %v463_v35, 0.0  ;;  %946 = vmatprep.subr.bf16.mxu0 %v1370_v31 }
 0x1e6   :  { %v479_v42 = vmax.f32 %v455_v39, 0.0 }
 0x1e7   :  { %v489_v43 = vpack.c.bf16 %v481_v41, %v480_v34 }
 0x1e8   :  { %v488_v44 = vpack.c.bf16 %v479_v42, %v478_v37  ;;  %947 = vmatpush1.bf16.msra.mxu0 %v1368_v40 }
 0x1e9   :  { %948 = vmatprep.subr.bf16.mxu0 %v1376_v46 }
 0x1ea   :  { %1302 = vmatprep.mubr.bf16.mxu0 %v488_v44 }
 0x1eb   :  { %1303 = vmatmul.mubr.bf16.gmra.mrb[28].mxu0 %v489_v43 }
 0x1ec   :  { %949 = vmatpush1.bf16.msra.mxu0 %v1374_v48  ;;  %968 = vmatprep.mubr.bf16.mxu0 %v1410_v52 }
 0x1ed   :  { %950 = vmatprep.subr.bf16.mxu0 %v1382_v38 }
 0x1f0   :  { %951 = vmatpush1.bf16.msra.mxu0 %v1380_v51 }
 0x2a6   :  { %v1292_v55 = vpop.f32.mrb[16].mxu0 }
 0x2a7   :  { %v585_v56 = vadd.f32 %v1292_v55, %v1574_v54  ;;  %v576_v57 = vpop.f32.mrb[17].mxu0 }
 0x2a8   :  { %v577_v58 = vadd.f32 %v576_v57, %v1574_v54  ;;  %v1293_v59 = vpop.f32.mrb[18].mxu0 }
 0x2a9   :  { %v588_v60 = vadd.f32 %v1293_v59, %v1574_v54  ;;  %v579_v61 = vpop.f32.mrb[19].mxu0  ;;  %v641_v63 = vmax.f32 %v585_v56, 0.0 }
 0x2aa   :  { %v580_v62 = vadd.f32 %v579_v61, %v1574_v54  ;;  %v639_v1 = vmax.f32 %v577_v58, 0.0 }
 0x2ab   :  { %v642_v0 = vmax.f32 %v588_v60, 0.0 }
 0x2ac   :  { %v640_v2 = vmax.f32 %v580_v62, 0.0 }
 0x2ad   :  { %v656_v24 = vpack.c.bf16 %v642_v0, %v641_v63 }
 0x2ae   :  { %v655_v3 = vpack.c.bf16 %v640_v2, %v639_v1  ;;  %v1296_v26 = vpop.f32.mrb[20].mxu0 }
 0x2af   :  { %v601_v4 = vadd.f32 %v1296_v26, %v1574_v54  ;;  %v592_v5 = vpop.f32.mrb[21].mxu0 }
 0x2b0   :  { %v593_v6 = vadd.f32 %v592_v5, %v1574_v54  ;;  %v1297_v7 = vpop.f32.mrb[22].mxu0  ;;  %856 = vmatmul.mubr.bf16.vlgmr.msra.gmra.mrb[16].mxu1 %v655_v3  ;;  %969 = vmatmul.mubr.bf16.vlgmr.msra.gmra.mrb[32].mxu0 %v655_v3 }
 0x2b1   :  { %v604_v8 = vadd.f32 %v1297_v7, %v1574_v54  ;;  %v595_v9 = vpop.f32.mrb[23].mxu0  ;;  %865 = vmatprep.mubr.bf16.mxu1 %v1410_v52  ;;  %978 = vmatprep.mubr.bf16.mxu0 %v1410_v52  ;;  %v645_v11 = vmax.f32 %v601_v4, 0.0 }
 0x2b2   :  { %v596_v10 = vadd.f32 %v595_v9, %v1574_v54  ;;  %v643_v13 = vmax.f32 %v593_v6, 0.0 }
 0x2b3   :  { %v646_v12 = vmax.f32 %v604_v8, 0.0 }
 0x2b4   :  { %v644_v14 = vmax.f32 %v596_v10, 0.0 }
 0x2b5   :  { %v658_v15 = vpack.c.bf16 %v646_v12, %v645_v11 }
 0x2b6   :  { %v657_v16 = vpack.c.bf16 %v644_v14, %v643_v13  ;;  %v1300_v17 = vpop.f32.mrb[24].mxu0 }
 0x2b7   :  { %v617_v18 = vadd.f32 %v1300_v17, %v1574_v54  ;;  %v608_v19 = vpop.f32.mrb[25].mxu0 }
 0x2b8   :  { %866 = vmatmul.mubr.bf16.gmra.mrb[20].mxu1 %v656_v24  ;;  %979 = vmatmul.mubr.bf16.gmra.mrb[36].mxu0 %v656_v24  ;;  %v609_v20 = vadd.f32 %v608_v19, %v1574_v54  ;;  %v1301_v21 = vpop.f32.mrb[26].mxu0 }
 0x2b9   :  { %v649_v22 = vmax.f32 %v617_v18, 0.0  ;;  %v620_v23 = vadd.f32 %v1301_v21, %v1574_v54  ;;  %v611_v25 = vpop.f32.mrb[27].mxu0  ;;  %875 = vmatprep.mubr.bf16.mxu1 %v1410_v52  ;;  %988 = vmatprep.mubr.bf16.mxu0 %v1410_v52 }
 0x2ba   :  { %v647_v27 = vmax.f32 %v609_v20, 0.0  ;;  %v612_v28 = vadd.f32 %v611_v25, %v1574_v54 }
 0x2bb   :  { %v650_v29 = vmax.f32 %v620_v23, 0.0 }
 0x2bc   :  { %v648_v30 = vmax.f32 %v612_v28, 0.0 }
 0x2bd   :  { %v660_v31 = vpack.c.bf16 %v650_v29, %v649_v22 }
 0x2be   :  { %v659_v32 = vpack.c.bf16 %v648_v30, %v647_v27  ;;  %v1304_v33 = vpop.f32.mrb[28].mxu0 }
 0x2bf   :  { %v633_v34 = vadd.f32 %v1304_v33, %v1574_v54  ;;  %v624_v35 = vpop.f32.mrb[29].mxu0 }
 0x2c0   :  { %876 = vmatmul.mubr.bf16.gmra.mrb[24].mxu1 %v657_v16  ;;  %989 = vmatmul.mubr.bf16.gmra.mrb[40].mxu0 %v657_v16  ;;  %v625_v36 = vadd.f32 %v624_v35, %v1574_v54  ;;  %v1305_v37 = vpop.f32.mrb[30].mxu0 }
 0x2c1   :  { %885 = vmatprep.mubr.bf16.mxu1 %v1410_v52  ;;  %998 = vmatprep.mubr.bf16.mxu0 %v1410_v52  ;;  %v653_v39 = vmax.f32 %v633_v34, 0.0  ;;  %v636_v40 = vadd.f32 %v1305_v37, %v1574_v54  ;;  %v627_v41 = vpop.f32.mrb[31].mxu0 }
 0x2c2   :  { %v651_v42 = vmax.f32 %v625_v36, 0.0  ;;  %v628_v43 = vadd.f32 %v627_v41, %v1574_v54 }
 0x2c3   :  { %v654_v44 = vmax.f32 %v636_v40, 0.0 }
 0x2c4   :  { %v652_v45 = vmax.f32 %v628_v43, 0.0 }
 0x2c5   :  { %v662_v46 = vpack.c.bf16 %v654_v44, %v653_v39 }
 0x2c6   :  { %v661_v47 = vpack.c.bf16 %v652_v45, %v651_v42 }
 0x2c8   :  { %886 = vmatmul.mubr.bf16.gmra.mrb[28].mxu1 %v658_v15  ;;  %999 = vmatmul.mubr.bf16.gmra.mrb[44].mxu0 %v658_v15 }
 0x2c9   :  { %895 = vmatprep.mubr.bf16.mxu1 %v1410_v52  ;;  %1008 = vmatprep.mubr.bf16.mxu0 %v1410_v52 }
 0x2d0   :  { %896 = vmatmul.mubr.bf16.gmra.mrb[32].mxu1 %v659_v32  ;;  %1009 = vmatmul.mubr.bf16.gmra.mrb[48].mxu0 %v659_v32 }
 0x2d1   :  { %905 = vmatprep.mubr.bf16.mxu1 %v1410_v52  ;;  %1018 = vmatprep.mubr.bf16.mxu0 %v1410_v52 }
 0x2d8   :  { %906 = vmatmul.mubr.bf16.gmra.mrb[36].mxu1 %v660_v31  ;;  %1019 = vmatmul.mubr.bf16.gmra.mrb[52].mxu0 %v660_v31 }
 0x2d9   :  { %915 = vmatprep.mubr.bf16.mxu1 %v1410_v52  ;;  %1028 = vmatprep.mubr.bf16.mxu0 %v1410_v52 }
 0x2e0   :  { %916 = vmatmul.mubr.bf16.gmra.mrb[40].mxu1 %v661_v47  ;;  %1029 = vmatmul.mubr.bf16.gmra.mrb[56].mxu0 %v661_v47 }
 0x2e1   :  { %925 = vmatprep.mubr.bf16.mxu1 %v1410_v52  ;;  %1038 = vmatprep.mubr.bf16.mxu0 %v1410_v52 }
 0x2e8   :  { %926 = vmatmul.mubr.bf16.gmra.mrb[44].mxu1 %v662_v46  ;;  %1039 = vmatmul.mubr.bf16.gmra.mrb[60].mxu0 %v662_v46 }
 0x383   :  { %v857_v48 = vpop.f32.mrb[16].mxu1  ;;  %v970_v49 = vpop.f32.mrb[32].mxu0 }
 0x384   :  { %1049 = vst [vmem:[%s1804_s6] sm:$0xff] %v857_v48  ;;  %1051 = vst [vmem:[%s1804_s6 + $0x10] sm:$0xff] %v970_v49  ;;  %v859_v38 = vpop.f32.mrb[17].mxu1  ;;  %v972_v50 = vpop.f32.mrb[33].mxu0 }
 0x385   :  { %1050 = vst [vmem:[%s1804_s6 + $0x8] sm:$0xff] %v859_v38  ;;  %1052 = vst [vmem:[%s1804_s6 + $0x18] sm:$0xff] %v972_v50  ;;  %v861_v51 = vpop.f32.mrb[18].mxu1  ;;  %v974_v52 = vpop.f32.mrb[34].mxu0 }
 0x386   :  { %1053 = vst [vmem:[%s1804_s6 + $0x20] sm:$0xff] %v861_v51  ;;  %1055 = vst [vmem:[%s1804_s6 + $0x30] sm:$0xff] %v974_v52  ;;  %v863_v53 = vpop.f32.mrb[19].mxu1  ;;  %v976_v54 = vpop.f32.mrb[35].mxu0 }
 0x387   :  { %1054 = vst [vmem:[%s1804_s6 + $0x28] sm:$0xff] %v863_v53  ;;  %1056 = vst [vmem:[%s1804_s6 + $0x38] sm:$0xff] %v976_v54 }
 0x38b   :  { %v867_v55 = vpop.f32.mrb[20].mxu1  ;;  %v980_v56 = vpop.f32.mrb[36].mxu0 }
 0x38c   :  { %1057 = vst [vmem:[%s1804_s6 + $0x40] sm:$0xff] %v867_v55  ;;  %1059 = vst [vmem:[%s1804_s6 + $0x50] sm:$0xff] %v980_v56  ;;  %v869_v57 = vpop.f32.mrb[21].mxu1  ;;  %v982_v58 = vpop.f32.mrb[37].mxu0 }
 0x38d   :  { %1058 = vst [vmem:[%s1804_s6 + $0x48] sm:$0xff] %v869_v57  ;;  %1060 = vst [vmem:[%s1804_s6 + $0x58] sm:$0xff] %v982_v58  ;;  %v871_v59 = vpop.f32.mrb[22].mxu1  ;;  %v984_v60 = vpop.f32.mrb[38].mxu0 }
 0x38e   :  { %1061 = vst [vmem:[%s1804_s6 + $0x60] sm:$0xff] %v871_v59  ;;  %1063 = vst [vmem:[%s1804_s6 + $0x70] sm:$0xff] %v984_v60  ;;  %v873_v61 = vpop.f32.mrb[23].mxu1  ;;  %v986_v62 = vpop.f32.mrb[39].mxu0 }
 0x38f   :  { %1062 = vst [vmem:[%s1804_s6 + $0x68] sm:$0xff] %v873_v61  ;;  %1064 = vst [vmem:[%s1804_s6 + $0x78] sm:$0xff] %v986_v62 }
 0x393   :  { %v877_v63 = vpop.f32.mrb[24].mxu1  ;;  %v990_v0 = vpop.f32.mrb[40].mxu0 }
 0x394   :  { %1065 = vst [vmem:[%s1804_s6 + $0x80] sm:$0xff] %v877_v63  ;;  %1067 = vst [vmem:[%s1804_s6 + $0x90] sm:$0xff] %v990_v0  ;;  %v879_v1 = vpop.f32.mrb[25].mxu1  ;;  %v992_v2 = vpop.f32.mrb[41].mxu0 }
 0x395   :  { %1066 = vst [vmem:[%s1804_s6 + $0x88] sm:$0xff] %v879_v1  ;;  %1068 = vst [vmem:[%s1804_s6 + $0x98] sm:$0xff] %v992_v2  ;;  %v881_v24 = vpop.f32.mrb[26].mxu1  ;;  %v994_v3 = vpop.f32.mrb[42].mxu0 }
 0x396   :  { %1069 = vst [vmem:[%s1804_s6 + $0xa0] sm:$0xff] %v881_v24  ;;  %1071 = vst [vmem:[%s1804_s6 + $0xb0] sm:$0xff] %v994_v3  ;;  %v883_v26 = vpop.f32.mrb[27].mxu1  ;;  %v996_v4 = vpop.f32.mrb[43].mxu0 }
 0x397   :  { %1070 = vst [vmem:[%s1804_s6 + $0xa8] sm:$0xff] %v883_v26  ;;  %1072 = vst [vmem:[%s1804_s6 + $0xb8] sm:$0xff] %v996_v4 }
 0x39b   :  { %v887_v5 = vpop.f32.mrb[28].mxu1  ;;  %v1000_v6 = vpop.f32.mrb[44].mxu0 }
 0x39c   :  { %1073 = vst [vmem:[%s1804_s6 + $0xc0] sm:$0xff] %v887_v5  ;;  %1075 = vst [vmem:[%s1804_s6 + $0xd0] sm:$0xff] %v1000_v6  ;;  %v889_v7 = vpop.f32.mrb[29].mxu1  ;;  %v1002_v8 = vpop.f32.mrb[45].mxu0 }
 0x39d   :  { %1074 = vst [vmem:[%s1804_s6 + $0xc8] sm:$0xff] %v889_v7  ;;  %1076 = vst [vmem:[%s1804_s6 + $0xd8] sm:$0xff] %v1002_v8  ;;  %v891_v9 = vpop.f32.mrb[30].mxu1  ;;  %v1004_v10 = vpop.f32.mrb[46].mxu0 }
 0x39e   :  { %1077 = vst [vmem:[%s1804_s6 + $0xe0] sm:$0xff] %v891_v9  ;;  %1079 = vst [vmem:[%s1804_s6 + $0xf0] sm:$0xff] %v1004_v10  ;;  %v893_v11 = vpop.f32.mrb[31].mxu1  ;;  %v1006_v12 = vpop.f32.mrb[47].mxu0 }
 0x39f   :  { %1078 = vst [vmem:[%s1804_s6 + $0xe8] sm:$0xff] %v893_v11  ;;  %1080 = vst [vmem:[%s1804_s6 + $0xf8] sm:$0xff] %v1006_v12 }
 0x3a3   :  { %v897_v13 = vpop.f32.mrb[32].mxu1  ;;  %v1010_v14 = vpop.f32.mrb[48].mxu0 }
 0x3a4   :  { %1081 = vst [vmem:[%s1804_s6 + $0x100] sm:$0xff] %v897_v13  ;;  %1083 = vst [vmem:[%s1804_s6 + $0x110] sm:$0xff] %v1010_v14  ;;  %v899_v15 = vpop.f32.mrb[33].mxu1  ;;  %v1012_v16 = vpop.f32.mrb[49].mxu0 }
 0x3a5   :  { %1082 = vst [vmem:[%s1804_s6 + $0x108] sm:$0xff] %v899_v15  ;;  %1084 = vst [vmem:[%s1804_s6 + $0x118] sm:$0xff] %v1012_v16  ;;  %v901_v17 = vpop.f32.mrb[34].mxu1  ;;  %v1014_v18 = vpop.f32.mrb[50].mxu0 }
 0x3a6   :  { %1085 = vst [vmem:[%s1804_s6 + $0x120] sm:$0xff] %v901_v17  ;;  %1087 = vst [vmem:[%s1804_s6 + $0x130] sm:$0xff] %v1014_v18  ;;  %v903_v19 = vpop.f32.mrb[35].mxu1  ;;  %v1016_v20 = vpop.f32.mrb[51].mxu0 }
 0x3a7   :  { %1086 = vst [vmem:[%s1804_s6 + $0x128] sm:$0xff] %v903_v19  ;;  %1088 = vst [vmem:[%s1804_s6 + $0x138] sm:$0xff] %v1016_v20 }
 0x3ab   :  { %v907_v21 = vpop.f32.mrb[36].mxu1  ;;  %v1020_v22 = vpop.f32.mrb[52].mxu0 }
 0x3ac   :  { %1089 = vst [vmem:[%s1804_s6 + $0x140] sm:$0xff] %v907_v21  ;;  %1091 = vst [vmem:[%s1804_s6 + $0x150] sm:$0xff] %v1020_v22  ;;  %v909_v23 = vpop.f32.mrb[37].mxu1  ;;  %v1022_v25 = vpop.f32.mrb[53].mxu0 }
 0x3ad   :  { %1090 = vst [vmem:[%s1804_s6 + $0x148] sm:$0xff] %v909_v23  ;;  %1092 = vst [vmem:[%s1804_s6 + $0x158] sm:$0xff] %v1022_v25  ;;  %v911_v27 = vpop.f32.mrb[38].mxu1  ;;  %v1024_v28 = vpop.f32.mrb[54].mxu0 }
 0x3ae   :  { %1093 = vst [vmem:[%s1804_s6 + $0x160] sm:$0xff] %v911_v27  ;;  %1095 = vst [vmem:[%s1804_s6 + $0x170] sm:$0xff] %v1024_v28  ;;  %v913_v29 = vpop.f32.mrb[39].mxu1  ;;  %v1026_v30 = vpop.f32.mrb[55].mxu0 }
 0x3af   :  { %1094 = vst [vmem:[%s1804_s6 + $0x168] sm:$0xff] %v913_v29  ;;  %1096 = vst [vmem:[%s1804_s6 + $0x178] sm:$0xff] %v1026_v30 }
 0x3b3   :  { %v917_v31 = vpop.f32.mrb[40].mxu1  ;;  %v1030_v32 = vpop.f32.mrb[56].mxu0 }
 0x3b4   :  { %1097 = vst [vmem:[%s1804_s6 + $0x180] sm:$0xff] %v917_v31  ;;  %1099 = vst [vmem:[%s1804_s6 + $0x190] sm:$0xff] %v1030_v32  ;;  %v919_v33 = vpop.f32.mrb[41].mxu1  ;;  %v1032_v34 = vpop.f32.mrb[57].mxu0 }
 0x3b5   :  { %1098 = vst [vmem:[%s1804_s6 + $0x188] sm:$0xff] %v919_v33  ;;  %1100 = vst [vmem:[%s1804_s6 + $0x198] sm:$0xff] %v1032_v34  ;;  %v921_v35 = vpop.f32.mrb[42].mxu1  ;;  %v1034_v36 = vpop.f32.mrb[58].mxu0 }
 0x3b6   :  { %1101 = vst [vmem:[%s1804_s6 + $0x1a0] sm:$0xff] %v921_v35  ;;  %1103 = vst [vmem:[%s1804_s6 + $0x1b0] sm:$0xff] %v1034_v36  ;;  %v923_v37 = vpop.f32.mrb[43].mxu1  ;;  %v1036_v39 = vpop.f32.mrb[59].mxu0 }
 0x3b7   :  { %1102 = vst [vmem:[%s1804_s6 + $0x1a8] sm:$0xff] %v923_v37  ;;  %1104 = vst [vmem:[%s1804_s6 + $0x1b8] sm:$0xff] %v1036_v39 }
 0x3bb   :  { %v927_v40 = vpop.f32.mrb[44].mxu1  ;;  %v1040_v41 = vpop.f32.mrb[60].mxu0 }
 0x3bc   :  { %1105 = vst [vmem:[%s1804_s6 + $0x1c0] sm:$0xff] %v927_v40  ;;  %1107 = vst [vmem:[%s1804_s6 + $0x1d0] sm:$0xff] %v1040_v41  ;;  %v929_v42 = vpop.f32.mrb[45].mxu1  ;;  %v1042_v43 = vpop.f32.mrb[61].mxu0 }
 0x3bd   :  { %1106 = vst [vmem:[%s1804_s6 + $0x1c8] sm:$0xff] %v929_v42  ;;  %1108 = vst [vmem:[%s1804_s6 + $0x1d8] sm:$0xff] %v1042_v43  ;;  %v931_v44 = vpop.f32.mrb[46].mxu1  ;;  %v1044_v45 = vpop.f32.mrb[62].mxu0 }
 0x3be   :  { %1109 = vst [vmem:[%s1804_s6 + $0x1e0] sm:$0xff] %v931_v44  ;;  %1111 = vst [vmem:[%s1804_s6 + $0x1f0] sm:$0xff] %v1044_v45  ;;  %v933_v46 = vpop.f32.mrb[47].mxu1  ;;  %v1046_v47 = vpop.f32.mrb[63].mxu0 }
 0x3bf   :  { %1110 = vst [vmem:[%s1804_s6 + $0x1e8] sm:$0xff] %v933_v46  ;;  %1112 = vst [vmem:[%s1804_s6 + $0x1f8] sm:$0xff] %v1046_v47 }
 0x3c0   :  { %1117 = vsyncpa [#allocation3], 1 }

// kernel: actor_critic_rollout.4
= control target key start
LH: loop header
LB: loop body
LE: loop exit
PB: predicated region body
PF: predicated region fallthrough
CT: control target
= control target key end

     0   :  { %12 = vsyncpa [#allocation5], 0  ;;  %s2632_s0 = inlined_call_operand.vmem [shape: f32[16,8,512], index: 0, kind: input, shape index: {}]   ;;  %s2633_s1 = inlined_call_operand.vmem [shape: f32[8,128], index: 1, kind: input, shape index: {}]   ;;  %s2634_s2 = inlined_call_operand.vmem [shape: f32[8,128], index: 2, kind: input, shape index: {}]   ;;  %s2635_s3 = inlined_call_operand.vmem [shape: bf16[128,512], index: 3, kind: input, shape index: {}]   ;;  %s2636_s4 = inlined_call_operand.vmem [shape: bf16[16,8,128], index: 4, kind: output, shape index: {0}]   ;;  %s2637_s5 = inlined_call_operand.hbm [shape: f32[8,128], index: 5, kind: output, shape index: {1}]   ;;  %s2638_s6 = inlined_call_operand.hbm [shape: f32[8,128], index: 6, kind: output, shape index: {2}]  }
   0x1   :  { %13 = vsyncpa [#allocation7], 0  ;;  %s1995_s21 = smov 0  }
   0x2 LB: > { %s2001_s22 = sadd.s32 4294967295, %s1955_s21   ;;  %p1552_p0 = scmp.ge.s32.totalorder %s1955_s21, 1  ;;  %s1955_s21 = sphi %s1995_s21, %s19_s21  }
   0x3   : > { %p211_p1 = scmp.lt.s32.totalorder %s1955_s21, 3 }
   0x5   : > { %p212_p2 = pnand %p1552_p0, %p211_p1 }
   0x6   : > { %s1553_s23 = sshll.u32 (!%p212_p2), %s2001_s22, 3  ;;  %p1558_p4 = scmp.ne.s32.totalorder (!%p212_p2), %s2001_s22, 0 }
   0x7   : > { %215 = sbr.rel (%p212_p2) target bundleno = 2190 (0x88e), region = 36  ;;  %p243_p3 = scmp.lt.s32.totalorder (!%p212_p2), %s1553_s23, 15 }
   0xe   : > { %s2640_s23 = smov (!%p243_p3, %s1553_s23), 15  ;;  %259 = sbr.rel (%p1558_p4) target bundleno = 21 (0x15), region = 40 }
   0xf   : > { %s1657_s24 = sshll.u32 %s2640_s23, 5  ;;  %s1557_s25 = sshll.u32 %s2640_s23, 2  ;;  %v260_v0 = vld [vmem:[%s2633_s1] sm:$0xff] (!%p1558_p4) }
  0x10   : > { %s2009_s28 = scalar_lea.vmem %s2632_s0, %s1657_s24  ;;  %s2014_s7 = scalar_lea.vmem %s2636_s4, %s1557_s25  ;;  %v262_v1 = vld [vmem:[%s2634_s2] sm:$0xff] (!%p1558_p4)  ;;  %261 = vst [vmem:[#allocation2] sm:$0xff] (!%p1558_p4), %v260_v0 }
  0x11   : > { %263 = vst [vmem:[#allocation3] sm:$0xff] (!%p1558_p4), %v262_v1 }
  0x15 PF: > { %v2026_v2 = vld [vmem:[%s2635_s3 + $0x4] ss:$16 sps:$4 sm:$0xff]   ;;  %v2031_v3 = vld [vmem:[%s2635_s3] ss:$16 sps:$4 sm:$0xff]   ;;  %v1957_v4 = vmov 0   ;;  %v299_v38 = vld [vmem:[%s2009_s28 + $0x8] sm:$0xff] }
  0x16   : > { %495 = vmatprep.mubr.bf16.mxu0 %v1957_v4  ;;  %536 = vmatprep.mubr.bf16.mxu1 %v1957_v4  ;;  %v2039_v5 = vld [vmem:[%s2635_s3 + $0x24] ss:$16 sps:$4 sm:$0xff]   ;;  %v2045_v6 = vld [vmem:[%s2635_s3 + $0x20] ss:$16 sps:$4 sm:$0xff]   ;;  %v2056_v8 = vld [vmem:[%s2635_s3 + $0xc] ss:$16 sps:$4 sm:$0xff]  }
  0x17   : > { %463 = vmatprep.subr.bf16.mxu0 %v2026_v2  ;;  %v2051_v7 = vld [vmem:[%s2635_s3 + $0x44] ss:$16 sps:$4 sm:$0xff]   ;;  %v2061_v9 = vld [vmem:[%s2635_s3 + $0x8] ss:$16 sps:$4 sm:$0xff]   ;;  %v2067_v10 = vld [vmem:[%s2635_s3 + $0x40] ss:$16 sps:$4 sm:$0xff]   ;;  %504 = vmatprep.subr.bf16.mxu1 %v2056_v8 }
  0x18   : > { %464 = vmatpush1.bf16.msra.mxu0 %v2031_v3  ;;  %v2074_v11 = vld [vmem:[%s2635_s3 + $0x64] ss:$16 sps:$4 sm:$0xff]   ;;  %505 = vmatpush1.bf16.msra.mxu1 %v2061_v9  ;;  %v2080_v12 = vld [vmem:[%s2635_s3 + $0x2c] ss:$16 sps:$4 sm:$0xff]   ;;  %v2085_v13 = vld [vmem:[%s2635_s3 + $0x28] ss:$16 sps:$4 sm:$0xff]  }
  0x19   : > { %465 = vmatprep.subr.bf16.mxu0 %v2039_v5  ;;  %506 = vmatprep.subr.bf16.mxu1 %v2080_v12  ;;  %v2092_v14 = vld [vmem:[%s2635_s3 + $0x60] ss:$16 sps:$4 sm:$0xff]   ;;  %v2097_v15 = vld [vmem:[%s2635_s3 + $0x84] ss:$16 sps:$4 sm:$0xff]   ;;  %v2102_v16 = vld [vmem:[%s2635_s3 + $0x4c] ss:$16 sps:$4 sm:$0xff]  }
  0x1a   : > { %v2109_v17 = vld [vmem:[%s2635_s3 + $0x48] ss:$16 sps:$4 sm:$0xff]   ;;  %v2115_v18 = vld [vmem:[%s2635_s3 + $0x6c] ss:$16 sps:$4 sm:$0xff]   ;;  %v2121_v19 = vld [vmem:[%s2635_s3 + $0x80] ss:$16 sps:$4 sm:$0xff]  }
  0x1b   : > { %v2127_v20 = vld [vmem:[%s2635_s3 + $0xa4] ss:$16 sps:$4 sm:$0xff]   ;;  %v2133_v21 = vld [vmem:[%s2635_s3 + $0x68] ss:$16 sps:$4 sm:$0xff]   ;;  %v2139_v22 = vld [vmem:[%s2635_s3 + $0x8c] ss:$16 sps:$4 sm:$0xff]  }
  0x1c   : > { %466 = vmatpush1.bf16.msra.mxu0 %v2045_v6  ;;  %507 = vmatpush1.bf16.msra.mxu1 %v2085_v13  ;;  %v2144_v23 = vld [vmem:[%s2635_s3 + $0xa0] ss:$16 sps:$4 sm:$0xff]   ;;  %v2150_v24 = vld [vmem:[%s2635_s3 + $0xc4] ss:$16 sps:$4 sm:$0xff]   ;;  %v2157_v25 = vld [vmem:[%s2635_s3 + $0x88] ss:$16 sps:$4 sm:$0xff]  }
  0x1d   : > { %467 = vmatprep.subr.bf16.mxu0 %v2051_v7  ;;  %508 = vmatprep.subr.bf16.mxu1 %v2102_v16  ;;  %v2163_v26 = vld [vmem:[%s2635_s3 + $0xac] ss:$16 sps:$4 sm:$0xff]   ;;  %v2169_v27 = vld [vmem:[%s2635_s3 + $0xc0] ss:$16 sps:$4 sm:$0xff]   ;;  %v2175_v28 = vld [vmem:[%s2635_s3 + $0xe4] ss:$16 sps:$4 sm:$0xff]  }
  0x1e   : > { %v2181_v29 = vld [vmem:[%s2635_s3 + $0xa8] ss:$16 sps:$4 sm:$0xff]   ;;  %v2187_v30 = vld [vmem:[%s2635_s3 + $0xcc] ss:$16 sps:$4 sm:$0xff]   ;;  %v2193_v31 = vld [vmem:[%s2635_s3 + $0xe0] ss:$16 sps:$4 sm:$0xff]  }
  0x1f   : > { %v296_v32 = vld [vmem:[#allocation2] sm:$0xff]  ;;  %v2200_v33 = vld [vmem:[%s2635_s3 + $0xc8] ss:$16 sps:$4 sm:$0xff]   ;;  %v2206_v34 = vld [vmem:[%s2635_s3 + $0xec] ss:$16 sps:$4 sm:$0xff]   ;;  %p1650_p5 = scmp.ne.s32.totalorder %s2001_s22, 1 }
  0x20   : > { %468 = vmatpush1.bf16.msra.mxu0 %v2067_v10  ;;  %509 = vmatpush1.bf16.msra.mxu1 %v2109_v17  ;;  %v302_v35 = vpack.c.bf16 %v296_v32, %v296_v32  ;;  %v2213_v36 = vld [vmem:[%s2635_s3 + $0xe8] ss:$16 sps:$4 sm:$0xff]   ;;  %v298_v37 = vld [vmem:[%s2009_s28] sm:$0xff]  ;;  %v300_v53 = vld [vmem:[%s2009_s28 + $0x10] sm:$0xff] }
  0x21   : > { %469 = vmatprep.subr.bf16.mxu0 %v2074_v11  ;;  %510 = vmatprep.subr.bf16.mxu1 %v2115_v18  ;;  %v301_v47 = vld [vmem:[%s2009_s28 + $0x18] sm:$0xff]  ;;  %v297_v62 = vld [vmem:[#allocation3] sm:$0xff] }
  0x24   : > { %470 = vmatpush1.bf16.msra.mxu0 %v2092_v14  ;;  %511 = vmatpush1.bf16.msra.mxu1 %v2133_v21 }
  0x25   : > { %471 = vmatprep.subr.bf16.mxu0 %v2097_v15  ;;  %512 = vmatprep.subr.bf16.mxu1 %v2139_v22 }
  0x28   : > { %472 = vmatpush1.bf16.msra.mxu0 %v2121_v19  ;;  %513 = vmatpush1.bf16.msra.mxu1 %v2157_v25 }
  0x29   : > { %473 = vmatprep.subr.bf16.mxu0 %v2127_v20  ;;  %514 = vmatprep.subr.bf16.mxu1 %v2163_v26 }
  0x2c   : > { %474 = vmatpush1.bf16.msra.mxu0 %v2144_v23  ;;  %515 = vmatpush1.bf16.msra.mxu1 %v2181_v29 }
  0x2d   : > { %475 = vmatprep.subr.bf16.mxu0 %v2150_v24  ;;  %516 = vmatprep.subr.bf16.mxu1 %v2187_v30 }
  0x30   : > { %476 = vmatpush1.bf16.msra.mxu0 %v2169_v27  ;;  %517 = vmatpush1.bf16.msra.mxu1 %v2200_v33 }
  0x31   : > { %477 = vmatprep.subr.bf16.mxu0 %v2175_v28  ;;  %518 = vmatprep.subr.bf16.mxu1 %v2206_v34 }
  0x34   : > { %478 = vmatpush1.bf16.msra.mxu0 %v2193_v31  ;;  %519 = vmatpush1.bf16.msra.mxu1 %v2213_v36 }
  0x35   : > { %585 = vmatprep.subr.bf16.mxu0 %v2026_v2  ;;  %626 = vmatprep.subr.bf16.mxu1 %v2056_v8 }
  0x37   : > { %496 = vmatmul.mubr.bf16.vlgmr.msra.gmra.mrb[0].mxu0 %v302_v35  ;;  %537 = vmatmul.mubr.bf16.vlgmr.msra.gmra.mrb[0].mxu1 %v302_v35 }
  0x38   : > { %586 = vmatpush1.bf16.msra.mxu0 %v2031_v3  ;;  %617 = vmatprep.mubr.bf16.mxu0 %v1957_v4 }
  0x39   : > { %587 = vmatprep.subr.bf16.mxu0 %v2039_v5  ;;  %627 = vmatpush1.bf16.msra.mxu1 %v2061_v9 }
  0x3a   : > { %628 = vmatprep.subr.bf16.mxu1 %v2080_v12  ;;  %658 = vmatprep.mubr.bf16.mxu1 %v1957_v4 }
  0x3c   : > { %588 = vmatpush1.bf16.msra.mxu0 %v2045_v6 }
  0x3d   : > { %589 = vmatprep.subr.bf16.mxu0 %v2051_v7  ;;  %629 = vmatpush1.bf16.msra.mxu1 %v2085_v13 }
  0x3e   : > { %630 = vmatprep.subr.bf16.mxu1 %v2102_v16 }
  0x40   : > { %590 = vmatpush1.bf16.msra.mxu0 %v2067_v10 }
  0x41   : > { %591 = vmatprep.subr.bf16.mxu0 %v2074_v11  ;;  %631 = vmatpush1.bf16.msra.mxu1 %v2109_v17 }
  0x42   : > { %632 = vmatprep.subr.bf16.mxu1 %v2115_v18 }
  0x44   : > { %592 = vmatpush1.bf16.msra.mxu0 %v2092_v14 }
  0x45   : > { %593 = vmatprep.subr.bf16.mxu0 %v2097_v15  ;;  %633 = vmatpush1.bf16.msra.mxu1 %v2133_v21 }
  0x46   : > { %634 = vmatprep.subr.bf16.mxu1 %v2139_v22 }
  0x48   : > { %594 = vmatpush1.bf16.msra.mxu0 %v2121_v19 }
  0x49   : > { %595 = vmatprep.subr.bf16.mxu0 %v2127_v20  ;;  %635 = vmatpush1.bf16.msra.mxu1 %v2157_v25 }
  0x4a   : > { %636 = vmatprep.subr.bf16.mxu1 %v2163_v26 }
  0x4c   : > { %596 = vmatpush1.bf16.msra.mxu0 %v2144_v23 }
  0x4d   : > { %597 = vmatprep.subr.bf16.mxu0 %v2150_v24  ;;  %637 = vmatpush1.bf16.msra.mxu1 %v2181_v29 }
  0x4e   : > { %638 = vmatprep.subr.bf16.mxu1 %v2187_v30 }
  0x50   : > { %598 = vmatpush1.bf16.msra.mxu0 %v2169_v27 }
  0x51   : > { %599 = vmatprep.subr.bf16.mxu0 %v2175_v28  ;;  %639 = vmatpush1.bf16.msra.mxu1 %v2200_v33 }
  0x52   : > { %640 = vmatprep.subr.bf16.mxu1 %v2206_v34 }
  0x54   : > { %600 = vmatpush1.bf16.msra.mxu0 %v2193_v31 }
  0x55   : > { %708 = vmatprep.subr.bf16.mxu0 %v2026_v2  ;;  %641 = vmatpush1.bf16.msra.mxu1 %v2213_v36 }
  0x56   : > { %749 = vmatprep.subr.bf16.mxu1 %v2056_v8 }
 0x10a   : > { %v497_v39 = vpop.f32.mrb[0].mxu0  ;;  %v538_v48 = vpop.f32.mrb[0].mxu1 }
 0x10b   : > { %v545_v40 = vadd.f32 %v497_v39, %v298_v37  ;;  %v499_v41 = vpop.f32.mrb[1].mxu0  ;;  %v540_v49 = vpop.f32.mrb[1].mxu1  ;;  %v547_v55 = vadd.f32 %v538_v48, %v300_v53 }
 0x10c   : > { %v546_v42 = vadd.f32 %v499_v41, %v299_v38  ;;  %v501_v43 = vpop.f32.mrb[2].mxu0  ;;  %v548_v50 = vadd.f32 %v540_v49, %v301_v47  ;;  %v542_v51 = vpop.f32.mrb[2].mxu1 }
 0x10d   : > { %v1591_v44 = vmul.f32 -1.442695, %v545_v40  ;;  %v502_v45 = vpop.f32.mrb[3].mxu0  ;;  %v543_v52 = vpop.f32.mrb[3].mxu1  ;;  %v1595_v43 = vld [vmem:[%s2009_s28 + $0x28] sm:$0xff] }
 0x10e   : > { %v1592_v46 = vmul.f32 -1.442695, %v546_v42  ;;  %v1593_v54 = vmul.f32 -1.442695, %v548_v50  ;;  %v1594_v42 = vld [vmem:[%s2009_s28 + $0x20] sm:$0xff] }
 0x10f   : > { %1729 = vpow2.f32 %v1591_v44 }
 0x110   : > { %1731 = vpow2.f32 %v1592_v46 }
 0x111   : > { %1733 = vpow2.f32 %v1593_v54 }
 0x112   : > { %1735 = vtanh.f32 %v547_v55 }
 0x119   : > { %v1730_v56 = vpop.eup %1729 }
 0x11a   : > { %v1732_v57 = vpop.eup %1731  ;;  %v552_v58 = vadd.f32 1.0, %v1730_v56  ;;  %v1597_v56 = vld [vmem:[%s2009_s28 + $0x38] sm:$0xff] }
 0x11b   : > { %v558_v59 = vadd.f32 1.0, %v1732_v57  ;;  %v1734_v60 = vpop.eup %1733 }
 0x11c   : > { %1737 = vrcp.f32 %v552_v58  ;;  %v1736_v61 = vpop.eup %1735  ;;  %v565_v0 = vadd.f32 1.0, %v1734_v60  ;;  %v1596_v58 = vld [vmem:[%s2009_s28 + $0x30] sm:$0xff] }
 0x11d   : > { %1739 = vrcp.f32 %v558_v59 }
 0x11e   : > { %1741 = vrcp.f32 %v565_v0 }
 0x126   : > { %v1738_v63 = vpop.eup %1737 }
 0x127   : > { %v1740_v1 = vpop.eup %1739  ;;  %v569_v32 = vmul.f32 %v1738_v63, %v1736_v61 }
 0x128   : > { %v568_v35 = vmul.f32 %v1740_v1, %v297_v62  ;;  %v1742_v38 = vpop.eup %1741 }
 0x12a   : > { %v2257_v37 = vadd.f32 %v569_v32, %v568_v35 }
 0x12c   : > { %1743 = vtanh.f32 %v2257_v37 }
 0x136   : > { %v1744_v39 = vpop.eup %1743 }
 0x137   : > { %v572_v40 = vmul.f32 %v1744_v39, %v1742_v38 }
 0x139   : > { %v575_v41 = vpack.c.bf16 %v572_v40, %v572_v40 }
 0x13b   : > { %576 = vst [vmem:[%s2014_s7] sm:$0xf] %v575_v41  ;;  %618 = vmatmul.mubr.bf16.vlgmr.msra.gmra.mrb[4].mxu0 %v575_v41  ;;  %659 = vmatmul.mubr.bf16.vlgmr.msra.gmra.mrb[4].mxu1 %v575_v41 }
 0x13c   : > { %709 = vmatpush1.bf16.msra.mxu0 %v2031_v3  ;;  %750 = vmatpush1.bf16.msra.mxu1 %v2061_v9 }
 0x13d   : > { %710 = vmatprep.subr.bf16.mxu0 %v2039_v5  ;;  %751 = vmatprep.subr.bf16.mxu1 %v2080_v12 }
 0x13e   : > { %740 = vmatprep.mubr.bf16.mxu0 %v1957_v4  ;;  %781 = vmatprep.mubr.bf16.mxu1 %v1957_v4 }
 0x140   : > { %711 = vmatpush1.bf16.msra.mxu0 %v2045_v6  ;;  %752 = vmatpush1.bf16.msra.mxu1 %v2085_v13 }
 0x141   : > { %712 = vmatprep.subr.bf16.mxu0 %v2051_v7  ;;  %753 = vmatprep.subr.bf16.mxu1 %v2102_v16 }
 0x144   : > { %713 = vmatpush1.bf16.msra.mxu0 %v2067_v10  ;;  %754 = vmatpush1.bf16.msra.mxu1 %v2109_v17 }
 0x145   : > { %714 = vmatprep.subr.bf16.mxu0 %v2074_v11  ;;  %755 = vmatprep.subr.bf16.mxu1 %v2115_v18 }
 0x148   : > { %715 = vmatpush1.bf16.msra.mxu0 %v2092_v14  ;;  %756 = vmatpush1.bf16.msra.mxu1 %v2133_v21 }
 0x149   : > { %716 = vmatprep.subr.bf16.mxu0 %v2097_v15  ;;  %757 = vmatprep.subr.bf16.mxu1 %v2139_v22 }
 0x14c   : > { %717 = vmatpush1.bf16.msra.mxu0 %v2121_v19  ;;  %758 = vmatpush1.bf16.msra.mxu1 %v2157_v25 }
 0x14d   : > { %718 = vmatprep.subr.bf16.mxu0 %v2127_v20  ;;  %759 = vmatprep.subr.bf16.mxu1 %v2163_v26 }
 0x150   : > { %719 = vmatpush1.bf16.msra.mxu0 %v2144_v23  ;;  %760 = vmatpush1.bf16.msra.mxu1 %v2181_v29 }
 0x151   : > { %720 = vmatprep.subr.bf16.mxu0 %v2150_v24  ;;  %761 = vmatprep.subr.bf16.mxu1 %v2187_v30 }
 0x154   : > { %721 = vmatpush1.bf16.msra.mxu0 %v2169_v27  ;;  %762 = vmatpush1.bf16.msra.mxu1 %v2200_v33 }
 0x155   : > { %722 = vmatprep.subr.bf16.mxu0 %v2175_v28  ;;  %763 = vmatprep.subr.bf16.mxu1 %v2206_v34 }
 0x158   : > { %723 = vmatpush1.bf16.msra.mxu0 %v2193_v31  ;;  %764 = vmatpush1.bf16.msra.mxu1 %v2213_v36 }
 0x159   : > { %831 = vmatprep.subr.bf16.mxu0 %v2026_v2  ;;  %872 = vmatprep.subr.bf16.mxu1 %v2056_v8 }
 0x20e   : > { %v619_v44 = vpop.f32.mrb[4].mxu0  ;;  %v660_v45 = vpop.f32.mrb[4].mxu1 }
 0x20f   : > { %v667_v46 = vadd.f32 %v1594_v42, %v619_v44  ;;  %v621_v47 = vpop.f32.mrb[5].mxu0  ;;  %v662_v48 = vpop.f32.mrb[5].mxu1  ;;  %v669_v60 = vadd.f32 %v1596_v58, %v660_v45 }
 0x210   : > { %v668_v49 = vadd.f32 %v1595_v43, %v621_v47  ;;  %v623_v50 = vpop.f32.mrb[6].mxu0  ;;  %v664_v51 = vpop.f32.mrb[6].mxu1  ;;  %v670_v57 = vadd.f32 %v1597_v56, %v662_v48  ;;  %v1603_v47 = vld [vmem:[%s2009_s28 + $0x48] sm:$0xff] }
 0x211   : > { %v1598_v52 = vmul.f32 -1.442695, %v667_v46  ;;  %v624_v53 = vpop.f32.mrb[7].mxu0  ;;  %v665_v54 = vpop.f32.mrb[7].mxu1 }
 0x212   : > { %v1599_v55 = vmul.f32 -1.442695, %v668_v49  ;;  %v1600_v59 = vmul.f32 -1.442695, %v670_v57 }
 0x213   : > { %1745 = vpow2.f32 %v1598_v52 }
 0x214   : > { %1747 = vpow2.f32 %v1599_v55 }
 0x215   : > { %1749 = vpow2.f32 %v1600_v59 }
 0x216   : > { %1751 = vtanh.f32 %v669_v60  ;;  %v1605_v60 = vld [vmem:[%s2009_s28 + $0x58] sm:$0xff] }
 0x21d   : > { %v1746_v61 = vpop.eup %1745 }
 0x21e   : > { %v1748_v62 = vpop.eup %1747  ;;  %v674_v63 = vadd.f32 1.0, %v1746_v61 }
 0x21f   : > { %v680_v0 = vadd.f32 1.0, %v1748_v62  ;;  %v1750_v1 = vpop.eup %1749  ;;  %v1604_v62 = vld [vmem:[%s2009_s28 + $0x50] sm:$0xff] }
 0x220   : > { %1753 = vrcp.f32 %v674_v63  ;;  %v1752_v32 = vpop.eup %1751  ;;  %v687_v40 = vadd.f32 1.0, %v1750_v1 }
 0x221   : > { %1755 = vrcp.f32 %v680_v0 }
 0x222   : > { %1757 = vrcp.f32 %v687_v40 }
 0x22a   : > { %v1754_v35 = vpop.eup %1753 }
 0x22b   : > { %v1756_v38 = vpop.eup %1755  ;;  %v691_v39 = vmul.f32 %v1754_v35, %v1752_v32 }
 0x22c   : > { %v690_v41 = vmul.f32 %v1756_v38, %v2257_v37  ;;  %v1758_v43 = vpop.eup %1757  ;;  %v1602_v37 = vld [vmem:[%s2009_s28 + $0x40] sm:$0xff] }
 0x22e   : > { %v2300_v42 = vadd.f32 %v691_v39, %v690_v41 }
 0x230   : > { %1759 = vtanh.f32 %v2300_v42 }
 0x23a   : > { %v1760_v44 = vpop.eup %1759 }
 0x23b   : > { %v694_v45 = vmul.f32 %v1760_v44, %v1758_v43 }
 0x23d   : > { %v697_v46 = vpack.c.bf16 %v694_v45, %v694_v45 }
 0x23f   : > { %1601 = vst [vmem:[%s2014_s7 + $0x4] sm:$0xf] %v697_v46  ;;  %741 = vmatmul.mubr.bf16.vlgmr.msra.gmra.mrb[8].mxu0 %v697_v46  ;;  %782 = vmatmul.mubr.bf16.vlgmr.msra.gmra.mrb[8].mxu1 %v697_v46 }
 0x240   : > { %832 = vmatpush1.bf16.msra.mxu0 %v2031_v3  ;;  %873 = vmatpush1.bf16.msra.mxu1 %v2061_v9 }
 0x241   : > { %833 = vmatprep.subr.bf16.mxu0 %v2039_v5  ;;  %874 = vmatprep.subr.bf16.mxu1 %v2080_v12 }
 0x242   : > { %863 = vmatprep.mubr.bf16.mxu0 %v1957_v4  ;;  %904 = vmatprep.mubr.bf16.mxu1 %v1957_v4 }
 0x244   : > { %834 = vmatpush1.bf16.msra.mxu0 %v2045_v6  ;;  %875 = vmatpush1.bf16.msra.mxu1 %v2085_v13 }
 0x245   : > { %835 = vmatprep.subr.bf16.mxu0 %v2051_v7  ;;  %876 = vmatprep.subr.bf16.mxu1 %v2102_v16 }
 0x248   : > { %836 = vmatpush1.bf16.msra.mxu0 %v2067_v10  ;;  %877 = vmatpush1.bf16.msra.mxu1 %v2109_v17 }
 0x249   : > { %837 = vmatprep.subr.bf16.mxu0 %v2074_v11  ;;  %878 = vmatprep.subr.bf16.mxu1 %v2115_v18 }
 0x24c   : > { %838 = vmatpush1.bf16.msra.mxu0 %v2092_v14  ;;  %879 = vmatpush1.bf16.msra.mxu1 %v2133_v21 }
 0x24d   : > { %839 = vmatprep.subr.bf16.mxu0 %v2097_v15  ;;  %880 = vmatprep.subr.bf16.mxu1 %v2139_v22 }
 0x250   : > { %840 = vmatpush1.bf16.msra.mxu0 %v2121_v19  ;;  %881 = vmatpush1.bf16.msra.mxu1 %v2157_v25 }
 0x251   : > { %841 = vmatprep.subr.bf16.mxu0 %v2127_v20  ;;  %882 = vmatprep.subr.bf16.mxu1 %v2163_v26 }
 0x254   : > { %842 = vmatpush1.bf16.msra.mxu0 %v2144_v23  ;;  %883 = vmatpush1.bf16.msra.mxu1 %v2181_v29 }
 0x255   : > { %843 = vmatprep.subr.bf16.mxu0 %v2150_v24  ;;  %884 = vmatprep.subr.bf16.mxu1 %v2187_v30 }
 0x258   : > { %844 = vmatpush1.bf16.msra.mxu0 %v2169_v27  ;;  %885 = vmatpush1.bf16.msra.mxu1 %v2200_v33 }
 0x259   : > { %845 = vmatprep.subr.bf16.mxu0 %v2175_v28  ;;  %886 = vmatprep.subr.bf16.mxu1 %v2206_v34 }
 0x25c   : > { %846 = vmatpush1.bf16.msra.mxu0 %v2193_v31  ;;  %887 = vmatpush1.bf16.msra.mxu1 %v2213_v36 }
 0x25d   : > { %954 = vmatprep.subr.bf16.mxu0 %v2026_v2  ;;  %995 = vmatprep.subr.bf16.mxu1 %v2056_v8 }
 0x312   : > { %v742_v48 = vpop.f32.mrb[8].mxu0  ;;  %v783_v49 = vpop.f32.mrb[8].mxu1 }
 0x313   : > { %v790_v50 = vadd.f32 %v1602_v37, %v742_v48  ;;  %v744_v51 = vpop.f32.mrb[9].mxu0  ;;  %v785_v52 = vpop.f32.mrb[9].mxu1  ;;  %v792_v0 = vadd.f32 %v1604_v62, %v783_v49 }
 0x314   : > { %v791_v53 = vadd.f32 %v1603_v47, %v744_v51  ;;  %v746_v54 = vpop.f32.mrb[10].mxu0  ;;  %v787_v55 = vpop.f32.mrb[10].mxu1  ;;  %v793_v61 = vadd.f32 %v1605_v60, %v785_v52  ;;  %v1611_v51 = vld [vmem:[%s2009_s28 + $0x68] sm:$0xff] }
 0x315   : > { %v1606_v56 = vmul.f32 -1.442695, %v790_v50  ;;  %v747_v57 = vpop.f32.mrb[11].mxu0  ;;  %v788_v58 = vpop.f32.mrb[11].mxu1 }
 0x316   : > { %v1607_v59 = vmul.f32 -1.442695, %v791_v53  ;;  %v1608_v63 = vmul.f32 -1.442695, %v793_v61 }
 0x317   : > { %1761 = vpow2.f32 %v1606_v56 }
 0x318   : > { %1763 = vpow2.f32 %v1607_v59 }
 0x319   : > { %1765 = vpow2.f32 %v1608_v63 }
 0x31a   : > { %1767 = vtanh.f32 %v792_v0  ;;  %v1613_v0 = vld [vmem:[%s2009_s28 + $0x78] sm:$0xff] }
 0x321   : > { %v1762_v1 = vpop.eup %1761 }
 0x322   : > { %v1764_v32 = vpop.eup %1763  ;;  %v797_v35 = vadd.f32 1.0, %v1762_v1 }
 0x323   : > { %v803_v38 = vadd.f32 1.0, %v1764_v32  ;;  %v1766_v39 = vpop.eup %1765  ;;  %v1612_v32 = vld [vmem:[%s2009_s28 + $0x70] sm:$0xff] }
 0x324   : > { %1769 = vrcp.f32 %v797_v35  ;;  %v1768_v40 = vpop.eup %1767  ;;  %v810_v45 = vadd.f32 1.0, %v1766_v39 }
 0x325   : > { %1771 = vrcp.f32 %v803_v38 }
 0x326   : > { %1773 = vrcp.f32 %v810_v45 }
 0x32e   : > { %v1770_v41 = vpop.eup %1769 }
 0x32f   : > { %v1772_v43 = vpop.eup %1771  ;;  %v814_v44 = vmul.f32 %v1770_v41, %v1768_v40 }
 0x330   : > { %v813_v46 = vmul.f32 %v1772_v43, %v2300_v42  ;;  %v1774_v47 = vpop.eup %1773  ;;  %v1610_v42 = vld [vmem:[%s2009_s28 + $0x60] sm:$0xff] }
 0x332   : > { %v2343_v37 = vadd.f32 %v814_v44, %v813_v46 }
 0x334   : > { %1775 = vtanh.f32 %v2343_v37 }
 0x33e   : > { %v1776_v48 = vpop.eup %1775 }
 0x33f   : > { %v817_v49 = vmul.f32 %v1776_v48, %v1774_v47 }
 0x341   : > { %v820_v50 = vpack.c.bf16 %v817_v49, %v817_v49 }
 0x343   : > { %1609 = vst [vmem:[%s2014_s7 + $0x8] sm:$0xf] %v820_v50  ;;  %864 = vmatmul.mubr.bf16.vlgmr.msra.gmra.mrb[12].mxu0 %v820_v50  ;;  %905 = vmatmul.mubr.bf16.vlgmr.msra.gmra.mrb[12].mxu1 %v820_v50 }
 0x344   : > { %955 = vmatpush1.bf16.msra.mxu0 %v2031_v3  ;;  %996 = vmatpush1.bf16.msra.mxu1 %v2061_v9 }
 0x345   : > { %956 = vmatprep.subr.bf16.mxu0 %v2039_v5  ;;  %997 = vmatprep.subr.bf16.mxu1 %v2080_v12 }
 0x346   : > { %986 = vmatprep.mubr.bf16.mxu0 %v1957_v4  ;;  %1027 = vmatprep.mubr.bf16.mxu1 %v1957_v4 }
 0x348   : > { %957 = vmatpush1.bf16.msra.mxu0 %v2045_v6  ;;  %998 = vmatpush1.bf16.msra.mxu1 %v2085_v13 }
 0x349   : > { %958 = vmatprep.subr.bf16.mxu0 %v2051_v7  ;;  %999 = vmatprep.subr.bf16.mxu1 %v2102_v16 }
 0x34c   : > { %959 = vmatpush1.bf16.msra.mxu0 %v2067_v10  ;;  %1000 = vmatpush1.bf16.msra.mxu1 %v2109_v17 }
 0x34d   : > { %960 = vmatprep.subr.bf16.mxu0 %v2074_v11  ;;  %1001 = vmatprep.subr.bf16.mxu1 %v2115_v18 }
 0x350   : > { %961 = vmatpush1.bf16.msra.mxu0 %v2092_v14  ;;  %1002 = vmatpush1.bf16.msra.mxu1 %v2133_v21 }
 0x351   : > { %962 = vmatprep.subr.bf16.mxu0 %v2097_v15  ;;  %1003 = vmatprep.subr.bf16.mxu1 %v2139_v22 }
 0x354   : > { %963 = vmatpush1.bf16.msra.mxu0 %v2121_v19  ;;  %1004 = vmatpush1.bf16.msra.mxu1 %v2157_v25 }
 0x355   : > { %964 = vmatprep.subr.bf16.mxu0 %v2127_v20  ;;  %1005 = vmatprep.subr.bf16.mxu1 %v2163_v26 }
 0x358   : > { %965 = vmatpush1.bf16.msra.mxu0 %v2144_v23  ;;  %1006 = vmatpush1.bf16.msra.mxu1 %v2181_v29 }
 0x359   : > { %966 = vmatprep.subr.bf16.mxu0 %v2150_v24  ;;  %1007 = vmatprep.subr.bf16.mxu1 %v2187_v30 }
 0x35c   : > { %967 = vmatpush1.bf16.msra.mxu0 %v2169_v27  ;;  %1008 = vmatpush1.bf16.msra.mxu1 %v2200_v33 }
 0x35d   : > { %968 = vmatprep.subr.bf16.mxu0 %v2175_v28  ;;  %1009 = vmatprep.subr.bf16.mxu1 %v2206_v34 }
 0x360   : > { %969 = vmatpush1.bf16.msra.mxu0 %v2193_v31  ;;  %1010 = vmatpush1.bf16.msra.mxu1 %v2213_v36 }
 0x361   : > { %1077 = vmatprep.subr.bf16.mxu0 %v2026_v2  ;;  %1118 = vmatprep.subr.bf16.mxu1 %v2056_v8 }
 0x416   : > { %v865_v52 = vpop.f32.mrb[12].mxu0  ;;  %v906_v53 = vpop.f32.mrb[12].mxu1 }
 0x417   : > { %v913_v54 = vadd.f32 %v1610_v42, %v865_v52  ;;  %v867_v55 = vpop.f32.mrb[13].mxu0  ;;  %v908_v56 = vpop.f32.mrb[13].mxu1  ;;  %v915_v38 = vadd.f32 %v1612_v32, %v906_v53 }
 0x418   : > { %v914_v57 = vadd.f32 %v1611_v51, %v867_v55  ;;  %v869_v58 = vpop.f32.mrb[14].mxu0  ;;  %v910_v59 = vpop.f32.mrb[14].mxu1  ;;  %v916_v1 = vadd.f32 %v1613_v0, %v908_v56  ;;  %v1619_v55 = vld [vmem:[%s2009_s28 + $0x88] sm:$0xff] }
 0x419   : > { %v1614_v60 = vmul.f32 -1.442695, %v913_v54  ;;  %v870_v61 = vpop.f32.mrb[15].mxu0  ;;  %v911_v62 = vpop.f32.mrb[15].mxu1 }
 0x41a   : > { %v1615_v63 = vmul.f32 -1.442695, %v914_v57  ;;  %v1616_v35 = vmul.f32 -1.442695, %v916_v1 }
 0x41b   : > { %1777 = vpow2.f32 %v1614_v60 }
 0x41c   : > { %1779 = vpow2.f32 %v1615_v63 }
 0x41d   : > { %1781 = vpow2.f32 %v1616_v35 }
 0x41e   : > { %1783 = vtanh.f32 %v915_v38  ;;  %v1620_v38 = vld [vmem:[%s2009_s28 + $0x90] sm:$0xff] }
 0x425   : > { %v1778_v39 = vpop.eup %1777 }
 0x426   : > { %v1780_v40 = vpop.eup %1779  ;;  %v920_v41 = vadd.f32 1.0, %v1778_v39 }
 0x427   : > { %v926_v43 = vadd.f32 1.0, %v1780_v40  ;;  %v1782_v44 = vpop.eup %1781 }
 0x428   : > { %1785 = vrcp.f32 %v920_v41  ;;  %v1784_v45 = vpop.eup %1783  ;;  %v933_v49 = vadd.f32 1.0, %v1782_v44 }
 0x429   : > { %1787 = vrcp.f32 %v926_v43 }
 0x42a   : > { %1789 = vrcp.f32 %v933_v49 }
 0x432   : > { %v1786_v46 = vpop.eup %1785 }
 0x433   : > { %v1788_v47 = vpop.eup %1787  ;;  %v937_v48 = vmul.f32 %v1786_v46, %v1784_v45 }
 0x434   : > { %v936_v50 = vmul.f32 %v1788_v47, %v2343_v37  ;;  %v1790_v51 = vpop.eup %1789  ;;  %v1618_v37 = vld [vmem:[%s2009_s28 + $0x80] sm:$0xff] }
 0x436   : > { %v2386_v42 = vadd.f32 %v937_v48, %v936_v50 }
 0x438   : > { %1791 = vtanh.f32 %v2386_v42 }
 0x442   : > { %v1792_v52 = vpop.eup %1791 }
 0x443   : > { %v940_v53 = vmul.f32 %v1792_v52, %v1790_v51 }
 0x445   : > { %v943_v54 = vpack.c.bf16 %v940_v53, %v940_v53 }
 0x447   : > { %1617 = vst [vmem:[%s2014_s7 + $0xc] sm:$0xf] %v943_v54  ;;  %987 = vmatmul.mubr.bf16.vlgmr.msra.gmra.mrb[16].mxu0 %v943_v54  ;;  %1028 = vmatmul.mubr.bf16.vlgmr.msra.gmra.mrb[16].mxu1 %v943_v54 }
 0x448   : > { %1078 = vmatpush1.bf16.msra.mxu0 %v2031_v3  ;;  %1119 = vmatpush1.bf16.msra.mxu1 %v2061_v9 }
 0x449   : > { %1079 = vmatprep.subr.bf16.mxu0 %v2039_v5  ;;  %1120 = vmatprep.subr.bf16.mxu1 %v2080_v12 }
 0x44a   : > { %1109 = vmatprep.mubr.bf16.mxu0 %v1957_v4  ;;  %1150 = vmatprep.mubr.bf16.mxu1 %v1957_v4 }
 0x44c   : > { %1080 = vmatpush1.bf16.msra.mxu0 %v2045_v6  ;;  %1121 = vmatpush1.bf16.msra.mxu1 %v2085_v13 }
 0x44d   : > { %1081 = vmatprep.subr.bf16.mxu0 %v2051_v7  ;;  %1122 = vmatprep.subr.bf16.mxu1 %v2102_v16 }
 0x450   : > { %1082 = vmatpush1.bf16.msra.mxu0 %v2067_v10  ;;  %1123 = vmatpush1.bf16.msra.mxu1 %v2109_v17 }
 0x451   : > { %1083 = vmatprep.subr.bf16.mxu0 %v2074_v11  ;;  %1124 = vmatprep.subr.bf16.mxu1 %v2115_v18 }
 0x454   : > { %1084 = vmatpush1.bf16.msra.mxu0 %v2092_v14  ;;  %1125 = vmatpush1.bf16.msra.mxu1 %v2133_v21 }
 0x455   : > { %1085 = vmatprep.subr.bf16.mxu0 %v2097_v15  ;;  %1126 = vmatprep.subr.bf16.mxu1 %v2139_v22 }
 0x458   : > { %1086 = vmatpush1.bf16.msra.mxu0 %v2121_v19  ;;  %1127 = vmatpush1.bf16.msra.mxu1 %v2157_v25 }
 0x459   : > { %1087 = vmatprep.subr.bf16.mxu0 %v2127_v20  ;;  %1128 = vmatprep.subr.bf16.mxu1 %v2163_v26 }
 0x45c   : > { %1088 = vmatpush1.bf16.msra.mxu0 %v2144_v23  ;;  %1129 = vmatpush1.bf16.msra.mxu1 %v2181_v29 }
 0x45d   : > { %1089 = vmatprep.subr.bf16.mxu0 %v2150_v24  ;;  %1130 = vmatprep.subr.bf16.mxu1 %v2187_v30 }
 0x460   : > { %1090 = vmatpush1.bf16.msra.mxu0 %v2169_v27  ;;  %1131 = vmatpush1.bf16.msra.mxu1 %v2200_v33 }
 0x461   : > { %1091 = vmatprep.subr.bf16.mxu0 %v2175_v28  ;;  %1132 = vmatprep.subr.bf16.mxu1 %v2206_v34 }
 0x464   : > { %1092 = vmatpush1.bf16.msra.mxu0 %v2193_v31  ;;  %1133 = vmatpush1.bf16.msra.mxu1 %v2213_v36 }
 0x465   : > { %1200 = vmatprep.subr.bf16.mxu0 %v2026_v2  ;;  %1241 = vmatprep.subr.bf16.mxu1 %v2056_v8  ;;  %v1621_v2 = vld [vmem:[%s2009_s28 + $0x98] sm:$0xff] }
 0x51a   : > { %v988_v56 = vpop.f32.mrb[16].mxu0  ;;  %v1029_v57 = vpop.f32.mrb[16].mxu1 }
 0x51b   : > { %v1036_v58 = vadd.f32 %v1618_v37, %v988_v56  ;;  %v990_v59 = vpop.f32.mrb[17].mxu0  ;;  %v1031_v60 = vpop.f32.mrb[17].mxu1  ;;  %v1038_v40 = vadd.f32 %v1620_v38, %v1029_v57  ;;  %v1866_v38 = vld [vmem:[%s2635_s3 + $0x4c] ss:$16 sps:$4 sm:$0xff]  }
 0x51c   : > { %v1037_v61 = vadd.f32 %v1619_v55, %v990_v59  ;;  %v992_v62 = vpop.f32.mrb[18].mxu0  ;;  %v1033_v63 = vpop.f32.mrb[18].mxu1  ;;  %v1039_v8 = vadd.f32 %v1621_v2, %v1031_v60  ;;  %v1864_v2 = vld [vmem:[%s2635_s3 + $0x28] ss:$16 sps:$4 sm:$0xff]  }
 0x51d   : > { %v1622_v0 = vmul.f32 -1.442695, %v1036_v58  ;;  %v993_v1 = vpop.f32.mrb[19].mxu0  ;;  %v1034_v32 = vpop.f32.mrb[19].mxu1  ;;  %v1859_v63 = vld [vmem:[%s2635_s3] ss:$16 sps:$4 sm:$0xff]  }
 0x51e   : > { %v1623_v35 = vmul.f32 -1.442695, %v1037_v61  ;;  %v1624_v39 = vmul.f32 -1.442695, %v1039_v8  ;;  %v1861_v1 = vld [vmem:[%s2635_s3 + $0x24] ss:$16 sps:$4 sm:$0xff]  }
 0x51f   : > { %1793 = vpow2.f32 %v1622_v0  ;;  %v1860_v0 = vld [vmem:[%s2635_s3 + $0x8] ss:$16 sps:$4 sm:$0xff]   ;;  %v1862_v32 = vld [vmem:[%s2635_s3 + $0x2c] ss:$16 sps:$4 sm:$0xff]   ;;  %v1865_v8 = vld [vmem:[%s2635_s3 + $0x44] ss:$16 sps:$4 sm:$0xff]  }
 0x520   : > { %1795 = vpow2.f32 %v1623_v35  ;;  %v1863_v35 = vld [vmem:[%s2635_s3 + $0x20] ss:$16 sps:$4 sm:$0xff]  }
 0x521   : > { %1797 = vpow2.f32 %v1624_v39  ;;  %v1868_v39 = vld [vmem:[%s2635_s3 + $0x48] ss:$16 sps:$4 sm:$0xff]  }
 0x522   : > { %1799 = vtanh.f32 %v1038_v40  ;;  %v1869_v40 = vld [vmem:[%s2635_s3 + $0x64] ss:$16 sps:$4 sm:$0xff]  }
 0x529   : > { %v1794_v41 = vpop.eup %1793 }
 0x52a   : > { %v1796_v43 = vpop.eup %1795  ;;  %v1043_v44 = vadd.f32 1.0, %v1794_v41  ;;  %v1870_v41 = vld [vmem:[%s2635_s3 + $0x6c] ss:$16 sps:$4 sm:$0xff]  }
 0x52b   : > { %v1049_v45 = vadd.f32 1.0, %v1796_v43  ;;  %v1798_v46 = vpop.eup %1797  ;;  %v1871_v43 = vld [vmem:[%s2635_s3 + $0x60] ss:$16 sps:$4 sm:$0xff]  }
 0x52c   : > { %1801 = vrcp.f32 %v1043_v44  ;;  %v1800_v47 = vpop.eup %1799  ;;  %v1056_v51 = vadd.f32 1.0, %v1798_v46  ;;  %v1872_v44 = vld [vmem:[%s2635_s3 + $0x68] ss:$16 sps:$4 sm:$0xff]   ;;  %v1874_v46 = vld [vmem:[%s2635_s3 + $0x8c] ss:$16 sps:$4 sm:$0xff]  }
 0x52d   : > { %1803 = vrcp.f32 %v1049_v45  ;;  %v1873_v45 = vld [vmem:[%s2635_s3 + $0x84] ss:$16 sps:$4 sm:$0xff]  }
 0x52e   : > { %1805 = vrcp.f32 %v1056_v51  ;;  %v1879_v51 = vld [vmem:[%s2635_s3 + $0xa0] ss:$16 sps:$4 sm:$0xff]  }
 0x536   : > { %v1802_v48 = vpop.eup %1801 }
 0x537   : > { %v1804_v49 = vpop.eup %1803  ;;  %v1060_v50 = vmul.f32 %v1802_v48, %v1800_v47  ;;  %v1875_v47 = vld [vmem:[%s2635_s3 + $0x80] ss:$16 sps:$4 sm:$0xff]   ;;  %v1876_v48 = vld [vmem:[%s2635_s3 + $0x88] ss:$16 sps:$4 sm:$0xff]  }
 0x538   : > { %v1059_v52 = vmul.f32 %v1804_v49, %v2386_v42  ;;  %v1806_v54 = vpop.eup %1805  ;;  %v1877_v49 = vld [vmem:[%s2635_s3 + $0xa4] ss:$16 sps:$4 sm:$0xff]  }
 0x53a   : > { %v2429_v53 = vadd.f32 %v1060_v50, %v1059_v52  ;;  %v1878_v50 = vld [vmem:[%s2635_s3 + $0xac] ss:$16 sps:$4 sm:$0xff]   ;;  %v1880_v52 = vld [vmem:[%s2635_s3 + $0xa8] ss:$16 sps:$4 sm:$0xff]  }
 0x53c   : > { %1807 = vtanh.f32 %v2429_v53 }
 0x546   : > { %v1808_v37 = vpop.eup %1807 }
 0x547   : > { %v1063_v55 = vmul.f32 %v1808_v37, %v1806_v54  ;;  %v1882_v54 = vld [vmem:[%s2635_s3 + $0xcc] ss:$16 sps:$4 sm:$0xff]   ;;  %v1883_v37 = vld [vmem:[%s2635_s3 + $0xc0] ss:$16 sps:$4 sm:$0xff]  }
 0x549   : > { %v1066_v56 = vpack.c.bf16 %v1063_v55, %v1063_v55  ;;  %v1884_v55 = vld [vmem:[%s2635_s3 + $0xc8] ss:$16 sps:$4 sm:$0xff]  }
 0x54b   : > { %1625 = vst [vmem:[%s2014_s7 + $0x10] sm:$0xf] %v1066_v56  ;;  %1110 = vmatmul.mubr.bf16.vlgmr.msra.gmra.mrb[20].mxu0 %v1066_v56  ;;  %1151 = vmatmul.mubr.bf16.vlgmr.msra.gmra.mrb[20].mxu1 %v1066_v56  ;;  %v1885_v56 = vld [vmem:[%s2635_s3 + $0xe4] ss:$16 sps:$4 sm:$0xff]  }
 0x54c   : > { %1201 = vmatpush1.bf16.msra.mxu0 %v2031_v3  ;;  %1242 = vmatpush1.bf16.msra.mxu1 %v2061_v9  ;;  %v1857_v3 = vld [vmem:[%s2635_s3 + $0x4] ss:$16 sps:$4 sm:$0xff]  }
 0x54d   : > { %1202 = vmatprep.subr.bf16.mxu0 %v2039_v5  ;;  %1243 = vmatprep.subr.bf16.mxu1 %v2080_v12  ;;  %v1858_v5 = vld [vmem:[%s2635_s3 + $0xc] ss:$16 sps:$4 sm:$0xff]  }
 0x54e   : > { %1232 = vmatprep.mubr.bf16.mxu0 %v1957_v4  ;;  %1273 = vmatprep.mubr.bf16.mxu1 %v1957_v4 }
 0x550   : > { %1203 = vmatpush1.bf16.msra.mxu0 %v2045_v6  ;;  %1244 = vmatpush1.bf16.msra.mxu1 %v2085_v13  ;;  %v1626_v6 = vld [vmem:[%s2009_s28 + $0xa0] sm:$0xff] }
 0x551   : > { %1204 = vmatprep.subr.bf16.mxu0 %v2051_v7  ;;  %1245 = vmatprep.subr.bf16.mxu1 %v2102_v16  ;;  %v1627_v7 = vld [vmem:[%s2009_s28 + $0xa8] sm:$0xff] }
 0x554   : > { %1205 = vmatpush1.bf16.msra.mxu0 %v2067_v10  ;;  %1246 = vmatpush1.bf16.msra.mxu1 %v2109_v17 }
 0x555   : > { %1206 = vmatprep.subr.bf16.mxu0 %v2074_v11  ;;  %1247 = vmatprep.subr.bf16.mxu1 %v2115_v18 }
 0x558   : > { %1207 = vmatpush1.bf16.msra.mxu0 %v2092_v14  ;;  %1248 = vmatpush1.bf16.msra.mxu1 %v2133_v21  ;;  %v1629_v21 = vld [vmem:[%s2009_s28 + $0xb8] sm:$0xff] }
 0x559   : > { %1208 = vmatprep.subr.bf16.mxu0 %v2097_v15  ;;  %1249 = vmatprep.subr.bf16.mxu1 %v2139_v22 }
 0x55c   : > { %1209 = vmatpush1.bf16.msra.mxu0 %v2121_v19  ;;  %1250 = vmatpush1.bf16.msra.mxu1 %v2157_v25 }
 0x55d   : > { %1210 = vmatprep.subr.bf16.mxu0 %v2127_v20  ;;  %1251 = vmatprep.subr.bf16.mxu1 %v2163_v26 }
 0x560   : > { %1211 = vmatpush1.bf16.msra.mxu0 %v2144_v23  ;;  %1252 = vmatpush1.bf16.msra.mxu1 %v2181_v29  ;;  %v1628_v23 = vld [vmem:[%s2009_s28 + $0xb0] sm:$0xff] }
 0x561   : > { %1212 = vmatprep.subr.bf16.mxu0 %v2150_v24  ;;  %1253 = vmatprep.subr.bf16.mxu1 %v2187_v30 }
 0x564   : > { %1213 = vmatpush1.bf16.msra.mxu0 %v2169_v27  ;;  %1254 = vmatpush1.bf16.msra.mxu1 %v2200_v33 }
 0x565   : > { %1214 = vmatprep.subr.bf16.mxu0 %v2175_v28  ;;  %1255 = vmatprep.subr.bf16.mxu1 %v2206_v34 }
 0x568   : > { %1215 = vmatpush1.bf16.msra.mxu0 %v2193_v31  ;;  %1256 = vmatpush1.bf16.msra.mxu1 %v2213_v36 }
 0x569   : > { %1323 = vmatprep.subr.bf16.mxu0 %v1857_v3  ;;  %1364 = vmatprep.subr.bf16.mxu1 %v1858_v5  ;;  %v1886_v3 = vld [vmem:[%s2635_s3 + $0xec] ss:$16 sps:$4 sm:$0xff]   ;;  %v1887_v5 = vld [vmem:[%s2635_s3 + $0xe0] ss:$16 sps:$4 sm:$0xff]  }
 0x61e   : > { %v1111_v9 = vpop.f32.mrb[20].mxu0  ;;  %v1152_v10 = vpop.f32.mrb[20].mxu1 }
 0x61f   : > { %v1159_v11 = vadd.f32 %v1626_v6, %v1111_v9  ;;  %v1113_v12 = vpop.f32.mrb[21].mxu0  ;;  %v1154_v13 = vpop.f32.mrb[21].mxu1  ;;  %v1161_v25 = vadd.f32 %v1628_v23, %v1152_v10  ;;  %v1888_v6 = vld [vmem:[%s2635_s3 + $0xe8] ss:$16 sps:$4 sm:$0xff]  }
 0x620   : > { %v1160_v14 = vadd.f32 %v1627_v7, %v1113_v12  ;;  %v1115_v15 = vpop.f32.mrb[22].mxu0  ;;  %v1156_v16 = vpop.f32.mrb[22].mxu1  ;;  %v1162_v22 = vadd.f32 %v1629_v21, %v1154_v13  ;;  %v1634_v7 = vld [vmem:[%s2009_s28 + $0xc0] sm:$0xff]  ;;  %v1635_v9 = vld [vmem:[%s2009_s28 + $0xc8] sm:$0xff] }
 0x621   : > { %v1630_v17 = vmul.f32 -1.442695, %v1159_v11  ;;  %v1116_v18 = vpop.f32.mrb[23].mxu0  ;;  %v1157_v19 = vpop.f32.mrb[23].mxu1 }
 0x622   : > { %v1631_v20 = vmul.f32 -1.442695, %v1160_v14  ;;  %v1632_v24 = vmul.f32 -1.442695, %v1162_v22  ;;  %v1637_v22 = vld [vmem:[%s2009_s28 + $0xd8] sm:$0xff] }
 0x623   : > { %1809 = vpow2.f32 %v1630_v17 }
 0x624   : > { %1811 = vpow2.f32 %v1631_v20 }
 0x625   : > { %1813 = vpow2.f32 %v1632_v24  ;;  %v1636_v24 = vld [vmem:[%s2009_s28 + $0xd0] sm:$0xff] }
 0x626   : > { %1815 = vtanh.f32 %v1161_v25 }
 0x62d   : > { %v1810_v26 = vpop.eup %1809 }
 0x62e   : > { %v1812_v27 = vpop.eup %1811  ;;  %v1166_v28 = vadd.f32 1.0, %v1810_v26 }
 0x62f   : > { %v1172_v29 = vadd.f32 1.0, %v1812_v27  ;;  %v1814_v30 = vpop.eup %1813 }
 0x630   : > { %1817 = vrcp.f32 %v1166_v28  ;;  %v1816_v31 = vpop.eup %1815  ;;  %v1179_v42 = vadd.f32 1.0, %v1814_v30 }
 0x631   : > { %1819 = vrcp.f32 %v1172_v29 }
 0x632   : > { %1821 = vrcp.f32 %v1179_v42 }
 0x63a   : > { %v1818_v33 = vpop.eup %1817 }
 0x63b   : > { %v1820_v34 = vpop.eup %1819  ;;  %v1183_v36 = vmul.f32 %v1818_v33, %v1816_v31 }
 0x63c   : > { %v1182_v57 = vmul.f32 %v1820_v34, %v2429_v53  ;;  %v1822_v59 = vpop.eup %1821  ;;  %v1881_v53 = vld [vmem:[%s2635_s3 + $0xc4] ss:$16 sps:$4 sm:$0xff]  }
 0x63e   : > { %v2476_v58 = vadd.f32 %v1183_v36, %v1182_v57 }
 0x640   : > { %1823 = vtanh.f32 %v2476_v58 }
 0x64a   : > { %v1824_v60 = vpop.eup %1823 }
 0x64b   : > { %v1186_v61 = vmul.f32 %v1824_v60, %v1822_v59 }
 0x64d   : > { %v1189_v62 = vpack.c.bf16 %v1186_v61, %v1186_v61 }
 0x64f   : > { %1633 = vst [vmem:[%s2014_s7 + $0x14] sm:$0xf] %v1189_v62  ;;  %1233 = vmatmul.mubr.bf16.vlgmr.msra.gmra.mrb[24].mxu0 %v1189_v62  ;;  %1274 = vmatmul.mubr.bf16.vlgmr.msra.gmra.mrb[24].mxu1 %v1189_v62 }
 0x650   : > { %1324 = vmatpush1.bf16.msra.mxu0 %v1859_v63  ;;  %1365 = vmatpush1.bf16.msra.mxu1 %v1860_v0 }
 0x651   : > { %1325 = vmatprep.subr.bf16.mxu0 %v1861_v1  ;;  %1366 = vmatprep.subr.bf16.mxu1 %v1862_v32  ;;  %v1642_v1 = vld [vmem:[%s2009_s28 + $0xe0] sm:$0xff]  ;;  %v1643_v32 = vld [vmem:[%s2009_s28 + $0xe8] sm:$0xff] }
 0x652   : > { %1355 = vmatprep.mubr.bf16.mxu0 %v1957_v4  ;;  %1396 = vmatprep.mubr.bf16.mxu1 %v1957_v4  ;;  %v1867_v4 = vld [vmem:[%s2635_s3 + $0x40] ss:$16 sps:$4 sm:$0xff]  }
 0x654   : > { %1326 = vmatpush1.bf16.msra.mxu0 %v1863_v35  ;;  %1367 = vmatpush1.bf16.msra.mxu1 %v1864_v2 }
 0x655   : > { %1327 = vmatprep.subr.bf16.mxu0 %v1865_v8  ;;  %1368 = vmatprep.subr.bf16.mxu1 %v1866_v38 }
 0x658   : > { %1328 = vmatpush1.bf16.msra.mxu0 %v1867_v4  ;;  %1369 = vmatpush1.bf16.msra.mxu1 %v1868_v39 }
 0x659   : > { %1329 = vmatprep.subr.bf16.mxu0 %v1869_v40  ;;  %1370 = vmatprep.subr.bf16.mxu1 %v1870_v41 }
 0x65c   : > { %1330 = vmatpush1.bf16.msra.mxu0 %v1871_v43  ;;  %1371 = vmatpush1.bf16.msra.mxu1 %v1872_v44 }
 0x65d   : > { %1331 = vmatprep.subr.bf16.mxu0 %v1873_v45  ;;  %1372 = vmatprep.subr.bf16.mxu1 %v1874_v46  ;;  %v1645_v46 = vld [vmem:[%s2009_s28 + $0xf8] sm:$0xff] }
 0x660   : > { %1332 = vmatpush1.bf16.msra.mxu0 %v1875_v47  ;;  %1373 = vmatpush1.bf16.msra.mxu1 %v1876_v48  ;;  %v1644_v48 = vld [vmem:[%s2009_s28 + $0xf0] sm:$0xff] }
 0x661   : > { %1333 = vmatprep.subr.bf16.mxu0 %v1877_v49  ;;  %1374 = vmatprep.subr.bf16.mxu1 %v1878_v50 }
 0x664   : > { %1334 = vmatpush1.bf16.msra.mxu0 %v1879_v51  ;;  %1375 = vmatpush1.bf16.msra.mxu1 %v1880_v52 }
 0x665   : > { %1335 = vmatprep.subr.bf16.mxu0 %v1881_v53  ;;  %1376 = vmatprep.subr.bf16.mxu1 %v1882_v54 }
 0x668   : > { %1336 = vmatpush1.bf16.msra.mxu0 %v1883_v37  ;;  %1377 = vmatpush1.bf16.msra.mxu1 %v1884_v55 }
 0x669   : > { %1337 = vmatprep.subr.bf16.mxu0 %v1885_v56  ;;  %1378 = vmatprep.subr.bf16.mxu1 %v1886_v3 }
 0x66c   : > { %1338 = vmatpush1.bf16.msra.mxu0 %v1887_v5  ;;  %1379 = vmatpush1.bf16.msra.mxu1 %v1888_v6 }
 0x722   : > { %v1234_v10 = vpop.f32.mrb[24].mxu0  ;;  %v1275_v11 = vpop.f32.mrb[24].mxu1 }
 0x723   : > { %v1282_v12 = vadd.f32 %v1634_v7, %v1234_v10  ;;  %v1236_v13 = vpop.f32.mrb[25].mxu0  ;;  %v1277_v14 = vpop.f32.mrb[25].mxu1  ;;  %v1284_v26 = vadd.f32 %v1636_v24, %v1275_v11 }
 0x724   : > { %v1283_v15 = vadd.f32 %v1635_v9, %v1236_v13  ;;  %v1238_v16 = vpop.f32.mrb[26].mxu0  ;;  %v1279_v17 = vpop.f32.mrb[26].mxu1  ;;  %v1285_v23 = vadd.f32 %v1637_v22, %v1277_v14 }
 0x725   : > { %v1638_v18 = vmul.f32 -1.442695, %v1282_v12  ;;  %v1239_v19 = vpop.f32.mrb[27].mxu0  ;;  %v1280_v20 = vpop.f32.mrb[27].mxu1 }
 0x726   : > { %v1639_v21 = vmul.f32 -1.442695, %v1283_v15  ;;  %v1640_v25 = vmul.f32 -1.442695, %v1285_v23 }
 0x727   : > { %1825 = vpow2.f32 %v1638_v18 }
 0x728   : > { %1827 = vpow2.f32 %v1639_v21 }
 0x729   : > { %1829 = vpow2.f32 %v1640_v25 }
 0x72a   : > { %1831 = vtanh.f32 %v1284_v26 }
 0x731   : > { %v1826_v27 = vpop.eup %1825 }
 0x732   : > { %v1828_v28 = vpop.eup %1827  ;;  %v1289_v29 = vadd.f32 1.0, %v1826_v27 }
 0x733   : > { %v1295_v30 = vadd.f32 1.0, %v1828_v28  ;;  %v1830_v31 = vpop.eup %1829 }
 0x734   : > { %1833 = vrcp.f32 %v1289_v29  ;;  %v1832_v33 = vpop.eup %1831  ;;  %v1302_v57 = vadd.f32 1.0, %v1830_v31 }
 0x735   : > { %1835 = vrcp.f32 %v1295_v30 }
 0x736   : > { %1837 = vrcp.f32 %v1302_v57 }
 0x73e   : > { %v1834_v34 = vpop.eup %1833 }
 0x73f   : > { %v1836_v36 = vpop.eup %1835  ;;  %v1306_v42 = vmul.f32 %v1834_v34, %v1832_v33 }
 0x740   : > { %v1305_v59 = vmul.f32 %v1836_v36, %v2476_v58  ;;  %v1838_v61 = vpop.eup %1837 }
 0x742   : > { %v1307_v60 = vadd.f32 %v1306_v42, %v1305_v59 }
 0x744   : > { %1839 = vtanh.f32 %v1307_v60 }
 0x74e   : > { %v1840_v62 = vpop.eup %1839 }
 0x74f   : > { %v1309_v63 = vmul.f32 %v1840_v62, %v1838_v61 }
 0x751   : > { %v1312_v0 = vpack.c.bf16 %v1309_v63, %v1309_v63 }
 0x753   : > { %1641 = vst [vmem:[%s2014_s7 + $0x18] sm:$0xf] %v1312_v0  ;;  %1356 = vmatmul.mubr.bf16.vlgmr.msra.gmra.mrb[28].mxu0 %v1312_v0  ;;  %1397 = vmatmul.mubr.bf16.vlgmr.msra.gmra.mrb[28].mxu1 %v1312_v0 }
 0x826   : > { %v1357_v35 = vpop.f32.mrb[28].mxu0  ;;  %v1398_v2 = vpop.f32.mrb[28].mxu1 }
 0x827   : > { %v1405_v8 = vadd.f32 %v1642_v1, %v1357_v35  ;;  %v1359_v38 = vpop.f32.mrb[29].mxu0  ;;  %v1400_v4 = vpop.f32.mrb[29].mxu1  ;;  %v1407_v50 = vadd.f32 %v1644_v48, %v1398_v2 }
 0x828   : > { %v1406_v58 = vadd.f32 %v1643_v32, %v1359_v38  ;;  %v1361_v39 = vpop.f32.mrb[30].mxu0  ;;  %v1402_v40 = vpop.f32.mrb[30].mxu1  ;;  %v1408_v47 = vadd.f32 %v1645_v46, %v1400_v4 }
 0x829   : > { %v1646_v41 = vmul.f32 -1.442695, %v1405_v8  ;;  %v1362_v43 = vpop.f32.mrb[31].mxu0  ;;  %v1403_v44 = vpop.f32.mrb[31].mxu1 }
 0x82a   : > { %v1647_v45 = vmul.f32 -1.442695, %v1406_v58  ;;  %v1648_v49 = vmul.f32 -1.442695, %v1408_v47 }
 0x82b   : > { %1841 = vpow2.f32 %v1646_v41 }
 0x82c   : > { %1843 = vpow2.f32 %v1647_v45 }
 0x82d   : > { %1845 = vpow2.f32 %v1648_v49 }
 0x82e   : > { %1847 = vtanh.f32 %v1407_v50 }
 0x835   : > { %v1842_v51 = vpop.eup %1841 }
 0x836   : > { %v1844_v52 = vpop.eup %1843  ;;  %v1412_v53 = vadd.f32 1.0, %v1842_v51 }
 0x837   : > { %v1418_v54 = vadd.f32 1.0, %v1844_v52  ;;  %v1846_v37 = vpop.eup %1845 }
 0x838   : > { %1849 = vrcp.f32 %v1412_v53  ;;  %v1848_v55 = vpop.eup %1847  ;;  %v1425_v6 = vadd.f32 1.0, %v1846_v37 }
 0x839   : > { %1851 = vrcp.f32 %v1418_v54 }
 0x83a   : > { %1853 = vrcp.f32 %v1425_v6 }
 0x842   : > { %v1850_v56 = vpop.eup %1849 }
 0x843   : > { %v1852_v3 = vpop.eup %1851  ;;  %v1429_v5 = vmul.f32 %v1850_v56, %v1848_v55 }
 0x844   : > { %v1428_v7 = vmul.f32 %v1852_v3, %v1307_v60  ;;  %v1854_v10 = vpop.eup %1853 }
 0x846   : > { %v1430_v9 = vadd.f32 %v1429_v5, %v1428_v7 }
 0x848   : > { %1855 = vtanh.f32 %v1430_v9  ;;  %1434 = vst [vmem:[#allocation3] sm:$0xff] %v1430_v9 }
 0x84f   : > { %v1444_v15 = vld [vmem:[#allocation3] sm:$0xff] (!%p1650_p5) }
 0x850   : > { %1445 = vst [vmem:[#allocation6] sm:$0xff] (!%p1650_p5), %v1444_v15 }
 0x851   : > { %1441 = sbr.rel (%p1650_p5) target bundleno = 2142 (0x85e), region = 44 }
 0x852   : > { %v1856_v11 = vpop.eup %1855 }
 0x853   : > { %v1432_v12 = vmul.f32 %v1856_v11, %v1854_v10 }
 0x855   : > { %1433 = vst [vmem:[#allocation2] sm:$0xff] %v1432_v12  ;;  %v1435_v13 = vpack.c.bf16 %v1432_v12, %v1432_v12 }
 0x857   : > { %1649 = vst [vmem:[%s2014_s7 + $0x1c] sm:$0xf] %v1435_v13 }
 0x85c   : > { %v1442_v14 = vld [vmem:[#allocation2] sm:$0xff] }
 0x85d   : > { %1443 = vst [vmem:[#allocation4] sm:$0xff] %v1442_v14 }
 0x85e PF: > { %p1666_p6 = scmp.eq.s32.totalorder %s2001_s22, 1  ;;  %s1958_s28 = smov [#allocation4]  }
 0x85f   : > { %s1462_s20 = sshll.u32 %s1958_s28, 4  ;;  %s1959_s23 = smov [#allocation6]   ;;  %s1463_s20 = int_to_ptr.vmem [resolvable:$true] %s1462_s20 }
 0x860   : > { %s1473_s24 = sshll.u32 %s1959_s23, 4  ;;  %s1889_s25 = scalar_lea.vmem %s1463_s20, 128  ;;  %s1474_s24 = int_to_ptr.vmem [resolvable:$true] %s1473_s24 }
 0x861   : > { %p1890_p7 = scmp.ne.s32.totalorder %s1463_s20, %s1889_s25  ;;  %p1896_p10 = scmp.lt.s32.totalorder %s1463_s20, %s1463_s20 }
 0x862   : > { %p1897_p11 = scmp.lt.s32.totalorder %s1889_s25, %s1889_s25 }
 0x863   : > { %p1891_p8 = pnand %p1890_p7, %p1666_p6 }
 0x864   : > { %p1898_p12 = por %p1897_p11, %p1896_p10 }
 0x865   : > { %p1892_p9 = pneg %p1891_p8 }
 0x867   : > { %p1899_p13 = pnand %p1898_p12, %p1892_p9 }
 0x869   : > { %1902 = shalt.err (!%p1899_p13)
}
 0x86a   : > { %s1903_s27 = scalar_lea.hbm %s2637_s5, 128 }
 0x86b   : > { %p1904_p0 = scmp.ne.s32.totalorder %s2637_s5, %s1903_s27  ;;  %p1909_p3 = scmp.lt.u32.totalorder %s1903_s27, %s2637_s5 }
 0x86d   : > { %p1905_p1 = pnand %p1904_p0, %p1666_p6 }
 0x86f   : > { %p1906_p2 = pneg %p1905_p1 }
 0x871   : > { %p1911_p4 = pnand %p1909_p3, %p1906_p2 }
 0x873   : > { %1914 = shalt.err (!%p1911_p4)
}
 0x874   : > { %1659 = dma.vmem_to_hbm [thread:$0]  (%p1666_p6), %s1463_s20, 128, %s2637_s5, [#allocation5]  }
 0x875   : > { %s1915_s12 = scalar_lea.vmem %s1474_s24, 128  ;;  %p1922_p9 = scmp.lt.s32.totalorder %s1474_s24, %s1474_s24 }
 0x876   : > { %p1916_p5 = scmp.ne.s32.totalorder %s1474_s24, %s1915_s12  ;;  %p1923_p10 = scmp.lt.s32.totalorder %s1915_s12, %s1915_s12 }
 0x878   : > { %p1917_p7 = pnand %p1916_p5, %p1666_p6  ;;  %p1924_p11 = por %p1923_p10, %p1922_p9 }
 0x87a   : > { %p1918_p8 = pneg %p1917_p7 }
 0x87c   : > { %p1925_p12 = pnand %p1924_p11, %p1918_p8 }
 0x87e   : > { %1928 = shalt.err (!%p1925_p12)
}
 0x87f   : > { %s1929_s15 = scalar_lea.hbm %s2638_s6, 128 }
 0x880   : > { %p1930_p13 = scmp.ne.s32.totalorder %s2638_s6, %s1929_s15  ;;  %p1935_p2 = scmp.lt.u32.totalorder %s1929_s15, %s2638_s6 }
 0x882   : > { %p1931_p0 = pnand %p1930_p13, %p1666_p6 }
 0x884   : > { %p1932_p1 = pneg %p1931_p0 }
 0x886   : > { %p1937_p3 = pnand %p1935_p2, %p1932_p1 }
 0x888   : > { %1940 = shalt.err (!%p1937_p3)
}
 0x889   : > { %1661 = dma.vmem_to_hbm [thread:$0]  (%p1666_p6), %s1474_s24, 128, %s2638_s6, [#allocation7]  }
 0x88a   : > { %1946 = dma.done.wait (%p1666_p6), [#allocation5], 128  }
 0x88b   : > { %1948 = vsyncadd (%p1666_p6), [#allocation5], 4294967168 }
 0x88c   : > { %1950 = dma.done.wait (%p1666_p6), [#allocation7], 128  }
 0x88d   : > { %1952 = vsyncadd (%p1666_p6), [#allocation7], 4294967168 }
 0x88e PF: > { %s19_s21 = sadd.s32 1, %s1955_s21  }
 0x88f   : > { %p16_p4 = scmp.ge.s32.totalorder %s19_s21, 4  }
 0x891   :  { %18 = sbr.rel (!%p16_p4) target bundleno = 2 (0x2), region = 105 }
 0x898   :  { %1498 = vsyncpa [#allocation5], 1 }
 0x899   :  { %1500 = vsyncpa [#allocation5 + $0x1], 1 }
 0x89a   :  { %1501 = vsyncpa [#allocation7], 1 }

</bundles_post_ra>
